<compile_context>
chip_gen: v5e
topology: v5e:2x2
jax: 0.10.0
libtpu: 0.0.40
codegen_flags: <defaults>
</compile_context>

<pallas_src>
import functools
import math

import jax
import jax.numpy as jnp
from jax.experimental import pallas as pl
from jax.experimental.pallas import tpu as pltpu


# ---------------------------------------------------------------------------
# Kernel helpers
# ---------------------------------------------------------------------------
def _layer_norm(h, w, b, eps):
    mean = jnp.mean(h, axis=-1, keepdims=True)
    var = jnp.mean(jnp.square(h - mean), axis=-1, keepdims=True)
    return (h - mean) * jax.lax.rsqrt(var + eps) * w + b


# ---------------------------------------------------------------------------
# Pallas kernel: one encoder layer. grid = (B // batch_tile, num_I_tiles)
# ---------------------------------------------------------------------------
def _encoder_layer_kernel(
    x_ref,                                 # (TB, S, D)  f32
    ln1w_ref, ln1b_ref,                    # (1, D)      f32
    wqkv_ref, bqkv_ref,                    # (D, 3D) bf16 / (1, 3D) f32
    wo_ref, bo_ref,                        # (D, D)  bf16 / (1, D)  f32
    ln2w_ref, ln2b_ref,                    # (1, D)      f32
    w1_ref, b1_ref,                        # (D, TI) bf16 / (1, TI) f32
    w2_ref, b2_ref,                        # (TI, D) bf16 / (1, D)  f32
    o_ref,                                 # (TB, S, D)  f32
    acc_ref,                               # VMEM (TB*S, D) f32   fc2 accumulator
    h2_ref,                                # VMEM (TB*S, D) bf16  LN2 output
    q_scr, k_scr, v_scr,                   # VMEM (TB*H, S, hd) bf16
    ctx_scr,                               # VMEM (TB*H, S, hd) f32
    *, num_heads, head_dim, eps, head_chunk, batch_tile):

    i = pl.program_id(1)
    n_i = pl.num_programs(1)
    d_model = num_heads * head_dim
    s_len = x_ref.shape[1]
    rows = batch_tile * s_len

    # ----- attention + LN2, once per batch block (first I tile) -----
    @pl.when(i == 0)
    def _attention_and_ln2():
        x = x_ref[...].reshape(rows, d_model)                 # (TB*S, D) f32
        h = _layer_norm(x, ln1w_ref[0], ln1b_ref[0], eps)
        hb = h.astype(jnp.bfloat16)

        # Fused QKV projection: one N=3D MXU matmul, scale folded into Q.
        qkv = jnp.dot(hb, wqkv_ref[...],
                      preferred_element_type=jnp.float32) + bqkv_ref[0]
        q = qkv[:, :d_model] * (head_dim ** -0.5)
        k = qkv[:, d_model:2 * d_model]
        v = qkv[:, 2 * d_model:]

        # Head-leading (TB*H, S, hd) layout; relayout done once per tensor.
        for b in range(batch_tile):                            # static, TB<=4
            lo = b * s_len
            gd = pl.ds(b * num_heads, num_heads)
            q_scr[gd, :, :] = jnp.transpose(
                q[lo:lo + s_len].reshape(s_len, num_heads, head_dim),
                (1, 0, 2)).astype(jnp.bfloat16)
            k_scr[gd, :, :] = jnp.transpose(
                k[lo:lo + s_len].reshape(s_len, num_heads, head_dim),
                (1, 0, 2)).astype(jnp.bfloat16)
            v_scr[gd, :, :] = jnp.transpose(
                v[lo:lo + s_len].reshape(s_len, num_heads, head_dim),
                (1, 0, 2)).astype(jnp.bfloat16)

        # Chunked attention over the combined (batch, head) axis: only a
        # (head_chunk, S, S) score slab is live at any time.
        n_chunks = (batch_tile * num_heads) // head_chunk

        def chunk_body(c, carry):
            g0 = pl.multiple_of(c * head_chunk, head_chunk)
            qc = q_scr[pl.ds(g0, head_chunk), :, :]
            kc = k_scr[pl.ds(g0, head_chunk), :, :]
            vc = v_scr[pl.ds(g0, head_chunk), :, :]
            s = jnp.einsum("gqd,gkd->gqk", qc, kc,
                           preferred_element_type=jnp.float32)
            s = s - jnp.max(s, axis=-1, keepdims=True)         # f32 softmax
            p = jnp.exp(s)
            p = p * pl.reciprocal(jnp.sum(p, axis=-1, keepdims=True),
                                  approx=True)
            ctx_scr[pl.ds(g0, head_chunk), :, :] = jnp.einsum(
                "gqk,gkd->gqd", p.astype(jnp.bfloat16), vc,
                preferred_element_type=jnp.float32)
            return carry

        jax.lax.fori_loop(0, n_chunks, chunk_body, 0, unroll=False)

        # Out-projection, residual 1, LN2 (per batch element, static loop).
        for b in range(batch_tile):
            lo = b * s_len
            ctx_b = ctx_scr[pl.ds(b * num_heads, num_heads), :, :]  # (H,S,hd)
            ctx_b = jnp.transpose(ctx_b, (1, 0, 2)).reshape(s_len, d_model)
            attn_b = jnp.dot(ctx_b.astype(jnp.bfloat16), wo_ref[...],
                             preferred_element_type=jnp.float32) + bo_ref[0]
            xm_b = x[lo:lo + s_len] + attn_b                   # residual 1
            # Seed the MLP accumulator with residual-2 + fc2 bias (added once)
            acc_ref[pl.ds(lo, s_len), :] = xm_b + b2_ref[0]
            h2_ref[pl.ds(lo, s_len), :] = _layer_norm(
                xm_b, ln2w_ref[0], ln2b_ref[0], eps).astype(jnp.bfloat16)

    # ----- MLP: one streamed tile of the (padded) intermediate dimension -----
    f = jnp.dot(h2_ref[...], w1_ref[...],
                preferred_element_type=jnp.float32) + b1_ref[0]   # (TB*S, TI)
    c = math.sqrt(2.0 / math.pi)                                  # gelu(tanh)
    f = 0.5 * f * (1.0 + jnp.tanh(c * (f + 0.044715 * (f * f * f))))
    acc_ref[...] += jnp.dot(f.astype(jnp.bfloat16), w2_ref[...],
                            preferred_element_type=jnp.float32)

    @pl.when(i == n_i - 1)
    def _write_out():
        o_ref[...] = acc_ref[...].reshape(o_ref.shape)


# ---------------------------------------------------------------------------
# Wrapper helpers
# ---------------------------------------------------------------------------
def _vmem_capacity_bytes():
    try:
        return int(pltpu.get_tpu_info().vmem_capacity_bytes)
    except Exception:
        return 128 * 1024 * 1024


def _const_spec(shape, single_buffer):
    index_map = lambda b, i, _n=len(shape): (0,) * _n
    if single_buffer:
        # Constant block index -> one buffer is enough (saves VMEM on v7x).
        return pl.BlockSpec(shape, index_map, pipeline_mode=pl.Buffered(1))
    return pl.BlockSpec(shape, index_map)


def _layer_call(x, p, *, num_heads, eps, i_tile, batch_tile, head_chunk,
                vmem_limit, single_buffer_consts):
    B, S, D = x.shape
    I = p["w1"].shape[1]
    head_dim = D // num_heads
    tb = batch_tile
    rows = tb * S
    G = tb * num_heads

    # ---- host-side weight prep ----
    wqkv = jnp.concatenate([p["wq"], p["wk"], p["wv"]], axis=1)   # (D, 3D)
    bqkv = jnp.concatenate([p["bq"], p["bk"], p["bv"]], axis=1)   # (1, 3D)

    # Zero-pad the intermediate dim so streaming works for any I.
    if i_tile >= I:
        i_tile, i_pad = I, I
    else:
        i_tile = ((max(i_tile, 128) + 127) // 128) * 128
        if i_tile >= I:
            i_tile, i_pad = I, I
        else:
            i_pad = pl.cdiv(I, i_tile) * i_tile
    n_i = i_pad // i_tile
    if i_pad != I:
        pad = i_pad - I
        w1 = jnp.pad(p["w1"], ((0, 0), (0, pad)))   # padded cols -> 0
        b1 = jnp.pad(p["b1"], ((0, 0), (0, pad)))   # padded bias -> 0
        w2 = jnp.pad(p["w2"], ((0, pad), (0, 0)))   # padded rows -> 0
    else:
        w1, b1, w2 = p["w1"], p["b1"], p["w2"]

    kernel = functools.partial(
        _encoder_layer_kernel, num_heads=num_heads, head_dim=head_dim,
        eps=eps, head_chunk=head_chunk, batch_tile=tb)

    cs = lambda shape: _const_spec(shape, single_buffer_consts)
    in_specs = [
        pl.BlockSpec((tb, S, D), lambda b, i: (b, 0, 0)),   # x
        cs((1, D)), cs((1, D)),                             # ln1 w/b
        cs((D, 3 * D)), cs((1, 3 * D)),                     # fused wqkv/bqkv
        cs((D, D)), cs((1, D)),                             # wo/bo
        cs((1, D)), cs((1, D)),                             # ln2 w/b
        pl.BlockSpec((D, i_tile), lambda b, i: (0, i)),     # w1 tile (streamed)
        pl.BlockSpec((1, i_tile), lambda b, i: (0, i)),     # b1 tile
        pl.BlockSpec((i_tile, D), lambda b, i: (i, 0)),     # w2 tile (streamed)
        cs((1, D)),                                         # b2
    ]

    n_rev = B // tb                                   # fc-weight re-streaming
    flops = 2 * B * S * (4 * D * D + 2 * S * D + 2 * D * I)
    transcendentals = B * S * (num_heads * S + I)
    bytes_accessed = (
        (4 * D * D) * 2 + (9 * D) * 4                 # resident weights/biases
        + n_rev * (2 * D * i_pad * 2 + i_pad * 4)     # streamed fc1/fc2 + b1
        + 2 * B * S * D * 4)                          # activations in/out

    return pl.pallas_call(
        kernel,
        out_shape=jax.ShapeDtypeStruct((B, S, D), jnp.float32),
        grid_spec=pltpu.PrefetchScalarGridSpec(
            num_scalar_prefetch=0,
            grid=(B // tb, n_i),
            in_specs=in_specs,
            out_specs=pl.BlockSpec((tb, S, D), lambda b, i: (b, 0, 0)),
            scratch_shapes=[
                pltpu.VMEM((rows, D), jnp.float32),        # fc2 accumulator
                pltpu.VMEM((rows, D), jnp.bfloat16),       # LN2 output
                pltpu.VMEM((G, S, head_dim), jnp.bfloat16),  # Q (head-leading)
                pltpu.VMEM((G, S, head_dim), jnp.bfloat16),  # K
                pltpu.VMEM((G, S, head_dim), jnp.bfloat16),  # V
                pltpu.VMEM((G, S, head_dim), jnp.float32),   # attention ctx
            ],
        ),
        compiler_params=pltpu.CompilerParams(
            dimension_semantics=("parallel", "arbitrary"),
            vmem_limit_bytes=int(vmem_limit)),
        cost_estimate=pl.CostEstimate(
            flops=int(flops),
            transcendentals=int(transcendentals),
            bytes_accessed=int(bytes_accessed)),
    )(x, p["ln1w"], p["ln1b"], wqkv, bqkv, p["wo"], p["bo"],
      p["ln2w"], p["ln2b"], w1, b1, w2, p["b2"])


def siglip_encoder_layer(x, p, *, num_heads, eps, i_tile=None, batch_tile=None,
                         head_chunk=None):
    B, S, D = x.shape
    cap = _vmem_capacity_bytes()
    big_vmem = cap >= 100 * 1024 * 1024                 # v5e/v6e: 128 MiB
    vmem_limit = max(32 * 1024 * 1024,
                     min(cap - 8 * 1024 * 1024, 112 * 1024 * 1024))

    if i_tile is None:                                  # large tiles when VMEM allows
        i_tile = 2048 if big_vmem else 512
    if batch_tile is None:                              # amortize fc streaming
        batch_tile = 2 if big_vmem else 1
    batch_tile = max(1, min(batch_tile, B))
    while B % batch_tile:
        batch_tile -= 1
    if head_chunk is None:
        head_chunk = 8 if big_vmem else 4
    G = batch_tile * num_heads
    head_chunk = max(1, min(head_chunk, G))
    while G % head_chunk:
        head_chunk -= 1

    kwargs = dict(num_heads=num_heads, eps=eps, i_tile=i_tile,
                  batch_tile=batch_tile, head_chunk=head_chunk,
                  vmem_limit=vmem_limit)
    # Single-buffer the constant weight blocks only where VMEM is tight (v7x);
    # fall back to default double-buffering if this build rejects Buffered(1).
    if not big_vmem:
        try:
            return _layer_call(x, p, single_buffer_consts=True, **kwargs)
        except Exception:
            pass
    return _layer_call(x, p, single_buffer_consts=False, **kwargs)


def siglip_encoder(x, params, *, num_heads, eps, i_tile=None, batch_tile=None,
                   head_chunk=None):
    for p in params:
        x = siglip_encoder_layer(x, p, num_heads=num_heads, eps=eps,
                                 i_tile=i_tile, batch_tile=batch_tile,
                                 head_chunk=head_chunk)
    return x


# ---------------------------------------------------------------------------
# Plain-JAX f32 reference (mirrors the PyTorch forward exactly)
# ---------------------------------------------------------------------------
def _ref_layer(x, p, *, num_heads, eps):
    B, S, D = x.shape
    hd = D // num_heads
    f32 = lambda a: a.astype(jnp.float32)

    def ln(h, w, b):
        m = h.mean(-1, keepdims=True)
        v = ((h - m) ** 2).mean(-1, keepdims=True)
        return (h - m) / jnp.sqrt(v + eps) * w[0] + b[0]

    res = x
    h = ln(x, p["ln1w"], p["ln1b"])
    q = h @ f32(p["wq"]) + p["bq"][0]
    k = h @ f32(p["wk"]) + p["bk"][0]
    v = h @ f32(p["wv"]) + p["bv"][0]
    q = q.reshape(B, S, num_heads, hd).transpose(0, 2, 1, 3)
    k = k.reshape(B, S, num_heads, hd).transpose(0, 2, 1, 3)
    v = v.reshape(B, S, num_heads, hd).transpose(0, 2, 1, 3)
    w = jnp.einsum("bhqd,bhkd->bhqk", q, k) * (hd ** -0.5)
    w = jax.nn.softmax(w, axis=-1)
    o = jnp.einsum("bhqk,bhkd->bhqd", w, v)
    o = o.transpose(0, 2, 1, 3).reshape(B, S, D)
    o = o @ f32(p["wo"]) + p["bo"][0]
    x = res + o

    res = x
    h = ln(x, p["ln2w"], p["ln2b"])
    f = h @ f32(p["w1"]) + p["b1"][0]
    f = jax.nn.gelu(f, approximate=True)
    f = f @ f32(p["w2"]) + p["b2"][0]
    return res + f


def _ref_encoder(x, params, *, num_heads, eps):
    for p in params:
        x = _ref_layer(x, p, num_heads=num_heads, eps=eps)
    return x


# ---------------------------------------------------------------------------
# Deterministic parameter init (weights in bf16, biases/LN in f32)
# ---------------------------------------------------------------------------
def init_params(key, num_layers, D, I):
    params = []
    scale = 0.02
    bf16 = jnp.bfloat16
    for _ in range(num_layers):
        keys = jax.random.split(key, 8)
        key = keys[0]
        p = {
            "ln1w": jnp.ones((1, D), jnp.float32),
            "ln1b": jnp.zeros((1, D), jnp.float32),
            "wq": (scale * jax.random.normal(keys[1], (D, D))).astype(bf16),
            "bq": jnp.zeros((1, D), jnp.float32),
            "wk": (scale * jax.random.normal(keys[2], (D, D))).astype(bf16),
            "bk": jnp.zeros((1, D), jnp.float32),
            "wv": (scale * jax.random.normal(keys[3], (D, D))).astype(bf16),
            "bv": jnp.zeros((1, D), jnp.float32),
            "wo": (scale * jax.random.normal(keys[4], (D, D))).astype(bf16),
            "bo": jnp.zeros((1, D), jnp.float32),
            "ln2w": jnp.ones((1, D), jnp.float32),
            "ln2b": jnp.zeros((1, D), jnp.float32),
            "w1": (scale * jax.random.normal(keys[5], (D, I))).astype(bf16),
            "b1": 0.01 * jnp.ones((1, I), jnp.float32),
            "w2": (scale * jax.random.normal(keys[6], (I, D))).astype(bf16),
            "b2": 0.01 * jnp.ones((1, D), jnp.float32),
        }
        params.append(p)
    return params


if __name__ == "__main__":
    # Small SiglipVisonConfig-consistent shapes.
    batch = 2
    seq_len = 16          # num image tokens
    hidden = 64           # hidden_size
    intermediate = 320    # NOT a multiple of 128 -> exercises padded streaming
    num_heads = 4         # head_dim = 16
    num_layers = 2
    eps = 1e-6

    key = jax.random.PRNGKey(0)
    k_x, k_p = jax.random.split(key)
    x = jax.random.normal(k_x, (batch, seq_len, hidden), jnp.float32)
    params = init_params(k_p, num_layers, hidden, intermediate)

    # i_tile=128 -> 3 padded I-tiles; batch_tile=2 -> fc weights fetched once
    # per layer; head_chunk=2 with TB*H=8 -> 4 chunked-attention iterations.
    out = siglip_encoder(x, params, num_heads=num_heads, eps=eps,
                         i_tile=128, batch_tile=2, head_chunk=2)
    out = jax.block_until_ready(out)

    ref = _ref_encoder(x, params, num_heads=num_heads, eps=eps)
    assert out.shape == (batch, seq_len, hidden)
    max_err = float(jnp.max(jnp.abs(out - ref)))
    # bf16 activations/weights + approx reciprocal vs f32 reference.
    assert jnp.allclose(out, ref, rtol=2e-2, atol=2e-2), max_err
    print("KERNEL_OK")
</pallas_src>

<mosaic_0001>
module attributes {stable_mosaic.version = 11 : i64} {
  func.func @_encoder_layer_kernel(%arg0: i32, %arg1: i32, %arg2: memref<2x16x64xf32, #tpu.memory_space<vmem>>, %arg3: memref<1x64xf32, #tpu.memory_space<vmem>>, %arg4: memref<1x64xf32, #tpu.memory_space<vmem>>, %arg5: memref<64x192xbf16, #tpu.memory_space<vmem>>, %arg6: memref<1x192xf32, #tpu.memory_space<vmem>>, %arg7: memref<64x64xbf16, #tpu.memory_space<vmem>>, %arg8: memref<1x64xf32, #tpu.memory_space<vmem>>, %arg9: memref<1x64xf32, #tpu.memory_space<vmem>>, %arg10: memref<1x64xf32, #tpu.memory_space<vmem>>, %arg11: memref<64x128xbf16, #tpu.memory_space<vmem>>, %arg12: memref<1x128xf32, #tpu.memory_space<vmem>>, %arg13: memref<128x64xbf16, #tpu.memory_space<vmem>>, %arg14: memref<1x64xf32, #tpu.memory_space<vmem>>, %arg15: memref<2x16x64xf32, #tpu.memory_space<vmem>>, %arg16: memref<32x64xf32, #tpu.memory_space<vmem>>, %arg17: memref<32x64xbf16, #tpu.memory_space<vmem>>, %arg18: memref<8x16x16xbf16, #tpu.memory_space<vmem>>, %arg19: memref<8x16x16xbf16, #tpu.memory_space<vmem>>, %arg20: memref<8x16x16xbf16, #tpu.memory_space<vmem>>, %arg21: memref<8x16x16xf32, #tpu.memory_space<vmem>>) attributes {dimension_semantics = [#tpu.dimension_semantics<parallel>, #tpu.dimension_semantics<arbitrary>], iteration_bounds = array<i64: 1, 3>, scalar_prefetch = 0 : i64, scratch_operands = 6 : i64, tpu.core_type = #tpu.core_type<tc>, window_params = [{transform_indices = @transform_0, window_bounds = array<i64: 2, 16, 64>}, {pipeline_mode = #tpu.pipeline_mode<synchronous>, transform_indices = @transform_1, window_bounds = array<i64: 1, 64>}, {pipeline_mode = #tpu.pipeline_mode<synchronous>, transform_indices = @transform_2, window_bounds = array<i64: 1, 64>}, {pipeline_mode = #tpu.pipeline_mode<synchronous>, transform_indices = @transform_3, window_bounds = array<i64: 64, 192>}, {pipeline_mode = #tpu.pipeline_mode<synchronous>, transform_indices = @transform_4, window_bounds = array<i64: 1, 192>}, {pipeline_mode = #tpu.pipeline_mode<synchronous>, transform_indices = @transform_5, window_bounds = array<i64: 64, 64>}, {pipeline_mode = #tpu.pipeline_mode<synchronous>, transform_indices = @transform_6, window_bounds = array<i64: 1, 64>}, {pipeline_mode = #tpu.pipeline_mode<synchronous>, transform_indices = @transform_7, window_bounds = array<i64: 1, 64>}, {pipeline_mode = #tpu.pipeline_mode<synchronous>, transform_indices = @transform_8, window_bounds = array<i64: 1, 64>}, {transform_indices = @transform_9, window_bounds = array<i64: 64, 128>}, {transform_indices = @transform_10, window_bounds = array<i64: 1, 128>}, {transform_indices = @transform_11, window_bounds = array<i64: 128, 64>}, {pipeline_mode = #tpu.pipeline_mode<synchronous>, transform_indices = @transform_12, window_bounds = array<i64: 1, 64>}, {transform_indices = @transform_13, window_bounds = array<i64: 2, 16, 64>}]} {
    %c0_i32 = arith.constant 0 : i32
    %0 = arith.cmpi eq, %arg1, %c0_i32 : i32
    %1 = arith.extui %0 : i1 to i32
    %c0_i32_0 = arith.constant 0 : i32
    %2 = arith.cmpi ne, %1, %c0_i32_0 : i32
    scf.if %2 {
      %c0_18 = arith.constant 0 : index
      %c0_19 = arith.constant 0 : index
      %c0_20 = arith.constant 0 : index
      %33 = vector.load %arg2[%c0_18, %c0_19, %c0_20] : memref<2x16x64xf32, #tpu.memory_space<vmem>>, vector<2x16x64xf32>
      %34 = vector.shape_cast %33 : vector<2x16x64xf32> to vector<32x64xf32>
      %c0_21 = arith.constant 0 : index
      %c0_22 = arith.constant 0 : index
      %35 = vector.load %arg3[%c0_21, %c0_22] : memref<1x64xf32, #tpu.memory_space<vmem>>, vector<1x64xf32>
      %36 = vector.shape_cast %35 : vector<1x64xf32> to vector<64xf32>
      %c0_23 = arith.constant 0 : index
      %c0_24 = arith.constant 0 : index
      %37 = vector.load %arg4[%c0_23, %c0_24] : memref<1x64xf32, #tpu.memory_space<vmem>>, vector<1x64xf32>
      %38 = vector.shape_cast %37 : vector<1x64xf32> to vector<64xf32>
      %cst_25 = arith.constant dense<0.000000e+00> : vector<32xf32>
      %39 = vector.multi_reduction <add>, %34, %cst_25 [1] : vector<32x64xf32> to vector<32xf32>
      %40 = vector.shape_cast %39 : vector<32xf32> to vector<32x1xf32>
      %cst_26 = arith.constant 6.400000e+01 : f32
      %41 = vector.broadcast %cst_26 : f32 to vector<32x1xf32>
      %42 = arith.divf %40, %41 : vector<32x1xf32>
      %43 = vector.broadcast %42 : vector<32x1xf32> to vector<32x64xf32>
      %44 = arith.subf %34, %43 : vector<32x64xf32>
      %45 = arith.mulf %44, %44 : vector<32x64xf32>
      %cst_27 = arith.constant dense<0.000000e+00> : vector<32xf32>
      %46 = vector.multi_reduction <add>, %45, %cst_27 [1] : vector<32x64xf32> to vector<32xf32>
      %47 = vector.shape_cast %46 : vector<32xf32> to vector<32x1xf32>
      %cst_28 = arith.constant 6.400000e+01 : f32
      %48 = vector.broadcast %cst_28 : f32 to vector<32x1xf32>
      %49 = arith.divf %47, %48 : vector<32x1xf32>
      %50 = vector.broadcast %42 : vector<32x1xf32> to vector<32x64xf32>
      %51 = arith.subf %34, %50 : vector<32x64xf32>
      %cst_29 = arith.constant 9.99999997E-7 : f32
      %52 = vector.broadcast %cst_29 : f32 to vector<32x1xf32>
      %53 = arith.addf %49, %52 : vector<32x1xf32>
      %54 = math.rsqrt %53 : vector<32x1xf32>
      %55 = vector.broadcast %54 : vector<32x1xf32> to vector<32x64xf32>
      %56 = arith.mulf %51, %55 : vector<32x64xf32>
      %57 = vector.shape_cast %36 : vector<64xf32> to vector<1x64xf32>
      %58 = vector.broadcast %57 : vector<1x64xf32> to vector<32x64xf32>
      %59 = arith.mulf %56, %58 : vector<32x64xf32>
      %60 = vector.shape_cast %38 : vector<64xf32> to vector<1x64xf32>
      %61 = vector.broadcast %60 : vector<1x64xf32> to vector<32x64xf32>
      %62 = arith.addf %59, %61 : vector<32x64xf32>
      %63 = arith.truncf %62 : vector<32x64xf32> to vector<32x64xbf16>
      %c0_30 = arith.constant 0 : index
      %c0_31 = arith.constant 0 : index
      %64 = vector.load %arg5[%c0_30, %c0_31] : memref<64x192xbf16, #tpu.memory_space<vmem>>, vector<64x192xbf16>
      %cst_32 = arith.constant dense<0.000000e+00> : vector<32x192xf32>
      %65 = tpu.matmul %63, %64, %cst_32 {dimension_numbers = #tpu.dot_dimension_numbers<[1], [0], [0], [1], [0, 0, 1, 1], [], []>} : vector<32x64xbf16>, vector<64x192xbf16>, vector<32x192xf32> -> vector<32x192xf32>
      %c0_33 = arith.constant 0 : index
      %c0_34 = arith.constant 0 : index
      %66 = vector.load %arg6[%c0_33, %c0_34] : memref<1x192xf32, #tpu.memory_space<vmem>>, vector<1x192xf32>
      %67 = vector.shape_cast %66 : vector<1x192xf32> to vector<192xf32>
      %68 = vector.shape_cast %67 : vector<192xf32> to vector<1x192xf32>
      %69 = vector.broadcast %68 : vector<1x192xf32> to vector<32x192xf32>
      %70 = arith.addf %65, %69 : vector<32x192xf32>
      %71 = vector.extract_strided_slice %70 {offsets = [0, 0], sizes = [32, 64], strides = [1, 1]} : vector<32x192xf32> to vector<32x64xf32>
      %cst_35 = arith.constant 2.500000e-01 : f32
      %72 = vector.broadcast %cst_35 : f32 to vector<32x64xf32>
      %73 = arith.mulf %71, %72 : vector<32x64xf32>
      %74 = vector.extract_strided_slice %70 {offsets = [0, 64], sizes = [32, 64], strides = [1, 1]} : vector<32x192xf32> to vector<32x64xf32>
      %75 = vector.extract_strided_slice %70 {offsets = [0, 128], sizes = [32, 64], strides = [1, 1]} : vector<32x192xf32> to vector<32x64xf32>
      %76 = vector.extract_strided_slice %73 {offsets = [0, 0], sizes = [16, 64], strides = [1, 1]} : vector<32x64xf32> to vector<16x64xf32>
      %77 = vector.shape_cast %76 : vector<16x64xf32> to vector<16x4x16xf32>
      %78 = tpu.transpose %77, [1, 0, 2] : vector<16x4x16xf32> -> vector<4x16x16xf32>
      %79 = arith.truncf %78 : vector<4x16x16xf32> to vector<4x16x16xbf16>
      %c0_36 = arith.constant 0 : index
      %c0_37 = arith.constant 0 : index
      %c0_38 = arith.constant 0 : index
      %80 = vector.load %arg18[%c0_36, %c0_37, %c0_38] : memref<8x16x16xbf16, #tpu.memory_space<vmem>>, vector<4x16x16xbf16>
      tpu.vector_store %arg18[%c0_36, %c0_37, %c0_38], %79 {strides = array<i32>} : memref<8x16x16xbf16, #tpu.memory_space<vmem>>, vector<4x16x16xbf16>,
      %81 = vector.extract_strided_slice %74 {offsets = [0, 0], sizes = [16, 64], strides = [1, 1]} : vector<32x64xf32> to vector<16x64xf32>
      %82 = vector.shape_cast %81 : vector<16x64xf32> to vector<16x4x16xf32>
      %83 = tpu.transpose %82, [1, 0, 2] : vector<16x4x16xf32> -> vector<4x16x16xf32>
      %84 = arith.truncf %83 : vector<4x16x16xf32> to vector<4x16x16xbf16>
      %c0_39 = arith.constant 0 : index
      %c0_40 = arith.constant 0 : index
      %c0_41 = arith.constant 0 : index
      %85 = vector.load %arg19[%c0_39, %c0_40, %c0_41] : memref<8x16x16xbf16, #tpu.memory_space<vmem>>, vector<4x16x16xbf16>
      tpu.vector_store %arg19[%c0_39, %c0_40, %c0_41], %84 {strides = array<i32>} : memref<8x16x16xbf16, #tpu.memory_space<vmem>>, vector<4x16x16xbf16>,
      %86 = vector.extract_strided_slice %75 {offsets = [0, 0], sizes = [16, 64], strides = [1, 1]} : vector<32x64xf32> to vector<16x64xf32>
      %87 = vector.shape_cast %86 : vector<16x64xf32> to vector<16x4x16xf32>
      %88 = tpu.transpose %87, [1, 0, 2] : vector<16x4x16xf32> -> vector<4x16x16xf32>
      %89 = arith.truncf %88 : vector<4x16x16xf32> to vector<4x16x16xbf16>
      %c0_42 = arith.constant 0 : index
      %c0_43 = arith.constant 0 : index
      %c0_44 = arith.constant 0 : index
      %90 = vector.load %arg20[%c0_42, %c0_43, %c0_44] : memref<8x16x16xbf16, #tpu.memory_space<vmem>>, vector<4x16x16xbf16>
      tpu.vector_store %arg20[%c0_42, %c0_43, %c0_44], %89 {strides = array<i32>} : memref<8x16x16xbf16, #tpu.memory_space<vmem>>, vector<4x16x16xbf16>,
      %91 = vector.extract_strided_slice %73 {offsets = [16, 0], sizes = [16, 64], strides = [1, 1]} : vector<32x64xf32> to vector<16x64xf32>
      %92 = vector.shape_cast %91 : vector<16x64xf32> to vector<16x4x16xf32>
      %93 = tpu.transpose %92, [1, 0, 2] : vector<16x4x16xf32> -> vector<4x16x16xf32>
      %94 = arith.truncf %93 : vector<4x16x16xf32> to vector<4x16x16xbf16>
      %c4 = arith.constant 4 : index
      %c0_45 = arith.constant 0 : index
      %c0_46 = arith.constant 0 : index
      %95 = vector.load %arg18[%c4, %c0_45, %c0_46] : memref<8x16x16xbf16, #tpu.memory_space<vmem>>, vector<4x16x16xbf16>
      tpu.vector_store %arg18[%c4, %c0_45, %c0_46], %94 {strides = array<i32>} : memref<8x16x16xbf16, #tpu.memory_space<vmem>>, vector<4x16x16xbf16>,
      %96 = vector.extract_strided_slice %74 {offsets = [16, 0], sizes = [16, 64], strides = [1, 1]} : vector<32x64xf32> to vector<16x64xf32>
      %97 = vector.shape_cast %96 : vector<16x64xf32> to vector<16x4x16xf32>
      %98 = tpu.transpose %97, [1, 0, 2] : vector<16x4x16xf32> -> vector<4x16x16xf32>
      %99 = arith.truncf %98 : vector<4x16x16xf32> to vector<4x16x16xbf16>
      %c4_47 = arith.constant 4 : index
      %c0_48 = arith.constant 0 : index
      %c0_49 = arith.constant 0 : index
      %100 = vector.load %arg19[%c4_47, %c0_48, %c0_49] : memref<8x16x16xbf16, #tpu.memory_space<vmem>>, vector<4x16x16xbf16>
      tpu.vector_store %arg19[%c4_47, %c0_48, %c0_49], %99 {strides = array<i32>} : memref<8x16x16xbf16, #tpu.memory_space<vmem>>, vector<4x16x16xbf16>,
      %101 = vector.extract_strided_slice %75 {offsets = [16, 0], sizes = [16, 64], strides = [1, 1]} : vector<32x64xf32> to vector<16x64xf32>
      %102 = vector.shape_cast %101 : vector<16x64xf32> to vector<16x4x16xf32>
      %103 = tpu.transpose %102, [1, 0, 2] : vector<16x4x16xf32> -> vector<4x16x16xf32>
      %104 = arith.truncf %103 : vector<4x16x16xf32> to vector<4x16x16xbf16>
      %c4_50 = arith.constant 4 : index
      %c0_51 = arith.constant 0 : index
      %c0_52 = arith.constant 0 : index
      %105 = vector.load %arg20[%c4_50, %c0_51, %c0_52] : memref<8x16x16xbf16, #tpu.memory_space<vmem>>, vector<4x16x16xbf16>
      tpu.vector_store %arg20[%c4_50, %c0_51, %c0_52], %104 {strides = array<i32>} : memref<8x16x16xbf16, #tpu.memory_space<vmem>>, vector<4x16x16xbf16>,
      %c0_i32_53 = arith.constant 0 : i32
      %c4_i32 = arith.constant 4 : i32
      %106 = arith.addi %c0_i32_53, %c4_i32 : i32
      %c1_i32 = arith.constant 1 : i32
      scf.for %arg22 = %c0_i32_53 to %106 step %c1_i32  : i32 {
        %c2_i32_100 = arith.constant 2 : i32
        %205 = arith.muli %arg22, %c2_i32_100 : i32
        %206 = tpu.assume_multiple %205, 2 : i32
        %207 = arith.index_cast %206 : i32 to index
        %c0_101 = arith.constant 0 : index
        %c0_102 = arith.constant 0 : index
        %208 = vector.load %arg18[%207, %c0_101, %c0_102] : memref<8x16x16xbf16, #tpu.memory_space<vmem>>, vector<2x16x16xbf16>
        %209 = arith.index_cast %206 : i32 to index
        %c0_103 = arith.constant 0 : index
        %c0_104 = arith.constant 0 : index
        %210 = vector.load %arg19[%209, %c0_103, %c0_104] : memref<8x16x16xbf16, #tpu.memory_space<vmem>>, vector<2x16x16xbf16>
        %211 = arith.index_cast %206 : i32 to index
        %c0_105 = arith.constant 0 : index
        %c0_106 = arith.constant 0 : index
        %212 = vector.load %arg20[%211, %c0_105, %c0_106] : memref<8x16x16xbf16, #tpu.memory_space<vmem>>, vector<2x16x16xbf16>
        "tpu.trace_start"() <{level = 10 : i32, message = "gqd,gkd->gqk"}> : () -> ()
        %cst_107 = arith.constant dense<0.000000e+00> : vector<2x16x16xf32>
        %213 = tpu.matmul %208, %210, %cst_107 {dimension_numbers = #tpu.dot_dimension_numbers<[2], [2], [1], [1], [0, 0, 0, 1, 1, 1], [0], [0]>} : vector<2x16x16xbf16>, vector<2x16x16xbf16>, vector<2x16x16xf32> -> vector<2x16x16xf32>
        "tpu.trace_stop"() : () -> ()
        %cst_108 = arith.constant dense<0xFF800000> : vector<2x16xf32>
        %214 = vector.multi_reduction <maximumf>, %213, %cst_108 [2] : vector<2x16x16xf32> to vector<2x16xf32>
        %215 = vector.shape_cast %214 : vector<2x16xf32> to vector<2x16x1xf32>
        %216 = vector.broadcast %215 : vector<2x16x1xf32> to vector<2x16x16xf32>
        %217 = arith.subf %213, %216 : vector<2x16x16xf32>
        %218 = math.exp %217 : vector<2x16x16xf32>
        %cst_109 = arith.constant dense<0.000000e+00> : vector<2x16xf32>
        %219 = vector.multi_reduction <add>, %218, %cst_109 [2] : vector<2x16x16xf32> to vector<2x16xf32>
        %220 = vector.shape_cast %219 : vector<2x16xf32> to vector<2x16x1xf32>
        %221 = tpu.reciprocal %220 {approx = true} : vector<2x16x1xf32> -> vector<2x16x1xf32>
        %222 = vector.broadcast %221 : vector<2x16x1xf32> to vector<2x16x16xf32>
        %223 = arith.mulf %218, %222 : vector<2x16x16xf32>
        %224 = arith.truncf %223 : vector<2x16x16xf32> to vector<2x16x16xbf16>
        "tpu.trace_start"() <{level = 10 : i32, message = "gqk,gkd->gqd"}> : () -> ()
        %cst_110 = arith.constant dense<0.000000e+00> : vector<2x16x16xf32>
        %225 = tpu.matmul %224, %212, %cst_110 {dimension_numbers = #tpu.dot_dimension_numbers<[2], [1], [1], [2], [0, 0, 0, 1, 1, 2], [0], [0]>} : vector<2x16x16xbf16>, vector<2x16x16xbf16>, vector<2x16x16xf32> -> vector<2x16x16xf32>
        "tpu.trace_stop"() : () -> ()
        %226 = arith.index_cast %206 : i32 to index
        %c0_111 = arith.constant 0 : index
        %c0_112 = arith.constant 0 : index
        %227 = vector.load %arg21[%226, %c0_111, %c0_112] : memref<8x16x16xf32, #tpu.memory_space<vmem>>, vector<2x16x16xf32>
        tpu.vector_store %arg21[%226, %c0_111, %c0_112], %225 {strides = array<i32>} : memref<8x16x16xf32, #tpu.memory_space<vmem>>, vector<2x16x16xf32>,
      }
      %c4_i32_54 = arith.constant 4 : i32
      %c0_55 = arith.constant 0 : index
      %c0_56 = arith.constant 0 : index
      %c0_57 = arith.constant 0 : index
      %107 = vector.load %arg21[%c0_55, %c0_56, %c0_57] : memref<8x16x16xf32, #tpu.memory_space<vmem>>, vector<4x16x16xf32>
      %108 = tpu.transpose %107, [1, 0, 2] : vector<4x16x16xf32> -> vector<16x4x16xf32>
      %109 = vector.shape_cast %108 : vector<16x4x16xf32> to vector<16x64xf32>
      %110 = arith.truncf %109 : vector<16x64xf32> to vector<16x64xbf16>
      %c0_58 = arith.constant 0 : index
      %c0_59 = arith.constant 0 : index
      %111 = vector.load %arg7[%c0_58, %c0_59] : memref<64x64xbf16, #tpu.memory_space<vmem>>, vector<64x64xbf16>
      %cst_60 = arith.constant dense<0.000000e+00> : vector<16x64xf32>
      %112 = tpu.matmul %110, %111, %cst_60 {dimension_numbers = #tpu.dot_dimension_numbers<[1], [0], [0], [1], [0, 0, 1, 1], [], []>} : vector<16x64xbf16>, vector<64x64xbf16>, vector<16x64xf32> -> vector<16x64xf32>
      %c0_61 = arith.constant 0 : index
      %c0_62 = arith.constant 0 : index
      %113 = vector.load %arg8[%c0_61, %c0_62] : memref<1x64xf32, #tpu.memory_space<vmem>>, vector<1x64xf32>
      %114 = vector.shape_cast %113 : vector<1x64xf32> to vector<64xf32>
      %115 = vector.shape_cast %114 : vector<64xf32> to vector<1x64xf32>
      %116 = vector.broadcast %115 : vector<1x64xf32> to vector<16x64xf32>
      %117 = arith.addf %112, %116 : vector<16x64xf32>
      %118 = vector.extract_strided_slice %34 {offsets = [0, 0], sizes = [16, 64], strides = [1, 1]} : vector<32x64xf32> to vector<16x64xf32>
      %119 = arith.addf %118, %117 : vector<16x64xf32>
      %c0_63 = arith.constant 0 : index
      %c0_64 = arith.constant 0 : index
      %120 = vector.load %arg14[%c0_63, %c0_64] : memref<1x64xf32, #tpu.memory_space<vmem>>, vector<1x64xf32>
      %121 = vector.shape_cast %120 : vector<1x64xf32> to vector<64xf32>
      %122 = vector.shape_cast %121 : vector<64xf32> to vector<1x64xf32>
      %123 = vector.broadcast %122 : vector<1x64xf32> to vector<16x64xf32>
      %124 = arith.addf %119, %123 : vector<16x64xf32>
      %c0_65 = arith.constant 0 : index
      %c0_66 = arith.constant 0 : index
      %125 = vector.load %arg16[%c0_65, %c0_66] : memref<32x64xf32, #tpu.memory_space<vmem>>, vector<16x64xf32>
      tpu.vector_store %arg16[%c0_65, %c0_66], %124 {strides = array<i32>} : memref<32x64xf32, #tpu.memory_space<vmem>>, vector<16x64xf32>,
      %c0_67 = arith.constant 0 : index
      %c0_68 = arith.constant 0 : index
      %126 = vector.load %arg9[%c0_67, %c0_68] : memref<1x64xf32, #tpu.memory_space<vmem>>, vector<1x64xf32>
      %127 = vector.shape_cast %126 : vector<1x64xf32> to vector<64xf32>
      %c0_69 = arith.constant 0 : index
      %c0_70 = arith.constant 0 : index
      %128 = vector.load %arg10[%c0_69, %c0_70] : memref<1x64xf32, #tpu.memory_space<vmem>>, vector<1x64xf32>
      %129 = vector.shape_cast %128 : vector<1x64xf32> to vector<64xf32>
      %cst_71 = arith.constant dense<0.000000e+00> : vector<16xf32>
      %130 = vector.multi_reduction <add>, %119, %cst_71 [1] : vector<16x64xf32> to vector<16xf32>
      %131 = vector.shape_cast %130 : vector<16xf32> to vector<16x1xf32>
      %cst_72 = arith.constant 6.400000e+01 : f32
      %132 = vector.broadcast %cst_72 : f32 to vector<16x1xf32>
      %133 = arith.divf %131, %132 : vector<16x1xf32>
      %134 = vector.broadcast %133 : vector<16x1xf32> to vector<16x64xf32>
      %135 = arith.subf %119, %134 : vector<16x64xf32>
      %136 = arith.mulf %135, %135 : vector<16x64xf32>
      %cst_73 = arith.constant dense<0.000000e+00> : vector<16xf32>
      %137 = vector.multi_reduction <add>, %136, %cst_73 [1] : vector<16x64xf32> to vector<16xf32>
      %138 = vector.shape_cast %137 : vector<16xf32> to vector<16x1xf32>
      %cst_74 = arith.constant 6.400000e+01 : f32
      %139 = vector.broadcast %cst_74 : f32 to vector<16x1xf32>
      %140 = arith.divf %138, %139 : vector<16x1xf32>
      %141 = vector.broadcast %133 : vector<16x1xf32> to vector<16x64xf32>
      %142 = arith.subf %119, %141 : vector<16x64xf32>
      %cst_75 = arith.constant 9.99999997E-7 : f32
      %143 = vector.broadcast %cst_75 : f32 to vector<16x1xf32>
      %144 = arith.addf %140, %143 : vector<16x1xf32>
      %145 = math.rsqrt %144 : vector<16x1xf32>
      %146 = vector.broadcast %145 : vector<16x1xf32> to vector<16x64xf32>
      %147 = arith.mulf %142, %146 : vector<16x64xf32>
      %148 = vector.shape_cast %127 : vector<64xf32> to vector<1x64xf32>
      %149 = vector.broadcast %148 : vector<1x64xf32> to vector<16x64xf32>
      %150 = arith.mulf %147, %149 : vector<16x64xf32>
      %151 = vector.shape_cast %129 : vector<64xf32> to vector<1x64xf32>
      %152 = vector.broadcast %151 : vector<1x64xf32> to vector<16x64xf32>
      %153 = arith.addf %150, %152 : vector<16x64xf32>
      %154 = arith.truncf %153 : vector<16x64xf32> to vector<16x64xbf16>
      %c0_76 = arith.constant 0 : index
      %c0_77 = arith.constant 0 : index
      %155 = vector.load %arg17[%c0_76, %c0_77] : memref<32x64xbf16, #tpu.memory_space<vmem>>, vector<16x64xbf16>
      tpu.vector_store %arg17[%c0_76, %c0_77], %154 {strides = array<i32>} : memref<32x64xbf16, #tpu.memory_space<vmem>>, vector<16x64xbf16>,
      %c4_78 = arith.constant 4 : index
      %c0_79 = arith.constant 0 : index
      %c0_80 = arith.constant 0 : index
      %156 = vector.load %arg21[%c4_78, %c0_79, %c0_80] : memref<8x16x16xf32, #tpu.memory_space<vmem>>, vector<4x16x16xf32>
      %157 = tpu.transpose %156, [1, 0, 2] : vector<4x16x16xf32> -> vector<16x4x16xf32>
      %158 = vector.shape_cast %157 : vector<16x4x16xf32> to vector<16x64xf32>
      %159 = arith.truncf %158 : vector<16x64xf32> to vector<16x64xbf16>
      %c0_81 = arith.constant 0 : index
      %c0_82 = arith.constant 0 : index
      %160 = vector.load %arg7[%c0_81, %c0_82] : memref<64x64xbf16, #tpu.memory_space<vmem>>, vector<64x64xbf16>
      %cst_83 = arith.constant dense<0.000000e+00> : vector<16x64xf32>
      %161 = tpu.matmul %159, %160, %cst_83 {dimension_numbers = #tpu.dot_dimension_numbers<[1], [0], [0], [1], [0, 0, 1, 1], [], []>} : vector<16x64xbf16>, vector<64x64xbf16>, vector<16x64xf32> -> vector<16x64xf32>
      %c0_84 = arith.constant 0 : index
      %c0_85 = arith.constant 0 : index
      %162 = vector.load %arg8[%c0_84, %c0_85] : memref<1x64xf32, #tpu.memory_space<vmem>>, vector<1x64xf32>
      %163 = vector.shape_cast %162 : vector<1x64xf32> to vector<64xf32>
      %164 = vector.shape_cast %163 : vector<64xf32> to vector<1x64xf32>
      %165 = vector.broadcast %164 : vector<1x64xf32> to vector<16x64xf32>
      %166 = arith.addf %161, %165 : vector<16x64xf32>
      %167 = vector.extract_strided_slice %34 {offsets = [16, 0], sizes = [16, 64], strides = [1, 1]} : vector<32x64xf32> to vector<16x64xf32>
      %168 = arith.addf %167, %166 : vector<16x64xf32>
      %c0_86 = arith.constant 0 : index
      %c0_87 = arith.constant 0 : index
      %169 = vector.load %arg14[%c0_86, %c0_87] : memref<1x64xf32, #tpu.memory_space<vmem>>, vector<1x64xf32>
      %170 = vector.shape_cast %169 : vector<1x64xf32> to vector<64xf32>
      %171 = vector.shape_cast %170 : vector<64xf32> to vector<1x64xf32>
      %172 = vector.broadcast %171 : vector<1x64xf32> to vector<16x64xf32>
      %173 = arith.addf %168, %172 : vector<16x64xf32>
      %c16 = arith.constant 16 : index
      %c0_88 = arith.constant 0 : index
      %174 = vector.load %arg16[%c16, %c0_88] : memref<32x64xf32, #tpu.memory_space<vmem>>, vector<16x64xf32>
      tpu.vector_store %arg16[%c16, %c0_88], %173 {strides = array<i32>} : memref<32x64xf32, #tpu.memory_space<vmem>>, vector<16x64xf32>,
      %c0_89 = arith.constant 0 : index
      %c0_90 = arith.constant 0 : index
      %175 = vector.load %arg9[%c0_89, %c0_90] : memref<1x64xf32, #tpu.memory_space<vmem>>, vector<1x64xf32>
      %176 = vector.shape_cast %175 : vector<1x64xf32> to vector<64xf32>
      %c0_91 = arith.constant 0 : index
      %c0_92 = arith.constant 0 : index
      %177 = vector.load %arg10[%c0_91, %c0_92] : memref<1x64xf32, #tpu.memory_space<vmem>>, vector<1x64xf32>
      %178 = vector.shape_cast %177 : vector<1x64xf32> to vector<64xf32>
      %cst_93 = arith.constant dense<0.000000e+00> : vector<16xf32>
      %179 = vector.multi_reduction <add>, %168, %cst_93 [1] : vector<16x64xf32> to vector<16xf32>
      %180 = vector.shape_cast %179 : vector<16xf32> to vector<16x1xf32>
      %cst_94 = arith.constant 6.400000e+01 : f32
      %181 = vector.broadcast %cst_94 : f32 to vector<16x1xf32>
      %182 = arith.divf %180, %181 : vector<16x1xf32>
      %183 = vector.broadcast %182 : vector<16x1xf32> to vector<16x64xf32>
      %184 = arith.subf %168, %183 : vector<16x64xf32>
      %185 = arith.mulf %184, %184 : vector<16x64xf32>
      %cst_95 = arith.constant dense<0.000000e+00> : vector<16xf32>
      %186 = vector.multi_reduction <add>, %185, %cst_95 [1] : vector<16x64xf32> to vector<16xf32>
      %187 = vector.shape_cast %186 : vector<16xf32> to vector<16x1xf32>
      %cst_96 = arith.constant 6.400000e+01 : f32
      %188 = vector.broadcast %cst_96 : f32 to vector<16x1xf32>
      %189 = arith.divf %187, %188 : vector<16x1xf32>
      %190 = vector.broadcast %182 : vector<16x1xf32> to vector<16x64xf32>
      %191 = arith.subf %168, %190 : vector<16x64xf32>
      %cst_97 = arith.constant 9.99999997E-7 : f32
      %192 = vector.broadcast %cst_97 : f32 to vector<16x1xf32>
      %193 = arith.addf %189, %192 : vector<16x1xf32>
      %194 = math.rsqrt %193 : vector<16x1xf32>
      %195 = vector.broadcast %194 : vector<16x1xf32> to vector<16x64xf32>
      %196 = arith.mulf %191, %195 : vector<16x64xf32>
      %197 = vector.shape_cast %176 : vector<64xf32> to vector<1x64xf32>
      %198 = vector.broadcast %197 : vector<1x64xf32> to vector<16x64xf32>
      %199 = arith.mulf %196, %198 : vector<16x64xf32>
      %200 = vector.shape_cast %178 : vector<64xf32> to vector<1x64xf32>
      %201 = vector.broadcast %200 : vector<1x64xf32> to vector<16x64xf32>
      %202 = arith.addf %199, %201 : vector<16x64xf32>
      %203 = arith.truncf %202 : vector<16x64xf32> to vector<16x64xbf16>
      %c16_98 = arith.constant 16 : index
      %c0_99 = arith.constant 0 : index
      %204 = vector.load %arg17[%c16_98, %c0_99] : memref<32x64xbf16, #tpu.memory_space<vmem>>, vector<16x64xbf16>
      tpu.vector_store %arg17[%c16_98, %c0_99], %203 {strides = array<i32>} : memref<32x64xbf16, #tpu.memory_space<vmem>>, vector<16x64xbf16>,
    } else {
    }
    %c0 = arith.constant 0 : index
    %c0_1 = arith.constant 0 : index
    %3 = vector.load %arg17[%c0, %c0_1] : memref<32x64xbf16, #tpu.memory_space<vmem>>, vector<32x64xbf16>
    %c0_2 = arith.constant 0 : index
    %c0_3 = arith.constant 0 : index
    %4 = vector.load %arg11[%c0_2, %c0_3] : memref<64x128xbf16, #tpu.memory_space<vmem>>, vector<64x128xbf16>
    %cst = arith.constant dense<0.000000e+00> : vector<32x128xf32>
    %5 = tpu.matmul %3, %4, %cst {dimension_numbers = #tpu.dot_dimension_numbers<[1], [0], [0], [1], [0, 0, 1, 1], [], []>} : vector<32x64xbf16>, vector<64x128xbf16>, vector<32x128xf32> -> vector<32x128xf32>
    %c0_4 = arith.constant 0 : index
    %c0_5 = arith.constant 0 : index
    %6 = vector.load %arg12[%c0_4, %c0_5] : memref<1x128xf32, #tpu.memory_space<vmem>>, vector<1x128xf32>
    %7 = vector.shape_cast %6 : vector<1x128xf32> to vector<128xf32>
    %8 = vector.shape_cast %7 : vector<128xf32> to vector<1x128xf32>
    %9 = vector.broadcast %8 : vector<1x128xf32> to vector<32x128xf32>
    %10 = arith.addf %5, %9 : vector<32x128xf32>
    %cst_6 = arith.constant 5.000000e-01 : f32
    %11 = vector.broadcast %cst_6 : f32 to vector<32x128xf32>
    %12 = arith.mulf %11, %10 : vector<32x128xf32>
    %13 = arith.mulf %10, %10 : vector<32x128xf32>
    %14 = arith.mulf %13, %10 : vector<32x128xf32>
    %cst_7 = arith.constant 4.471500e-02 : f32
    %15 = vector.broadcast %cst_7 : f32 to vector<32x128xf32>
    %16 = arith.mulf %15, %14 : vector<32x128xf32>
    %17 = arith.addf %10, %16 : vector<32x128xf32>
    %cst_8 = arith.constant 0.797884583 : f32
    %18 = vector.broadcast %cst_8 : f32 to vector<32x128xf32>
    %19 = arith.mulf %18, %17 : vector<32x128xf32>
    %20 = math.tanh %19 : vector<32x128xf32>
    %cst_9 = arith.constant 1.000000e+00 : f32
    %21 = vector.broadcast %cst_9 : f32 to vector<32x128xf32>
    %22 = arith.addf %21, %20 : vector<32x128xf32>
    %23 = arith.mulf %12, %22 : vector<32x128xf32>
    %c0_10 = arith.constant 0 : index
    %c0_11 = arith.constant 0 : index
    %24 = vector.load %arg16[%c0_10, %c0_11] : memref<32x64xf32, #tpu.memory_space<vmem>>, vector<32x64xf32>
    %25 = arith.truncf %23 : vector<32x128xf32> to vector<32x128xbf16>
    %c0_12 = arith.constant 0 : index
    %c0_13 = arith.constant 0 : index
    %26 = vector.load %arg13[%c0_12, %c0_13] : memref<128x64xbf16, #tpu.memory_space<vmem>>, vector<128x64xbf16>
    %cst_14 = arith.constant dense<0.000000e+00> : vector<32x64xf32>
    %27 = tpu.matmul %25, %26, %cst_14 {dimension_numbers = #tpu.dot_dimension_numbers<[1], [0], [0], [1], [0, 0, 1, 1], [], []>} : vector<32x128xbf16>, vector<128x64xbf16>, vector<32x64xf32> -> vector<32x64xf32>
    %28 = arith.addf %24, %27 : vector<32x64xf32>
    %c0_15 = arith.constant 0 : index
    %c0_16 = arith.constant 0 : index
    %29 = vector.load %arg16[%c0_15, %c0_16] : memref<32x64xf32, #tpu.memory_space<vmem>>, vector<32x64xf32>
    tpu.vector_store %arg16[%c0_15, %c0_16], %28 {strides = array<i32>} : memref<32x64xf32, #tpu.memory_space<vmem>>, vector<32x64xf32>,
    %c2_i32 = arith.constant 2 : i32
    %30 = arith.cmpi eq, %arg1, %c2_i32 : i32
    %31 = arith.extui %30 : i1 to i32
    %c0_i32_17 = arith.constant 0 : i32
    %32 = arith.cmpi ne, %31, %c0_i32_17 : i32
    scf.if %32 {
      %c0_18 = arith.constant 0 : index
      %c0_19 = arith.constant 0 : index
      %33 = vector.load %arg16[%c0_18, %c0_19] : memref<32x64xf32, #tpu.memory_space<vmem>>, vector<32x64xf32>
      %34 = vector.shape_cast %33 : vector<32x64xf32> to vector<2x16x64xf32>
      %c0_20 = arith.constant 0 : index
      %c0_21 = arith.constant 0 : index
      %c0_22 = arith.constant 0 : index
      %35 = vector.load %arg15[%c0_20, %c0_21, %c0_22] : memref<2x16x64xf32, #tpu.memory_space<vmem>>, vector<2x16x64xf32>
      tpu.vector_store %arg15[%c0_20, %c0_21, %c0_22], %34 {strides = array<i32>} : memref<2x16x64xf32, #tpu.memory_space<vmem>>, vector<2x16x64xf32>,
    } else {
    }
    return
  }
  func.func @transform_0(%arg0: i32, %arg1: i32) -> (i32, i32, i32) {
    %c0_i32 = arith.constant 0 : i32
    %c0_i32_0 = arith.constant 0 : i32
    %c0_i32_1 = arith.constant 0 : i32
    return %arg0, %c0_i32, %c0_i32_0 : i32, i32, i32
  }
  func.func @transform_1(%arg0: i32, %arg1: i32) -> (i32, i32) {
    %c0_i32 = arith.constant 0 : i32
    %c0_i32_0 = arith.constant 0 : i32
    %c0_i32_1 = arith.constant 0 : i32
    return %c0_i32, %c0_i32_0 : i32, i32
  }
  func.func @transform_2(%arg0: i32, %arg1: i32) -> (i32, i32) {
    %c0_i32 = arith.constant 0 : i32
    %c0_i32_0 = arith.constant 0 : i32
    %c0_i32_1 = arith.constant 0 : i32
    return %c0_i32, %c0_i32_0 : i32, i32
  }
  func.func @transform_3(%arg0: i32, %arg1: i32) -> (i32, i32) {
    %c0_i32 = arith.constant 0 : i32
    %c0_i32_0 = arith.constant 0 : i32
    %c0_i32_1 = arith.constant 0 : i32
    return %c0_i32, %c0_i32_0 : i32, i32
  }
  func.func @transform_4(%arg0: i32, %arg1: i32) -> (i32, i32) {
    %c0_i32 = arith.constant 0 : i32
    %c0_i32_0 = arith.constant 0 : i32
    %c0_i32_1 = arith.constant 0 : i32
    return %c0_i32, %c0_i32_0 : i32, i32
  }
  func.func @transform_5(%arg0: i32, %arg1: i32) -> (i32, i32) {
    %c0_i32 = arith.constant 0 : i32
    %c0_i32_0 = arith.constant 0 : i32
    %c0_i32_1 = arith.constant 0 : i32
    return %c0_i32, %c0_i32_0 : i32, i32
  }
  func.func @transform_6(%arg0: i32, %arg1: i32) -> (i32, i32) {
    %c0_i32 = arith.constant 0 : i32
    %c0_i32_0 = arith.constant 0 : i32
    %c0_i32_1 = arith.constant 0 : i32
    return %c0_i32, %c0_i32_0 : i32, i32
  }
  func.func @transform_7(%arg0: i32, %arg1: i32) -> (i32, i32) {
    %c0_i32 = arith.constant 0 : i32
    %c0_i32_0 = arith.constant 0 : i32
    %c0_i32_1 = arith.constant 0 : i32
    return %c0_i32, %c0_i32_0 : i32, i32
  }
  func.func @transform_8(%arg0: i32, %arg1: i32) -> (i32, i32) {
    %c0_i32 = arith.constant 0 : i32
    %c0_i32_0 = arith.constant 0 : i32
    %c0_i32_1 = arith.constant 0 : i32
    return %c0_i32, %c0_i32_0 : i32, i32
  }
  func.func @transform_9(%arg0: i32, %arg1: i32) -> (i32, i32) {
    %c0_i32 = arith.constant 0 : i32
    %c0_i32_0 = arith.constant 0 : i32
    return %c0_i32, %arg1 : i32, i32
  }
  func.func @transform_10(%arg0: i32, %arg1: i32) -> (i32, i32) {
    %c0_i32 = arith.constant 0 : i32
    %c0_i32_0 = arith.constant 0 : i32
    return %c0_i32, %arg1 : i32, i32
  }
  func.func @transform_11(%arg0: i32, %arg1: i32) -> (i32, i32) {
    %c0_i32 = arith.constant 0 : i32
    %c0_i32_0 = arith.constant 0 : i32
    return %arg1, %c0_i32 : i32, i32
  }
  func.func @transform_12(%arg0: i32, %arg1: i32) -> (i32, i32) {
    %c0_i32 = arith.constant 0 : i32
    %c0_i32_0 = arith.constant 0 : i32
    %c0_i32_1 = arith.constant 0 : i32
    return %c0_i32, %c0_i32_0 : i32, i32
  }
  func.func @transform_13(%arg0: i32, %arg1: i32) -> (i32, i32, i32) {
    %c0_i32 = arith.constant 0 : i32
    %c0_i32_0 = arith.constant 0 : i32
    %c0_i32_1 = arith.constant 0 : i32
    return %arg0, %c0_i32, %c0_i32_0 : i32, i32, i32
  }
}

</mosaic_0001>

<bundles_post_ra>
// kernel: tpu_custom_call.1
= control target key start
LH: loop header
LB: loop body
LE: loop exit
PB: predicated region body
PF: predicated region fallthrough
CT: control target
= control target key end

     0   :  { %s5685_s0 = inlined_call_operand.vmem [shape: f32[2,16,64], index: 0, kind: input, shape index: {}]   ;;  %s5686_s1 = inlined_call_operand.vmem [shape: f32[1,64], index: 1, kind: input, shape index: {}]   ;;  %s5687_s2 = inlined_call_operand.vmem [shape: f32[1,64], index: 2, kind: input, shape index: {}]   ;;  %s5688_s3 = inlined_call_operand.vmem [shape: bf16[64,192], index: 3, kind: input, shape index: {}]   ;;  %s5689_s4 = inlined_call_operand.vmem [shape: f32[1,192], index: 4, kind: input, shape index: {}]   ;;  %s5690_s5 = inlined_call_operand.vmem [shape: bf16[64,64], index: 5, kind: input, shape index: {}]   ;;  %s5691_s6 = inlined_call_operand.vmem [shape: f32[1,64], index: 6, kind: input, shape index: {}]   ;;  %s5692_s7 = inlined_call_operand.vmem [shape: f32[1,64], index: 7, kind: input, shape index: {}]   ;;  %s5693_s8 = inlined_call_operand.vmem [shape: f32[1,64], index: 8, kind: input, shape index: {}]   ;;  %s5694_s9 = inlined_call_operand.vmem [shape: bf16[64,384], index: 9, kind: input, shape index: {}]   ;;  %s5695_s10 = inlined_call_operand.vmem [shape: f32[1,384], index: 10, kind: input, shape index: {}]   ;;  %s5696_s11 = inlined_call_operand.vmem [shape: bf16[384,64], index: 11, kind: input, shape index: {}]   ;;  %s5697_s12 = inlined_call_operand.vmem [shape: f32[1,64], index: 12, kind: input, shape index: {}]   ;;  %s5698_s13 = inlined_call_operand.hbm [shape: f32[2,16,64], index: 13, kind: output, shape index: {}]  }
   0x1   :  { %5701 = sst [smem:[#allocation14_spill]] %s5694_s9 }
   0x2   :  { %18 = vsyncpa [#allocation10], 0  ;;  %s4368_s25 = smov 0   ;;  %s4370_s26 = smov 0  }
   0x3   :  { %s4372_s27 = smov 0   ;;  %s4374_s28 = smov 0  }
   0x4   :  { %s4376_s29 = smov 0  }
   0x5 LB: > { %5702 = sst [smem:[#allocation12_spill]] %s4275_s28  ;;  %s33_s14 = sadd.s32 1, %s4275_s28  ;;  %s4279_s29 = sphi %s4376_s29, %s24_s29   ;;  %s4275_s28 = sphi %s4374_s28, %s5707_s28   ;;  %s4271_s27 = sphi %s4372_s27, %s5706_s27   ;;  %s4267_s26 = sphi %s4370_s26, %s5709_s26   ;;  %s4263_s25 = sphi %s4368_s25, %s5708_s25  }
   0x6   : > { %p34_p0 = scmp.ge.s32.totalorder %s33_s14, 3  ;;  %p244_p1 = scmp.ne.s32.totalorder %s4267_s26, %s4263_s25 }
   0x7   : > { %p245_p2 = scmp.eq.s32.totalorder %s4279_s29, 0  ;;  %s237_s16 = sadd.s32 1, %s4267_s26 }
   0x8   : > { %s5711_s14 = smov (%p34_p0, %s33_s14), 0  ;;  %p3689_p5 = scmp.ge.s32.totalorder %s4279_s29, 3 }
   0x9   : > { %5703 = sst [smem:[#allocation13_spill]] %s5711_s14  ;;  %p246_p3 = por %p245_p2, %p244_p1 }
   0xa   : > { %s234_s15 = ssub.s32 %s4275_s28, %s5711_s14  ;;  %406 = sbr.rel (%p3689_p5) target bundleno = 33 (0x21), region = 56 }
   0xb   : > { %p235_p4 = scmp.eq.s32.totalorder %s234_s15, 0 }
   0xd   : > { %s4404_s17 = scalar_select %p235_p4, %s4267_s26, %s237_s16  }
   0xf   : > { %409 = sbr.rel (!%p246_p3) target bundleno = 33 (0x21), region = 60  ;;  %s411_s18 = sand.u32 (%p246_p3), 1, %s4267_s26  }
  0x10   : > { %s3691_s19 = sshll.u32 (%p246_p3), %s4275_s28, 2  ;;  %s3690_s20 = sshll.u32 (%p246_p3), %s411_s18, 5 }
  0x11   : > { %s5704_s9 = sld [smem:[#allocation14_spill]] (%p246_p3)  ;;  %s413_s24 = scalar_lea.vmem (%p246_p3), [#allocation8], %s3690_s20 }
  0x17   : > { %s415_s23 = scalar_lea.vmem %s5704_s9, %s3691_s19 }
  0x18   : > { %v432_v0 = vld [vmem:[%s415_s23] sm:$0xf]  ;;  %v434_v1 = vld [vmem:[%s415_s23 + $0xc] sm:$0xf]  ;;  %v436_v2 = vld [vmem:[%s415_s23 + $0x18] sm:$0xf] }
  0x19   : > { %433 = vst [vmem:[%s413_s24] sm:$0xf] %v432_v0  ;;  %v438_v3 = vld [vmem:[%s415_s23 + $0x24] sm:$0xf]  ;;  %v440_v4 = vld [vmem:[%s415_s23 + $0x30] sm:$0xf] }
  0x1a   : > { %435 = vst [vmem:[%s413_s24 + $0x4] sm:$0xf] %v434_v1  ;;  %v442_v5 = vld [vmem:[%s415_s23 + $0x3c] sm:$0xf]  ;;  %v444_v6 = vld [vmem:[%s415_s23 + $0x48] sm:$0xf] }
  0x1b   : > { %437 = vst [vmem:[%s413_s24 + $0x8] sm:$0xf] %v436_v2  ;;  %v446_v7 = vld [vmem:[%s415_s23 + $0x54] sm:$0xf] }
  0x1c   : > { %439 = vst [vmem:[%s413_s24 + $0xc] sm:$0xf] %v438_v3 }
  0x1d   : > { %441 = vst [vmem:[%s413_s24 + $0x10] sm:$0xf] %v440_v4 }
  0x1e   : > { %443 = vst [vmem:[%s413_s24 + $0x14] sm:$0xf] %v442_v5 }
  0x1f   : > { %445 = vst [vmem:[%s413_s24 + $0x18] sm:$0xf] %v444_v6 }
  0x20   : > { %447 = vst [vmem:[%s413_s24 + $0x1c] sm:$0xf] %v446_v7 }
  0x21 PF: > { %p3692_p6 = scmp.ge.s32.totalorder %s4279_s29, 1  ;;  %p501_p7 = scmp.lt.s32.totalorder %s4279_s29, 4 }
  0x23   : > { %p502_p8 = pnand %p3692_p6, %p501_p7 }
  0x24   : > { %s508_s15 = sand.u32 (!%p502_p8), 1, %s4263_s25   ;;  %p567_p9 = scmp.lt.s32.totalorder (!%p502_p8), %s4271_s27, 2 }
  0x25   : > { %505 = sbr.rel (%p502_p8) target bundleno = 2293 (0x8f5), region = 109  ;;  %s3693_s16 = sshll.u32 (!%p502_p8), %s508_s15, 5 }
  0x26   : > { %s3694_s18 = sshll.u32 (!%p502_p8), %s4271_s27, 4  ;;  %s4429_s14 = scalar_lea.vmem (!%p502_p8), [#allocation8], %s3693_s16 }
  0x27   : > { %p571_p10 = scmp.lt.s32.totalorder (!%p502_p8), %s3694_s18, 47  ;;  %p3696_p11 = scmp.ne.s32.totalorder (!%p502_p8), %s4271_s27, 0 }
  0x2a   : > { %s4418_s19 = scalar_select %p567_p9, %s4271_s27, 2 }
  0x2b   : > { %s5713_s18 = smov (!%p571_p10, %s3694_s18), 47  ;;  %581 = sbr.rel (%p3696_p11) target bundleno = 1954 (0x7a2), region = 117 }
  0x2c   : > { %s569_s22 = scalar_lea.vmem %s5695_s10, %s4418_s19  ;;  %s3695_s23 = sshll.u32 %s5713_s18, 2 }
  0x2d   : > { %s4427_s9 = scalar_lea.vmem %s5696_s11, %s3695_s23  ;;  %s4286_s18 = smov (!%p3696_p11), 64  }
  0x2e   : > { %s4287_s21 = smov (!%p3696_p11), 96   ;;  %s4288_s28 = smov (!%p3696_p11), 112  }
  0x2f   : > { %s4289_s23 = smov (!%p3696_p11), 80   ;;  %s5300_s24 = smov (!%p3696_p11), 0  }
  0x30   : > { %v4435_v8 = vld [vmem:[%s5685_s0 + $0x10] sm:$0xff]  ;;  %vm588_vm0 = vcmask 523264   ;;  %v4440_v9 = vld [vmem:[%s5685_s0] sm:$0xff]  ;;  %v4449_v12 = vld [vmem:[%s5685_s0 + $0x18] sm:$0xff]  ;;  %v4285_v16 = vmov 64.0   ;;  %vm823_vm14 = vcmask 1047556  }
  0x31   : > { %v595_v10 = vsel %vm588_vm0, %v4435_v8, 0.0  ;;  %v589_v11 = vsel %vm588_vm0, %v4440_v9, 0.0  ;;  %v4454_v13 = vld [vmem:[%s5685_s0 + $0x8] sm:$0xff]  ;;  %v598_v14 = vsel %vm588_vm0, %v4449_v12, 0.0  ;;  %4124 = vrcp.f32 %v4285_v16  ;;  %v3723_v43 = vld [vmem:[%s5688_s3 + $0x30] sm:$0xf] }
  0x32   : > { %596 = vadd.xlane.f32.xlu0 %v595_v10  ;;  %590 = vadd.xlane.f32.xlu1 %v589_v11  ;;  %v592_v15 = vsel %vm588_vm0, %v4454_v13, 0.0  ;;  %v3871_v44 = vld [vmem:[%s5688_s3 + $0x34] sm:$0xf0]  ;;  %v3870_v45 = vld [vmem:[%s5688_s3 + $0x34] sm:$0xf]  ;;  %vm1051_vm15 = vcmask 125952  }
  0x33   : > { %v3724_v46 = vor.u32 %v3871_v44, %v3723_v43  ;;  %v3725_v47 = vld [vmem:[%s5688_s3 + $0x38] sm:$0xf0]  ;;  %v3715_v49 = vld [vmem:[%s5688_s3 + $0x20] sm:$0xf]  ;;  %v3869_v50 = vld [vmem:[%s5688_s3 + $0x24] sm:$0xf0] }
  0x34   : > { %v3728_v48 = vor.u32 %v3870_v45, %v3725_v47  ;;  %v3868_v51 = vld [vmem:[%s5688_s3 + $0x24] sm:$0xf]  ;;  %v3716_v52 = vor.u32 %v3869_v50, %v3715_v49  ;;  %v3717_v53 = vld [vmem:[%s5688_s3 + $0x28] sm:$0xf0]  ;;  %v3707_v55 = vld [vmem:[%s5688_s3 + $0x10] sm:$0xf] }
  0x35   : > { %764 = vmatpush.bf16.msra.mxu0 %v3724_v46  ;;  %3905 = vmatpush.bf16.msra.mxu2 %v3724_v46  ;;  %v3720_v54 = vor.u32 %v3868_v51, %v3717_v53  ;;  %v3867_v56 = vld [vmem:[%s5688_s3 + $0x14] sm:$0xf0]  ;;  %v3866_v57 = vld [vmem:[%s5688_s3 + $0x14] sm:$0xf]  ;;  %v3709_v59 = vld [vmem:[%s5688_s3 + $0x18] sm:$0xf0] }
  0x36   : > { %783 = vmatpush.bf16.msra.mxu1 %v3728_v48  ;;  %3909 = vmatpush.bf16.msra.mxu3 %v3728_v48  ;;  %v3708_v58 = vor.u32 %v3867_v56, %v3707_v55  ;;  %v3712_v62 = vor.u32 %v3866_v57, %v3709_v59  ;;  %v3699_v63 = vld [vmem:[%s5688_s3] sm:$0xf]  ;;  %v3865_v0 = vld [vmem:[%s5688_s3 + $0x4] sm:$0xf0]  ;;  %v3864_v1 = vld [vmem:[%s5688_s3 + $0x4] sm:$0xf] }
  0x37   : > { %v4125_v17 = vpop.eup %4124  ;;  %v3700_v4 = vor.u32 %v3865_v0, %v3699_v63  ;;  %v3701_v5 = vld [vmem:[%s5688_s3 + $0x8] sm:$0xf0]  ;;  %v4122_v49 = vld [vmem:[%s5686_s1] ss:$0 sm:$0xff] }
  0x38   : > { %v602_v18 = vmul.f32 64.0, %v4125_v17  ;;  %vm606_vm1 = vweird.f32 %v4125_v17  ;;  %v3704_v6 = vor.u32 %v3864_v1, %v3701_v5 }
  0x39   : > { %765 = vmatpush.bf16.msra.mxu0 %v3716_v52  ;;  %3906 = vmatpush.bf16.msra.mxu2 %v3716_v52 }
  0x3a   : > { %599 = vadd.xlane.f32.xlu0 %v598_v14  ;;  %593 = vadd.xlane.f32.xlu1 %v592_v15  ;;  %v603_v19 = vsub.f32 1.0, %v602_v18 }
  0x3b   : > { %784 = vmatpush.bf16.msra.mxu1 %v3720_v54  ;;  %3910 = vmatpush.bf16.msra.mxu3 %v3720_v54 }
  0x3c   : > { %v604_v20 = vmul.f32 %v4125_v17, %v603_v19 }
  0x3d   : > { %766 = vmatpush.bf16.msra.mxu0 %v3708_v58  ;;  %3907 = vmatpush.bf16.msra.mxu2 %v3708_v58 }
  0x3e   : > { %v605_v21 = vadd.f32 %v4125_v17, %v604_v20 }
  0x3f   : > { %785 = vmatpush.bf16.msra.mxu1 %v3712_v62  ;;  %3911 = vmatpush.bf16.msra.mxu3 %v3712_v62 }
  0x40   : > { %v4460_v22 = vsel %vm606_vm1, %v4125_v17, %v605_v21 }
  0x41   : > { %767 = vmatpush.bf16.msra.mxu0 %v3700_v4  ;;  %3908 = vmatpush.bf16.msra.mxu2 %v3700_v4 }
  0x43   : > { %786 = vmatpush.bf16.msra.mxu1 %v3704_v6  ;;  %3912 = vmatpush.bf16.msra.mxu3 %v3704_v6 }
  0xa5   : > { %v597_v23 = vpop.xlane.xlu0 %596  ;;  %v591_v24 = vpop.xlane.xlu1 %590 }
  0xa6   : > { %v610_v25 = vmul.f32 %v4460_v22, %v597_v23  ;;  %v608_v26 = vmul.f32 %v4460_v22, %v591_v24 }
  0xa8   : > { %v4465_v27 = vsub.f32 %v4435_v8, %v610_v25  ;;  %v4468_v28 = vsub.f32 %v4440_v9, %v608_v26 }
  0xaa   : > { %v618_v29 = vmul.f32 %v4465_v27, %v4465_v27  ;;  %v616_v30 = vmul.f32 %v4468_v28, %v4468_v28 }
  0xac   : > { %v626_v31 = vsel %vm588_vm0, %v618_v29, 0.0  ;;  %v620_v32 = vsel %vm588_vm0, %v616_v30, 0.0 }
  0xad   : > { %627 = vadd.xlane.f32.xlu2 %v626_v31  ;;  %v600_v33 = vpop.xlane.xlu0 %599  ;;  %621 = vadd.xlane.f32.xlu0 %v620_v32  ;;  %v594_v34 = vpop.xlane.xlu1 %593 }
  0xae   : > { %v611_v35 = vmul.f32 %v4460_v22, %v600_v33  ;;  %v609_v36 = vmul.f32 %v4460_v22, %v594_v34 }
  0xb0   : > { %v4479_v37 = vsub.f32 %v4449_v12, %v611_v35  ;;  %v4482_v38 = vsub.f32 %v4454_v13, %v609_v36 }
  0xb2   : > { %v619_v39 = vmul.f32 %v4479_v37, %v4479_v37  ;;  %v617_v40 = vmul.f32 %v4482_v38, %v4482_v38 }
  0xb4   : > { %v629_v41 = vsel %vm588_vm0, %v619_v39, 0.0  ;;  %v623_v42 = vsel %vm588_vm0, %v617_v40, 0.0 }
  0xb5   : > { %630 = vadd.xlane.f32.xlu2 %v629_v41  ;;  %624 = vadd.xlane.f32.xlu1 %v623_v42 }
 0x120   : > { %v628_v60 = vpop.xlane.xlu2 %627  ;;  %v622_v61 = vpop.xlane.xlu0 %621 }
 0x121   : > { %v634_v2 = vmul.f32 %v628_v60, %v4460_v22  ;;  %v632_v3 = vmul.f32 %v622_v61, %v4460_v22 }
 0x123   : > { %v638_v7 = vadd.f32 1e-06, %v634_v2  ;;  %v636_v10 = vadd.f32 1e-06, %v632_v3 }
 0x125   : > { %4126 = vrsqrt.f32 %v638_v7  ;;  %vm666_vm2 = vweird.f32 %v638_v7  ;;  %vm646_vm6 = vweird.f32 %v636_v10 }
 0x126   : > { %4128 = vrsqrt.f32 %v636_v10 }
 0x128   : > { %v631_v11 = vpop.xlane.xlu2 %630  ;;  %v625_v14 = vpop.xlane.xlu1 %624 }
 0x129   : > { %v635_v15 = vmul.f32 %v631_v11, %v4460_v22  ;;  %v633_v16 = vmul.f32 %v625_v14, %v4460_v22 }
 0x12b   : > { %v4127_v17 = vpop.eup %4126  ;;  %v639_v18 = vadd.f32 1e-06, %v635_v15  ;;  %v637_v19 = vadd.f32 1e-06, %v633_v16 }
 0x12c   : > { %v4129_v20 = vpop.eup %4128  ;;  %v661_v21 = vmul.f32 %v4127_v17, %v638_v7  ;;  %vm667_vm3 = vweird.f32 %v4127_v17 }
 0x12d   : > { %v641_v23 = vmul.f32 %v4129_v20, %v636_v10  ;;  %4130 = vrsqrt.f32 %v639_v18  ;;  %vm668_vm4 = vmor %vm666_vm2, %vm667_vm3  ;;  %vm647_vm5 = vweird.f32 %v4129_v20  ;;  %vm676_vm8 = vweird.f32 %v639_v18 }
 0x12e   : > { %v662_v24 = vmul.f32 %v4127_v17, %v661_v21  ;;  %4132 = vrsqrt.f32 %v637_v19  ;;  %vm648_vm7 = vmor %vm646_vm6, %vm647_vm5  ;;  %vm656_vm12 = vweird.f32 %v637_v19 }
 0x12f   : > { %v642_v25 = vmul.f32 %v4129_v20, %v641_v23 }
 0x130   : > { %v663_v26 = vmul.f32 0.5, %v662_v24 }
 0x131   : > { %v643_v29 = vmul.f32 0.5, %v642_v25 }
 0x132   : > { %v664_v30 = vsub.f32 1.5, %v663_v26 }
 0x133   : > { %v4131_v31 = vpop.eup %4130  ;;  %v644_v32 = vsub.f32 1.5, %v643_v29 }
 0x134   : > { %v4133_v33 = vpop.eup %4132  ;;  %v665_v34 = vmul.f32 %v4127_v17, %v664_v30  ;;  %v671_v35 = vmul.f32 %v4131_v31, %v639_v18  ;;  %vm677_vm9 = vweird.f32 %v4131_v31 }
 0x135   : > { %v645_v36 = vmul.f32 %v4129_v20, %v644_v32  ;;  %v651_v39 = vmul.f32 %v4133_v33, %v637_v19  ;;  %vm678_vm10 = vmor %vm676_vm8, %vm677_vm9  ;;  %vm657_vm11 = vweird.f32 %v4133_v33 }
 0x136   : > { %v672_v40 = vmul.f32 %v4131_v31, %v671_v35  ;;  %v669_v42 = vsel %vm668_vm4, %v4127_v17, %v665_v34  ;;  %vm658_vm13 = vmor %vm656_vm12, %vm657_vm11 }
 0x137   : > { %v652_v41 = vmul.f32 %v4133_v33, %v651_v39  ;;  %v649_v44 = vsel %vm648_vm7, %v4129_v20, %v645_v36  ;;  %v682_v47 = vmul.f32 %v669_v42, %v4465_v27  ;;  %v4123_v27 = vld [vmem:[%s5687_s2] ss:$0 sm:$0xff] }
 0x138   : > { %v673_v43 = vmul.f32 0.5, %v672_v40  ;;  %v680_v50 = vmul.f32 %v649_v44, %v4468_v28 }
 0x139   : > { %v653_v45 = vmul.f32 0.5, %v652_v41  ;;  %v689_v56 = vmul.f32 %v4122_v49, %v682_v47 }
 0x13a   : > { %v674_v46 = vsub.f32 1.5, %v673_v43  ;;  %v687_v58 = vmul.f32 %v4122_v49, %v680_v50 }
 0x13b   : > { %v654_v48 = vsub.f32 1.5, %v653_v45  ;;  %v696_v61 = vadd.f32 %v4123_v27, %v689_v56 }
 0x13c   : > { %v675_v51 = vmul.f32 %v4131_v31, %v674_v46  ;;  %v694_v62 = vadd.f32 %v4123_v27, %v687_v58  ;;  %v4290_v46 = vmov 1983009808  }
 0x13d   : > { %v655_v52 = vmul.f32 %v4133_v33, %v654_v48  ;;  %v828_v47 = vunpack.c.l.s4 %v4290_v46  ;;  %v4291_v48 = vmov 1934713408  }
 0x13e   : > { %v679_v53 = vsel %vm678_vm10, %v4131_v31, %v675_v51 }
 0x13f   : > { %v683_v54 = vmul.f32 %v679_v53, %v4479_v37  ;;  %v659_v55 = vsel %vm658_vm13, %v4133_v33, %v655_v52  ;;  %v4613_v52 = vunpack.c.0.s8 %v828_v47 }
 0x140   : > { %v681_v57 = vmul.f32 %v659_v55, %v4482_v38  ;;  %v708_v38 = vld [vmem:[%s5689_s4] sm:$0x3] }
 0x141   : > { %v690_v59 = vmul.f32 %v4122_v49, %v683_v54  ;;  %v710_v2 = vperm.slane %v708_v38, 0  ;;  %v711_v19 = vperm.slane %v708_v38, 1 }
 0x142   : > { %v688_v60 = vmul.f32 %v4122_v49, %v681_v57  ;;  %v852_v49 = vunpack.c.l.s4 %v4291_v48 }
 0x143   : > { %v697_v28 = vadd.f32 %v4123_v27, %v690_v59 }
 0x144   : > { %v695_v63 = vadd.f32 %v4123_v27, %v688_v60  ;;  %v4617_v59 = vunpack.c.0.s8 %v852_v49 }
 0x145   : > { %v699_v0 = vpack.c.bf16 %v697_v28, %v696_v61 }
 0x146   : > { %v698_v1 = vpack.c.bf16 %v695_v63, %v694_v62 }
 0x147   : > { %3730 = vmatmul.msk.bf16.vlgmr.msra.gmra.mxu2 %vm588_vm0, %v699_v0  ;;  %3732 = vmatmul.msk.bf16.vlgmr.msra.gmra.mxu3 %vm588_vm0, %v699_v0 }
 0x148   : > { %3729 = vmatmul.msk.bf16.vlgmr.msra.gmra.mxu0 %vm588_vm0, %v698_v1  ;;  %3731 = vmatmul.msk.bf16.vlgmr.msra.gmra.mxu1 %vm588_vm0, %v698_v1 }
 0x1c5   : > { %v769_v37 = vpop.f32.mrf.mxu0  ;;  %v788_v6 = vpop.f32.mrf.mxu1 }
 0x1c6   : > { %v770_v4 = vadd.f32 %v769_v37, %v710_v2  ;;  %v4573_v23 = vadd.f32 %v788_v6, %v711_v19 }
 0x1c8   : > { %v4564_v14 = vmul.f32 0.25, %v770_v4 }
 0x1ca   : > { %v774_v7 = vpop.f32.mrf.mxu2  ;;  %v793_v15 = vpop.f32.mrf.mxu3  ;;  %v825_v61 = vrot.slane %v4564_v14, 4 }
 0x1cb   : > { %v775_v24 = vadd.f32 %v774_v7, %v710_v2  ;;  %v4582_v31 = vadd.f32 %v793_v15, %v711_v19 }
 0x1cd   : > { %v771_v3 = vpop.f32.mrf.mxu0  ;;  %v790_v17 = vpop.f32.mrf.mxu1  ;;  %v4594_v34 = vmul.f32 0.25, %v775_v24 }
 0x1ce   : > { %v772_v5 = vadd.f32 %v771_v3, %v710_v2  ;;  %v4571_v20 = vadd.f32 %v790_v17, %v711_v19 }
 0x1d0   : > { %v4007_v10 = vpack.i.bf16 %v772_v5, %v770_v4  ;;  %v4562_v11 = vmul.f32 0.25, %v772_v5  ;;  %v4032_v26 = vpack.i.bf16 %v4571_v20, %v4573_v23 }
 0x1d2   : > { %4008 = vrot.lane.b32.xlu1 %v4007_v10, %s4286_s18  ;;  %3998 = vrot.lane.b32.xlu0 %v4007_v10, %s4287_s21  ;;  %v4022_v16 = vpack.i.bf16 %v4562_v11, %v4564_v14  ;;  %v776_v18 = vpop.f32.mrf.mxu2  ;;  %v795_v29 = vpop.f32.mrf.mxu3  ;;  %v881_v60 = vrot.slane %v4562_v11, 4 }
 0x1d3   : > { %3993 = vrot.lane.b32.xlu2 %v4007_v10, %s4288_s28  ;;  %v777_v21 = vadd.f32 %v776_v18, %v710_v2  ;;  %v4580_v30 = vadd.f32 %v795_v29, %v711_v19 }
 0x1d5   : > { %v4027_v25 = vpack.i.bf16 %v777_v21, %v775_v24  ;;  %v4586_v32 = vpack.i.bf16 %v4580_v30, %v4582_v31  ;;  %v4592_v33 = vmul.f32 0.25, %v777_v21 }
 0x1d7   : > { %v4067_v35 = vpack.i.bf16 %v4592_v33, %v4594_v34 }
 0x1da   : > { %4023 = vrot.lane.b32.xlu1 %v4022_v16, %s4289_s23  ;;  %4018 = vrot.lane.b32.xlu0 %v4022_v16, %s4287_s21 }
 0x1db   : > { %4003 = vrot.lane.b32.xlu2 %v4007_v10, %s4289_s23 }
 0x1e2   : > { %4028 = vrot.lane.b32.xlu1 %v4027_v25, %s4287_s21  ;;  %4033 = vrot.lane.b32.xlu0 %v4032_v26, %s4288_s28 }
 0x1e3   : > { %4013 = vrot.lane.b32.xlu2 %v4022_v16, %s4288_s28 }
 0x1ea   : > { %4063 = vrot.lane.b32.xlu1 %v4586_v32, %s4287_s21  ;;  %4038 = vrot.lane.b32.xlu0 %v4027_v25, %s4288_s28 }
 0x1eb   : > { %4043 = vrot.lane.b32.xlu2 %v4027_v25, %s4289_s23 }
 0x1f2   : > { %4068 = vrot.lane.b32.xlu1 %v4067_v35, %s4287_s21  ;;  %4053 = vrot.lane.b32.xlu0 %v4032_v26, %s4289_s23 }
 0x1f3   : > { %4048 = vrot.lane.b32.xlu2 %v4032_v26, %s4287_s21 }
 0x1fa   : > { %4078 = vrot.lane.b32.xlu1 %v4067_v35, %s4289_s23  ;;  %4058 = vrot.lane.b32.xlu0 %v4027_v25, %s4286_s18 }
 0x1fb   : > { %4073 = vrot.lane.b32.xlu2 %v4067_v35, %s4288_s28 }
 0x22d   : > { %v3994_v36 = vpop.permute.xlu2 %3993 }
 0x22e   : > { %4083 = vrot.lane.b32.xlu0 %v3994_v36, %s4286_s18 }
 0x235   : > { %v4004_v39 = vpop.permute.xlu2 %4003 }
 0x236   : > { %4093 = vrot.lane.b32.xlu1 %v4004_v39, %s4286_s18 }
 0x23d   : > { %v4014_v40 = vpop.permute.xlu2 %4013 }
 0x23e   : > { %4113 = vrot.lane.b32.xlu1 %v4586_v32, %s4288_s28  ;;  %v4016_v44 = vunpack.i.h.bf16 %v4014_v40  ;;  %v4015_v45 = vunpack.i.l.bf16 %v4014_v40 }
 0x240   : > { %v893_v50 = vrot.slane %v4016_v44, 4  ;;  %v837_v51 = vrot.slane %v4015_v45, 4 }
 0x244   : > { %v4608_v41 = vpop.permute.xlu1 %4008  ;;  %v3999_v42 = vpop.permute.xlu0 %3998 }
 0x245   : > { %v4610_v43 = vpop.permute.xlu2 %4043  ;;  %4088 = vrot.lane.b32.xlu2 %v3999_v42, %s4286_s18 }
 0x24c   : > { %v4024_v53 = vpop.permute.xlu1 %4023  ;;  %v4019_v54 = vpop.permute.xlu0 %4018 }
 0x24d   : > { %v4026_v55 = vunpack.i.h.bf16 %v4024_v53  ;;  %v4025_v27 = vunpack.i.l.bf16 %v4024_v53  ;;  %v4021_v56 = vunpack.i.h.bf16 %v4019_v54  ;;  %v4020_v57 = vunpack.i.l.bf16 %v4019_v54  ;;  %v4615_v58 = vpop.permute.xlu2 %4048 }
 0x24e   : > { %v4051_v28 = vunpack.i.h.bf16 %v4615_v58 }
 0x24f   : > { %v891_v62 = vrot.slane %v4026_v55, 4  ;;  %v835_v63 = vrot.slane %v4025_v27, 4  ;;  %v838_v0 = vsel %vm823_vm14, %v4025_v27, %v837_v51  ;;  %v894_v1 = vsel %vm823_vm14, %v4026_v55, %v893_v50 }
 0x250   : > { %v846_v37 = vperm.slane %v838_v0, %v4613_v52  ;;  %v902_v38 = vperm.slane %v894_v1, %v4613_v52  ;;  %v879_v2 = vrot.slane %v4021_v56, 4  ;;  %v882_v3 = vsel %vm823_vm14, %v4021_v56, %v881_v60 }
 0x251   : > { %v836_v4 = vsel %vm823_vm14, %v835_v63, %v4015_v45  ;;  %v892_v5 = vsel %vm823_vm14, %v891_v62, %v4016_v44  ;;  %v890_v6 = vperm.slane %v882_v3, %v4613_v52  ;;  %v822_v7 = vrot.slane %v4020_v57, 4 }
 0x252   : > { %v842_v10 = vperm.slane %v836_v4, %v4613_v52  ;;  %v859_v15 = vrot.slane %v846_v37, 4  ;;  %v898_v16 = vperm.slane %v892_v5, %v4613_v52  ;;  %v915_v17 = vrot.slane %v902_v38, 4 }
 0x253   : > { %v880_v18 = vsel %vm823_vm14, %v879_v2, %v4562_v11  ;;  %v917_v19 = vrot.slane %v890_v6, 4  ;;  %v824_v21 = vsel %vm823_vm14, %v822_v7, %v4564_v14  ;;  %v826_v24 = vsel %vm823_vm14, %v4020_v57, %v825_v61 }
 0x254   : > { %v847_v25 = vrot.slane %v842_v10, 4  ;;  %v903_v26 = vrot.slane %v898_v16, 4  ;;  %v886_v29 = vperm.slane %v880_v18, %v4613_v52  ;;  %v830_v35 = vperm.slane %v824_v21, %v4613_v52 }
 0x255   : > { %v834_v36 = vperm.slane %v826_v24, %v4613_v52  ;;  %v916_v39 = vsel %vm823_vm14, %v915_v17, %v890_v6  ;;  %v918_v40 = vsel %vm823_vm14, %v902_v38, %v917_v19  ;;  %v4050_v11 = vunpack.i.l.bf16 %v4615_v58 }
 0x256   : > { %v905_v42 = vrot.slane %v886_v29, 4  ;;  %v848_v44 = vsel %vm823_vm14, %v847_v25, %v830_v35  ;;  %v849_v14 = vrot.slane %v830_v35, 4  ;;  %v904_v45 = vsel %vm823_vm14, %v903_v26, %v886_v29 }
 0x257   : > { %v854_v46 = vperm.slane %v848_v44, %v4617_v59  ;;  %v860_v47 = vsel %vm823_vm14, %v859_v15, %v834_v36  ;;  %v861_v48 = vrot.slane %v834_v36, 4  ;;  %v910_v49 = vperm.slane %v904_v45, %v4617_v59 }
 0x258   : > { %v850_v50 = vsel %vm823_vm14, %v842_v10, %v849_v14  ;;  %v866_v51 = vperm.slane %v860_v47, %v4617_v59  ;;  %v906_v53 = vsel %vm823_vm14, %v898_v16, %v905_v42  ;;  %v922_v54 = vperm.slane %v916_v39, %v4617_v59  ;;  %v4664_v16 = vpop.permute.xlu1 %4028 }
 0x259   : > { %v858_v55 = vperm.slane %v850_v50, %v4617_v59  ;;  %v862_v27 = vsel %vm823_vm14, %v846_v37, %v861_v48  ;;  %v871_v56 = vrot.slane %v854_v46, 4  ;;  %v914_v57 = vperm.slane %v906_v53, %v4617_v59  ;;  %v4681_v50 = vpop.permute.xlu0 %4033  ;;  %4098 = vrot.lane.b32.xlu2 %v4664_v16, %s4286_s18 }
 0x25a   : > { %v870_v60 = vperm.slane %v862_v27, %v4617_v59  ;;  %v875_v61 = vrot.slane %v866_v51, 4  ;;  %v926_v62 = vperm.slane %v918_v40, %v4617_v59  ;;  %v927_v63 = vrot.slane %v910_v49, 4 }
 0x25b   : > { %v872_v0 = vsel %vm823_vm14, 0.0, %v871_v56  ;;  %v873_v1 = vrot.slane %v858_v55, 4  ;;  %v929_v38 = vrot.slane %v914_v57, 4  ;;  %v931_v2 = vrot.slane %v922_v54, 4 }
 0x25c   : > { %v876_v3 = vsel %vm823_vm14, 0.0, %v875_v61  ;;  %v877_v4 = vrot.slane %v870_v60, 4  ;;  %v928_v5 = vsel %vm823_vm14, 0.0, %v927_v63  ;;  %v933_v37 = vrot.slane %v926_v62, 4 }
 0x25d   : > { %v874_v6 = vsel %vm823_vm14, 0.0, %v873_v1  ;;  %v930_v7 = vsel %vm823_vm14, 0.0, %v929_v38  ;;  %v932_v10 = vsel %vm823_vm14, 0.0, %v931_v2  ;;  %v935_v15 = vsel %vm823_vm14, %v873_v1, %v854_v46 }
 0x25e   : > { %v878_v17 = vsel %vm823_vm14, 0.0, %v877_v4  ;;  %v934_v18 = vsel %vm823_vm14, 0.0, %v933_v37  ;;  %v939_v19 = vperm.slane %v935_v15, %v4613_v52  ;;  %v940_v21 = vrot.slane %v874_v6, 4 }
 0x25f   : > { %v946_v24 = vsel %vm823_vm14, %v877_v4, %v866_v51  ;;  %v951_v25 = vrot.slane %v878_v17, 4  ;;  %v989_v26 = vsel %vm823_vm14, %v929_v38, %v910_v49  ;;  %v994_v29 = vrot.slane %v930_v7, 4 }
 0x260   : > { %v941_v35 = vsel %vm823_vm14, %v940_v21, %v872_v0  ;;  %v950_v36 = vperm.slane %v946_v24, %v4613_v52  ;;  %v959_v39 = vrot.slane %v939_v19, 4  ;;  %v993_v40 = vperm.slane %v989_v26, %v4613_v52  ;;  %v4696_v7 = vpop.permute.xlu1 %4063 }
 0x261   : > { %v945_v42 = vperm.slane %v941_v35, %v4613_v52  ;;  %v952_v44 = vsel %vm823_vm14, %v951_v25, %v876_v3  ;;  %v995_v14 = vsel %vm823_vm14, %v994_v29, %v928_v5  ;;  %v1000_v45 = vsel %vm823_vm14, %v933_v37, %v922_v54  ;;  %4108 = vrot.lane.b32.xlu2 %v4610_v43, %s4286_s18 }
 0x262   : > { %v956_v46 = vperm.slane %v952_v44, %v4613_v52  ;;  %v971_v47 = vrot.slane %v950_v36, 4  ;;  %v999_v48 = vperm.slane %v995_v14, %v4613_v52  ;;  %v1004_v49 = vperm.slane %v1000_v45, %v4613_v52 }
 0x263   : > { %v957_v51 = vrot.slane %v945_v42, 4  ;;  %v960_v53 = vsel %vm823_vm14, %v945_v42, %v959_v39  ;;  %v1005_v55 = vrot.slane %v934_v18, 4  ;;  %v1013_v27 = vrot.slane %v993_v40, 4 }
 0x264   : > { %v968_v56 = vperm.slane %v960_v53, %v4617_v59  ;;  %v969_v57 = vrot.slane %v956_v46, 4  ;;  %v972_v60 = vsel %vm823_vm14, %v956_v46, %v971_v47  ;;  %v1011_v54 = vrot.slane %v999_v48, 4  ;;  %v4039_v47 = vpop.permute.xlu0 %4038 }
 0x265   : > { %v958_v61 = vsel %vm823_vm14, %v957_v51, %v939_v19  ;;  %v980_v62 = vperm.slane %v972_v60, %v4617_v59  ;;  %v1006_v63 = vsel %vm823_vm14, %v1005_v55, %v932_v10  ;;  %v1014_v0 = vsel %vm823_vm14, %v999_v48, %v1013_v27  ;;  %4103 = vrot.lane.b32.xlu0 %v4039_v47, %s4286_s18 }
 0x266   : > { %v964_v1 = vperm.slane %v958_v61, %v4617_v59  ;;  %v970_v38 = vsel %vm823_vm14, %v969_v57, %v950_v36  ;;  %v987_v2 = vrot.slane %v968_v56, 4  ;;  %v1010_v3 = vperm.slane %v1006_v63, %v4613_v52 }
 0x267   : > { %v976_v4 = vperm.slane %v970_v38, %v4617_v59  ;;  %v985_v5 = vrot.slane %v980_v62, 4  ;;  %v1012_v37 = vsel %vm823_vm14, %v1011_v54, %v993_v40  ;;  %v1022_v6 = vperm.slane %v1014_v0, %v4617_v59 }
 0x268   : > { %v983_v15 = vrot.slane %v964_v1, 4  ;;  %v988_v10 = vsel %vm823_vm14, %v980_v62, %v987_v2  ;;  %v1018_v17 = vperm.slane %v1012_v37, %v4617_v59  ;;  %v1023_v18 = vrot.slane %v1010_v3, 4  ;;  %v4069_v2 = vpop.permute.xlu1 %4068 }
 0x269   : > { %v981_v19 = vrot.slane %v976_v4, 4  ;;  %v986_v21 = vsel %vm823_vm14, %v985_v5, %v968_v56  ;;  %v1025_v24 = vrot.slane %v1004_v49, 4  ;;  %v1041_v25 = vrot.slane %v1022_v6, 4 }
 0x26a   : > { %v984_v26 = vsel %vm823_vm14, %v976_v4, %v983_v15  ;;  %v1024_v29 = vsel %vm823_vm14, %v1023_v18, %v1004_v49  ;;  %v1037_v35 = vrot.slane %v1018_v17, 4  ;;  %v1047_v36 = vpack.c.bf16 %v986_v21, %v986_v21 }
 0x26b   : > { %v982_v39 = vsel %vm823_vm14, %v981_v19, %v964_v1  ;;  %v1026_v40 = vsel %vm823_vm14, %v1010_v3, %v1025_v24  ;;  %v1030_v42 = vperm.slane %v1024_v29, %v4617_v59  ;;  %v1045_v44 = vpack.c.bf16 %v984_v26, %v984_v26 }
 0x26c   : > { %v1034_v14 = vperm.slane %v1026_v40, %v4617_v59  ;;  %v1043_v45 = vpack.c.bf16 %v982_v39, %v982_v39  ;;  %v1049_v46 = vpack.c.bf16 %v988_v10, %v988_v10  ;;  %1056 = vst.msk [vmem:[#allocation4 + $0x10] sm:$0xf] %vm1051_vm15, %v1047_v36  ;;  %v1410_v49 = vrot.slane %v4051_v28, 4 }
 0x26d   : > { %v1035_v48 = vrot.slane %v1030_v42, 4  ;;  %v1038_v51 = vsel %vm823_vm14, %v1030_v42, %v1037_v35  ;;  %1054 = vst.msk [vmem:[#allocation4 + $0x8] sm:$0xf] %vm1051_vm15, %v1045_v44  ;;  %v1356_v56 = vrot.slane %v4573_v23, 4  ;;  %v1412_v54 = vrot.slane %v4571_v20, 4  ;;  %4118 = vrot.lane.b32.xlu0 %v4586_v32, %s4289_s23 }
 0x26e   : > { %v1039_v53 = vrot.slane %v1034_v14, 4  ;;  %v1042_v55 = vsel %vm823_vm14, %v1034_v14, %v1041_v25  ;;  %v1046_v27 = vpack.c.bf16 %v1038_v51, %v1038_v51  ;;  %1052 = vst.msk [vmem:[#allocation4] sm:$0xf] %vm1051_vm15, %v1043_v45  ;;  %v1354_v61 = vrot.slane %v4050_v11, 4 }
 0x26f   : > { %v1036_v57 = vsel %vm823_vm14, %v1035_v48, %v1018_v17  ;;  %v1050_v60 = vpack.c.bf16 %v1042_v55, %v1042_v55  ;;  %1058 = vst.msk [vmem:[#allocation4 + $0x18] sm:$0xf] %vm1051_vm15, %v1049_v46  ;;  %v1411_v1 = vsel %vm823_vm14, %v1410_v49, %v4571_v20  ;;  %v1413_v38 = vsel %vm823_vm14, %v4051_v28, %v1412_v54 }
 0x270   : > { %v1040_v62 = vsel %vm823_vm14, %v1039_v53, %v1022_v6  ;;  %v1044_v63 = vpack.c.bf16 %v1036_v57, %v1036_v57  ;;  %1055 = vst.msk [vmem:[#allocation4 + $0xc] sm:$0xf] %vm1051_vm15, %v1046_v27  ;;  %v1355_v3 = vsel %vm823_vm14, %v1354_v61, %v4573_v23  ;;  %v1357_v4 = vsel %vm823_vm14, %v4050_v11, %v1356_v56  ;;  %v4743_v6 = vpop.permute.xlu2 %4073  ;;  %v4054_v11 = vpop.permute.xlu0 %4053 }
 0x271   : > { %v1048_v0 = vpack.c.bf16 %v1040_v62, %v1040_v62  ;;  %1059 = vst.msk [vmem:[#allocation4 + $0x1c] sm:$0xf] %vm1051_vm15, %v1050_v60  ;;  %v4736_v5 = vperm.slane %v1411_v1, %v4613_v52  ;;  %v4739_v20 = vperm.slane %v1413_v38, %v4613_v52  ;;  %v1612_v28 = vrot.slane %v4594_v34, 4  ;;  %v4767_v46 = vpop.permute.xlu1 %4078 }
 0x272   : > { %1053 = vst.msk [vmem:[#allocation4 + $0x4] sm:$0xf] %vm1051_vm15, %v1044_v63  ;;  %v4011_v37 = vunpack.i.h.bf16 %v4608_v41  ;;  %v1668_v15 = vrot.slane %v4592_v33, 4  ;;  %v4747_v23 = vperm.slane %v1355_v3, %v4613_v52  ;;  %v1365_v58 = vperm.slane %v1357_v4, %v4613_v52 }
 0x273   : > { %1057 = vst.msk [vmem:[#allocation4 + $0x14] sm:$0xf] %vm1051_vm15, %v1048_v0  ;;  %v4036_v10 = vunpack.i.h.bf16 %v4681_v50  ;;  %v4035_v17 = vunpack.i.l.bf16 %v4681_v50  ;;  %v4071_v18 = vunpack.i.h.bf16 %v4069_v2  ;;  %v4070_v19 = vunpack.i.l.bf16 %v4069_v2 }
 0x274   : > { %v1436_v21 = vrot.slane %v4736_v5, 4  ;;  %v1448_v24 = vrot.slane %v4739_v20, 4  ;;  %v4076_v25 = vunpack.i.h.bf16 %v4743_v6  ;;  %v4075_v26 = vunpack.i.l.bf16 %v4743_v6 }
 0x275   : > { %v1666_v29 = vrot.slane %v4071_v18, 4  ;;  %v1669_v35 = vsel %vm823_vm14, %v4071_v18, %v1668_v15  ;;  %v4056_v36 = vunpack.i.h.bf16 %v4054_v11  ;;  %v1380_v16 = vrot.slane %v4747_v23, 4 }
 0x276   : > { %v1392_v39 = vrot.slane %v1365_v58, 4  ;;  %v4761_v40 = vperm.slane %v1669_v35, %v4613_v52  ;;  %v1610_v50 = vrot.slane %v4070_v19, 4  ;;  %v1424_v42 = vrot.slane %v4036_v10, 4 }
 0x277   : > { %v1368_v44 = vrot.slane %v4035_v17, 4  ;;  %v1667_v14 = vsel %vm823_vm14, %v1666_v29, %v4592_v33  ;;  %v1613_v45 = vsel %vm823_vm14, %v4070_v19, %v1612_v28  ;;  %v1680_v48 = vrot.slane %v4076_v25, 4 }
 0x278   : > { %v4772_v51 = vperm.slane %v1667_v14, %v4613_v52  ;;  %v1611_v49 = vsel %vm823_vm14, %v1610_v50, %v4594_v34  ;;  %v4777_v53 = vperm.slane %v1613_v45, %v4613_v52  ;;  %v4781_v47 = vrot.slane %v4075_v26, 4 }
 0x279   : > { %v4784_v33 = vperm.slane %v1611_v49, %v4613_v52  ;;  %v1422_v55 = vrot.slane %v4056_v36, 4  ;;  %v4055_v27 = vunpack.i.l.bf16 %v4054_v11  ;;  %v1704_v57 = vrot.slane %v4761_v40, 4 }
 0x27a   : > { %v1692_v56 = vrot.slane %v4772_v51, 4  ;;  %v1425_v34 = vsel %vm823_vm14, %v4056_v36, %v1424_v42  ;;  %v4081_v60 = vunpack.i.h.bf16 %v4767_v46  ;;  %v1648_v54 = vrot.slane %v4777_v53, 4 }
 0x27b   : > { %v1366_v61 = vrot.slane %v4055_v27, 4  ;;  %v1369_v62 = vsel %vm823_vm14, %v4055_v27, %v1368_v44  ;;  %v1423_v63 = vsel %vm823_vm14, %v1422_v55, %v4036_v10  ;;  %v1636_v0 = vrot.slane %v4784_v33, 4 }
 0x27c   : > { %v1377_v1 = vperm.slane %v1369_v62, %v4613_v52  ;;  %v1429_v43 = vperm.slane %v1423_v63, %v4613_v52  ;;  %v1433_v38 = vperm.slane %v1425_v34, %v4613_v52  ;;  %v4800_v3 = vrot.slane %v4081_v60, 4 }
 0x27d   : > { %v1367_v2 = vsel %vm823_vm14, %v1366_v61, %v4035_v17  ;;  %v4080_v4 = vunpack.i.l.bf16 %v4767_v46  ;;  %v4804_v28 = vsel %vm823_vm14, %v4081_v60, %v1680_v48 }
 0x27e   : > { %v1373_v15 = vperm.slane %v1367_v2, %v4613_v52  ;;  %v1390_v11 = vrot.slane %v1377_v1, 4  ;;  %v1393_v10 = vsel %vm823_vm14, %v1377_v1, %v1392_v39  ;;  %v1434_v18 = vrot.slane %v1429_v43, 4 }
 0x27f   : > { %v1401_v19 = vperm.slane %v1393_v10, %v4617_v59  ;;  %v1437_v29 = vsel %vm823_vm14, %v1429_v43, %v1436_v21  ;;  %v1446_v35 = vrot.slane %v1433_v38, 4  ;;  %v1449_v17 = vsel %vm823_vm14, %v1433_v38, %v1448_v24 }
 0x280   : > { %v1378_v36 = vrot.slane %v1373_v15, 4  ;;  %v1381_v50 = vsel %vm823_vm14, %v1373_v15, %v1380_v16  ;;  %v1391_v42 = vsel %vm823_vm14, %v1390_v11, %v1365_v58  ;;  %v1435_v44 = vsel %vm823_vm14, %v1434_v18, %v4736_v5 }
 0x281   : > { %v1389_v39 = vperm.slane %v1381_v50, %v4617_v59  ;;  %v1397_v14 = vperm.slane %v1391_v42, %v4617_v59  ;;  %v1408_v45 = vrot.slane %v1401_v19, 4  ;;  %v1441_v21 = vperm.slane %v1435_v44, %v4617_v59 }
 0x282   : > { %v1379_v24 = vsel %vm823_vm14, %v1378_v36, %v4747_v23  ;;  %v1445_v32 = vperm.slane %v1437_v29, %v4617_v59  ;;  %v1447_v16 = vsel %vm823_vm14, %v1446_v35, %v4739_v20  ;;  %v1457_v58 = vperm.slane %v1449_v17, %v4617_v59 }
 0x283   : > { %v1385_v48 = vperm.slane %v1379_v24, %v4617_v59  ;;  %v1404_v5 = vrot.slane %v1389_v39, 4  ;;  %v1406_v49 = vrot.slane %v1397_v14, 4  ;;  %v1409_v55 = vsel %vm823_vm14, 0.0, %v1408_v45 }
 0x284   : > { %v1453_v27 = vperm.slane %v1447_v16, %v4617_v59  ;;  %v1458_v34 = vrot.slane %v1441_v21, 4  ;;  %v1460_v60 = vrot.slane %v1445_v32, 4  ;;  %v1464_v61 = vrot.slane %v1457_v58, 4 }
 0x285   : > { %v1402_v62 = vrot.slane %v1385_v48, 4  ;;  %v1405_v23 = vsel %vm823_vm14, 0.0, %v1404_v5  ;;  %v1407_v63 = vsel %vm823_vm14, 0.0, %v1406_v49  ;;  %v1466_v20 = vsel %vm823_vm14, %v1404_v5, %v1385_v48 }
 0x286   : > { %v1459_v1 = vsel %vm823_vm14, 0.0, %v1458_v34  ;;  %v1461_v43 = vsel %vm823_vm14, 0.0, %v1460_v60  ;;  %v1462_v38 = vrot.slane %v1453_v27, 4  ;;  %v1465_v2 = vsel %vm823_vm14, 0.0, %v1464_v61 }
 0x287   : > { %v1403_v15 = vsel %vm823_vm14, 0.0, %v1402_v62  ;;  %v1470_v11 = vperm.slane %v1466_v20, %v4613_v52  ;;  %v1471_v10 = vrot.slane %v1405_v23, 4  ;;  %v1477_v18 = vsel %vm823_vm14, %v1408_v45, %v1397_v14 }
 0x288   : > { %v1463_v19 = vsel %vm823_vm14, 0.0, %v1462_v38  ;;  %v1481_v29 = vperm.slane %v1477_v18, %v4613_v52  ;;  %v1482_v35 = vrot.slane %v1409_v55, 4  ;;  %v1520_v17 = vsel %vm823_vm14, %v1460_v60, %v1441_v21 }
 0x289   : > { %v1472_v36 = vsel %vm823_vm14, %v1471_v10, %v1403_v15  ;;  %v1490_v50 = vrot.slane %v1470_v11, 4  ;;  %v1524_v42 = vperm.slane %v1520_v17, %v4613_v52  ;;  %v1525_v44 = vrot.slane %v1461_v43, 4 }
 0x28a   : > { %v1476_v39 = vperm.slane %v1472_v36, %v4613_v52  ;;  %v1483_v24 = vsel %vm823_vm14, %v1482_v35, %v1407_v63  ;;  %v1502_v32 = vrot.slane %v1481_v29, 4  ;;  %v1531_v14 = vsel %vm823_vm14, %v1464_v61, %v1453_v27 }
 0x28b   : > { %v1487_v45 = vperm.slane %v1483_v24, %v4613_v52  ;;  %v1526_v16 = vsel %vm823_vm14, %v1525_v44, %v1459_v1  ;;  %v1535_v58 = vperm.slane %v1531_v14, %v4613_v52  ;;  %v1536_v21 = vrot.slane %v1465_v2, 4 }
 0x28c   : > { %v1488_v48 = vrot.slane %v1476_v39, 4  ;;  %v1491_v5 = vsel %vm823_vm14, %v1476_v39, %v1490_v50  ;;  %v1530_v49 = vperm.slane %v1526_v16, %v4613_v52  ;;  %v1544_v55 = vrot.slane %v1524_v42, 4 }
 0x28d   : > { %v1499_v34 = vperm.slane %v1491_v5, %v4617_v59  ;;  %v1500_v60 = vrot.slane %v1487_v45, 4  ;;  %v1503_v62 = vsel %vm823_vm14, %v1487_v45, %v1502_v32  ;;  %v1537_v27 = vsel %vm823_vm14, %v1536_v21, %v1463_v19 }
 0x28e   : > { %v1489_v61 = vsel %vm823_vm14, %v1488_v48, %v1470_v11  ;;  %v1511_v23 = vperm.slane %v1503_v62, %v4617_v59  ;;  %v1541_v63 = vperm.slane %v1537_v27, %v4613_v52  ;;  %v1542_v20 = vrot.slane %v1530_v49, 4 }
 0x28f   : > { %v1495_v1 = vperm.slane %v1489_v61, %v4617_v59  ;;  %v1501_v43 = vsel %vm823_vm14, %v1500_v60, %v1481_v29  ;;  %v1518_v38 = vrot.slane %v1499_v34, 4  ;;  %v1545_v2 = vsel %vm823_vm14, %v1530_v49, %v1544_v55 }
 0x290   : > { %v1507_v15 = vperm.slane %v1501_v43, %v4617_v59  ;;  %v1516_v10 = vrot.slane %v1511_v23, 4  ;;  %v1543_v18 = vsel %vm823_vm14, %v1542_v20, %v1524_v42  ;;  %v1553_v19 = vperm.slane %v1545_v2, %v4617_v59 }
 0x291   : > { %v1514_v11 = vrot.slane %v1495_v1, 4  ;;  %v1519_v35 = vsel %vm823_vm14, %v1511_v23, %v1518_v38  ;;  %v1549_v17 = vperm.slane %v1543_v18, %v4617_v59  ;;  %v1554_v36 = vrot.slane %v1541_v63, 4 }
 0x292   : > { %v1512_v50 = vrot.slane %v1507_v15, 4  ;;  %v1517_v44 = vsel %vm823_vm14, %v1516_v10, %v1499_v34  ;;  %v1556_v29 = vrot.slane %v1535_v58, 4  ;;  %v1572_v39 = vrot.slane %v1553_v19, 4 }
 0x293   : > { %v1515_v24 = vsel %vm823_vm14, %v1507_v15, %v1514_v11  ;;  %v1555_v32 = vsel %vm823_vm14, %v1554_v36, %v1535_v58  ;;  %v1568_v14 = vrot.slane %v1549_v17, 4  ;;  %v1578_v45 = vpack.c.bf16 %v1517_v44, %v1517_v44 }
 0x294   : > { %v1513_v42 = vsel %vm823_vm14, %v1512_v50, %v1495_v1  ;;  %v1557_v16 = vsel %vm823_vm14, %v1541_v63, %v1556_v29  ;;  %v1561_v21 = vperm.slane %v1555_v32, %v4617_v59  ;;  %v1576_v48 = vpack.c.bf16 %v1515_v24, %v1515_v24 }
 0x295   : > { %v1565_v5 = vperm.slane %v1557_v16, %v4617_v59  ;;  %v1574_v49 = vpack.c.bf16 %v1513_v42, %v1513_v42  ;;  %v1580_v55 = vpack.c.bf16 %v1519_v35, %v1519_v35  ;;  %1586 = vst.msk [vmem:[#allocation6 + $0x10] sm:$0xf] %vm1051_vm15, %v1578_v45  ;;  %v1622_v34 = vrot.slane %v4080_v4, 4 }
 0x296   : > { %v1566_v60 = vrot.slane %v1561_v21, 4  ;;  %v1569_v58 = vsel %vm823_vm14, %v1561_v21, %v1568_v14  ;;  %1584 = vst.msk [vmem:[#allocation6 + $0x8] sm:$0xf] %vm1051_vm15, %v1576_v48  ;;  %v1625_v62 = vsel %vm823_vm14, %v4080_v4, %v4781_v47  ;;  %v1679_v27 = vsel %vm823_vm14, %v4800_v3, %v4076_v25 }
 0x297   : > { %v1570_v61 = vrot.slane %v1565_v5, 4  ;;  %v1573_v23 = vsel %vm823_vm14, %v1565_v5, %v1572_v39  ;;  %v1577_v63 = vpack.c.bf16 %v1569_v58, %v1569_v58  ;;  %1582 = vst.msk [vmem:[#allocation6] sm:$0xf] %vm1051_vm15, %v1574_v49  ;;  %v1623_v20 = vsel %vm823_vm14, %v1622_v34, %v4075_v26 }
 0x298   : > { %v1567_v1 = vsel %vm823_vm14, %v1566_v60, %v1549_v17  ;;  %v1581_v46 = vpack.c.bf16 %v1573_v23, %v1573_v23  ;;  %1588 = vst.msk [vmem:[#allocation6 + $0x18] sm:$0xf] %vm1051_vm15, %v1580_v55  ;;  %v1629_v47 = vperm.slane %v1623_v20, %v4613_v52  ;;  %v1633_v4 = vperm.slane %v1625_v62, %v4613_v52 }
 0x299   : > { %v1571_v25 = vsel %vm823_vm14, %v1570_v61, %v1553_v19  ;;  %v1575_v3 = vpack.c.bf16 %v1567_v1, %v1567_v1  ;;  %1585 = vst.msk [vmem:[#allocation6 + $0xc] sm:$0xf] %vm1051_vm15, %v1577_v63  ;;  %v1685_v43 = vperm.slane %v1679_v27, %v4613_v52  ;;  %v1689_v6 = vperm.slane %v4804_v28, %v4613_v52 }
 0x29a   : > { %v1579_v26 = vpack.c.bf16 %v1571_v25, %v1571_v25  ;;  %1589 = vst.msk [vmem:[#allocation6 + $0x1c] sm:$0xf] %vm1051_vm15, %v1581_v46  ;;  %v1634_v38 = vrot.slane %v1629_v47, 4  ;;  %v1637_v2 = vsel %vm823_vm14, %v1629_v47, %v1636_v0  ;;  %v1646_v15 = vrot.slane %v1633_v4, 4 }
 0x29b   : > { %1583 = vst.msk [vmem:[#allocation6 + $0x4] sm:$0xf] %vm1051_vm15, %v1575_v3  ;;  %v1645_v10 = vperm.slane %v1637_v2, %v4617_v59  ;;  %v1649_v18 = vsel %vm823_vm14, %v1633_v4, %v1648_v54  ;;  %v1690_v19 = vrot.slane %v1685_v43, 4  ;;  %v1693_v28 = vsel %vm823_vm14, %v1685_v43, %v1692_v56 }
 0x29c   : > { %1587 = vst.msk [vmem:[#allocation6 + $0x14] sm:$0xf] %vm1051_vm15, %v1579_v26  ;;  %v1635_v11 = vsel %vm823_vm14, %v1634_v38, %v4784_v33  ;;  %v1647_v0 = vsel %vm823_vm14, %v1646_v15, %v4777_v53  ;;  %v1657_v35 = vperm.slane %v1649_v18, %v4617_v59  ;;  %v1701_v17 = vperm.slane %v1693_v28, %v4617_v59 }
 0x29d   : > { %v1641_v36 = vperm.slane %v1635_v11, %v4617_v59  ;;  %v1653_v54 = vperm.slane %v1647_v0, %v4617_v59  ;;  %v1660_v50 = vrot.slane %v1645_v10, 4  ;;  %v1691_v56 = vsel %vm823_vm14, %v1690_v19, %v4772_v51 }
 0x29e   : > { %v1664_v44 = vrot.slane %v1657_v35, 4  ;;  %v1697_v29 = vperm.slane %v1691_v56, %v4617_v59  ;;  %v1702_v39 = vrot.slane %v1689_v6, 4  ;;  %v1705_v53 = vsel %vm823_vm14, %v1689_v6, %v1704_v57 }
 0x29f   : > { %v1658_v33 = vrot.slane %v1641_v36, 4  ;;  %v1661_v24 = vsel %vm823_vm14, 0.0, %v1660_v50  ;;  %v1662_v32 = vrot.slane %v1653_v54, 4  ;;  %v1713_v14 = vperm.slane %v1705_v53, %v4617_v59 }
 0x2a0   : > { %v1665_v45 = vsel %vm823_vm14, 0.0, %v1664_v44  ;;  %v1703_v42 = vsel %vm823_vm14, %v1702_v39, %v4761_v40  ;;  %v1714_v51 = vrot.slane %v1697_v29, 4  ;;  %v1716_v16 = vrot.slane %v1701_v17, 4 }
 0x2a1   : > { %v1659_v21 = vsel %vm823_vm14, 0.0, %v1658_v33  ;;  %v1663_v48 = vsel %vm823_vm14, 0.0, %v1662_v32  ;;  %v1709_v5 = vperm.slane %v1703_v42, %v4617_v59  ;;  %v1720_v57 = vrot.slane %v1713_v14, 4 }
 0x2a2   : > { %v1715_v49 = vsel %vm823_vm14, 0.0, %v1714_v51  ;;  %v1717_v55 = vsel %vm823_vm14, 0.0, %v1716_v16  ;;  %v1722_v34 = vsel %vm823_vm14, %v1660_v50, %v1641_v36  ;;  %v1727_v60 = vrot.slane %v1661_v24, 4  ;;  %v4956_v36 = vpop.permute.xlu0 %4058 }
 0x2a3   : > { %v1718_v58 = vrot.slane %v1709_v5, 4  ;;  %v1721_v62 = vsel %vm823_vm14, 0.0, %v1720_v57  ;;  %v1726_v40 = vperm.slane %v1722_v34, %v4613_v52  ;;  %v1733_v27 = vsel %vm823_vm14, %v1664_v44, %v1653_v54 }
 0x2a4   : > { %v1728_v61 = vsel %vm823_vm14, %v1727_v60, %v1659_v21  ;;  %v1737_v23 = vperm.slane %v1733_v27, %v4613_v52  ;;  %v1738_v63 = vrot.slane %v1665_v45, 4  ;;  %v1776_v20 = vsel %vm823_vm14, %v1716_v16, %v1697_v29 }
 0x2a5   : > { %v1719_v1 = vsel %vm823_vm14, 0.0, %v1718_v58  ;;  %v1732_v46 = vperm.slane %v1728_v61, %v4613_v52  ;;  %v1746_v47 = vrot.slane %v1726_v40, 4  ;;  %v1780_v4 = vperm.slane %v1776_v20, %v4613_v52 }
 0x2a6   : > { %v1739_v25 = vsel %vm823_vm14, %v1738_v63, %v1663_v48  ;;  %v1758_v3 = vrot.slane %v1737_v23, 4  ;;  %v1781_v43 = vrot.slane %v1717_v55, 4  ;;  %v1787_v6 = vsel %vm823_vm14, %v1720_v57, %v1709_v5 }
 0x2a7   : > { %v1743_v26 = vperm.slane %v1739_v25, %v4613_v52  ;;  %v1744_v38 = vrot.slane %v1732_v46, 4  ;;  %v1747_v2 = vsel %vm823_vm14, %v1732_v46, %v1746_v47  ;;  %v1791_v15 = vperm.slane %v1787_v6, %v4613_v52 }
 0x2a8   : > { %v1755_v10 = vperm.slane %v1747_v2, %v4617_v59  ;;  %v1782_v18 = vsel %vm823_vm14, %v1781_v43, %v1715_v49  ;;  %v1792_v19 = vrot.slane %v1721_v62, 4  ;;  %v1800_v28 = vrot.slane %v1780_v4, 4  ;;  %v4089_v43 = vpop.permute.xlu2 %4088 }
 0x2a9   : > { %v1745_v11 = vsel %vm823_vm14, %v1744_v38, %v1726_v40  ;;  %v1756_v0 = vrot.slane %v1743_v26, 4  ;;  %v1759_v35 = vsel %vm823_vm14, %v1743_v26, %v1758_v3  ;;  %v1786_v17 = vperm.slane %v1782_v18, %v4613_v52  ;;  %v4094_v38 = vpop.permute.xlu1 %4093 }
 0x2aa   : > { %v1751_v54 = vperm.slane %v1745_v11, %v4617_v59  ;;  %v1767_v50 = vperm.slane %v1759_v35, %v4617_v59  ;;  %v1774_v56 = vrot.slane %v1755_v10, 4  ;;  %v1793_v44 = vsel %vm823_vm14, %v1792_v19, %v1719_v1  ;;  %v4084_v46 = vpop.permute.xlu0 %4083 }
 0x2ab   : > { %v1757_v29 = vsel %vm823_vm14, %v1756_v0, %v1737_v23  ;;  %v1797_v39 = vperm.slane %v1793_v44, %v4613_v52  ;;  %v1798_v53 = vrot.slane %v1786_v17, 4  ;;  %v1801_v33 = vsel %vm823_vm14, %v1786_v17, %v1800_v28 }
 0x2ac   : > { %v1763_v24 = vperm.slane %v1757_v29, %v4617_v59  ;;  %v1770_v32 = vrot.slane %v1751_v54, 4  ;;  %v1772_v14 = vrot.slane %v1767_v50, 4  ;;  %v1775_v45 = vsel %vm823_vm14, %v1767_v50, %v1774_v56 }
 0x2ad   : > { %v1799_v42 = vsel %vm823_vm14, %v1798_v53, %v1780_v4  ;;  %v1809_v51 = vperm.slane %v1801_v33, %v4617_v59  ;;  %v1810_v16 = vrot.slane %v1797_v39, 4  ;;  %v1812_v21 = vrot.slane %v1791_v15, 4 }
 0x2ae   : > { %v1768_v48 = vrot.slane %v1763_v24, 4  ;;  %v1771_v5 = vsel %vm823_vm14, %v1763_v24, %v1770_v32  ;;  %v1773_v57 = vsel %vm823_vm14, %v1772_v14, %v1755_v10  ;;  %v1805_v49 = vperm.slane %v1799_v42, %v4617_v59 }
 0x2af   : > { %v1811_v55 = vsel %vm823_vm14, %v1810_v16, %v1791_v15  ;;  %v1813_v34 = vsel %vm823_vm14, %v1797_v39, %v1812_v21  ;;  %v1828_v60 = vrot.slane %v1809_v51, 4  ;;  %v1832_v58 = vpack.c.bf16 %v1771_v5, %v1771_v5 }
 0x2b0   : > { %v1769_v62 = vsel %vm823_vm14, %v1768_v48, %v1751_v54  ;;  %v1817_v40 = vperm.slane %v1811_v55, %v4617_v59  ;;  %v1821_v27 = vperm.slane %v1813_v34, %v4617_v59  ;;  %v1824_v61 = vrot.slane %v1805_v49, 4 }
 0x2b1   : > { %v4010_v23 = vunpack.i.l.bf16 %v4608_v41  ;;  %v1830_v63 = vpack.c.bf16 %v1769_v62, %v1769_v62  ;;  %v1834_v20 = vpack.c.bf16 %v1773_v57, %v1773_v57  ;;  %v1836_v1 = vpack.c.bf16 %v1775_v45, %v1775_v45  ;;  %1841 = vst.msk [vmem:[#allocation4 + $0x28] sm:$0xf] %vm1051_vm15, %v1832_v58 }
 0x2b2   : > { %v1822_v47 = vrot.slane %v1817_v40, 4  ;;  %v1825_v4 = vsel %vm823_vm14, %v1817_v40, %v1824_v61  ;;  %v1826_v25 = vrot.slane %v1821_v27, 4  ;;  %v1829_v3 = vsel %vm823_vm14, %v1821_v27, %v1828_v60 }
 0x2b3   : > { %v1156_v6 = vrot.slane %v4011_v37, 4  ;;  %v1833_v26 = vpack.c.bf16 %v1825_v4, %v1825_v4  ;;  %1839 = vst.msk [vmem:[#allocation4 + $0x20] sm:$0xf] %vm1051_vm15, %v1830_v63  ;;  %v4086_v10 = vunpack.i.h.bf16 %v4084_v46  ;;  %v4085_v18 = vunpack.i.l.bf16 %v4084_v46 }
 0x2b4   : > { %v1823_v2 = vsel %vm823_vm14, %v1822_v47, %v1805_v49  ;;  %v1827_v15 = vsel %vm823_vm14, %v1826_v25, %v1809_v51  ;;  %1843 = vst.msk [vmem:[#allocation4 + $0x30] sm:$0xf] %vm1051_vm15, %v1834_v20  ;;  %v1837_v11 = vpack.c.bf16 %v1829_v3, %v1829_v3  ;;  %v4091_v0 = vunpack.i.h.bf16 %v4089_v43 }
 0x2b5   : > { %v1831_v19 = vpack.c.bf16 %v1823_v2, %v1823_v2  ;;  %v1835_v28 = vpack.c.bf16 %v1827_v15, %v1827_v15  ;;  %1842 = vst.msk [vmem:[#allocation4 + $0x2c] sm:$0xf] %vm1051_vm15, %v1833_v26  ;;  %v1100_v35 = vrot.slane %v4010_v23, 4  ;;  %v4090_v17 = vunpack.i.l.bf16 %v4089_v43 }
 0x2b6   : > { %1845 = vst.msk [vmem:[#allocation4 + $0x38] sm:$0xf] %vm1051_vm15, %v1836_v1  ;;  %v4096_v54 = vunpack.i.h.bf16 %v4094_v38  ;;  %v1112_v50 = vrot.slane %v4085_v18, 4  ;;  %v1154_v56 = vrot.slane %v4091_v0, 4  ;;  %v1157_v44 = vsel %vm823_vm14, %v4091_v0, %v1156_v6 }
 0x2b7   : > { %1840 = vst.msk [vmem:[#allocation4 + $0x24] sm:$0xf] %vm1051_vm15, %v1831_v19  ;;  %v4095_v29 = vunpack.i.l.bf16 %v4094_v38  ;;  %v1168_v39 = vrot.slane %v4086_v10, 4  ;;  %v1098_v53 = vrot.slane %v4090_v17, 4  ;;  %v1101_v33 = vsel %vm823_vm14, %v4090_v17, %v1100_v35 }
 0x2b8   : > { %1844 = vst.msk [vmem:[#allocation4 + $0x34] sm:$0xf] %vm1051_vm15, %v1835_v28  ;;  %v1166_v24 = vrot.slane %v4096_v54, 4  ;;  %v1155_v32 = vsel %vm823_vm14, %v1154_v56, %v4011_v37  ;;  %v1109_v14 = vperm.slane %v1101_v33, %v4613_v52  ;;  %v1165_v16 = vperm.slane %v1157_v44, %v4613_v52 }
 0x2b9   : > { %1846 = vst.msk [vmem:[#allocation4 + $0x3c] sm:$0xf] %vm1051_vm15, %v1837_v11  ;;  %v1110_v45 = vrot.slane %v4095_v29, 4  ;;  %v1113_v42 = vsel %vm823_vm14, %v4095_v29, %v1112_v50  ;;  %v1161_v51 = vperm.slane %v1155_v32, %v4613_v52  ;;  %v1099_v21 = vsel %vm823_vm14, %v1098_v53, %v4010_v23 }
 0x2ba   : > { %v1121_v48 = vperm.slane %v1113_v42, %v4613_v52  ;;  %v1105_v5 = vperm.slane %v1099_v21, %v4613_v52  ;;  %v1136_v57 = vrot.slane %v1109_v14, 4  ;;  %v1167_v37 = vsel %vm823_vm14, %v1166_v24, %v4086_v10 }
 0x2bb   : > { %v1111_v41 = vsel %vm823_vm14, %v1110_v45, %v4085_v18  ;;  %v1180_v49 = vrot.slane %v1161_v51, 4  ;;  %v1169_v60 = vsel %vm823_vm14, %v4096_v54, %v1168_v39  ;;  %v1173_v40 = vperm.slane %v1167_v37, %v4613_v52 }
 0x2bc   : > { %v1117_v55 = vperm.slane %v1111_v41, %v4613_v52  ;;  %v1134_v34 = vrot.slane %v1121_v48, 4  ;;  %v1124_v58 = vrot.slane %v1105_v5, 4  ;;  %v1137_v62 = vsel %vm823_vm14, %v1121_v48, %v1136_v57 }
 0x2bd   : > { %v1177_v27 = vperm.slane %v1169_v60, %v4613_v52  ;;  %v1192_v61 = vrot.slane %v1165_v16, 4  ;;  %v1145_v20 = vperm.slane %v1137_v62, %v4617_v59  ;;  %v1178_v47 = vrot.slane %v1173_v40, 4 }
 0x2be   : > { %v1122_v23 = vrot.slane %v1117_v55, 4  ;;  %v1135_v63 = vsel %vm823_vm14, %v1134_v34, %v1109_v14  ;;  %v1125_v1 = vsel %vm823_vm14, %v1117_v55, %v1124_v58  ;;  %v1181_v4 = vsel %vm823_vm14, %v1173_v40, %v1180_v49 }
 0x2bf   : > { %v1141_v46 = vperm.slane %v1135_v63, %v4617_v59  ;;  %v1133_v3 = vperm.slane %v1125_v1, %v4617_v59  ;;  %v1152_v43 = vrot.slane %v1145_v20, 4  ;;  %v1189_v6 = vperm.slane %v1181_v4, %v4617_v59 }
 0x2c0   : > { %v1123_v25 = vsel %vm823_vm14, %v1122_v23, %v1105_v5  ;;  %v1179_v2 = vsel %vm823_vm14, %v1178_v47, %v1161_v51  ;;  %v1190_v15 = vrot.slane %v1177_v27, 4  ;;  %v1193_v28 = vsel %vm823_vm14, %v1177_v27, %v1192_v61 }
 0x2c1   : > { %v1129_v26 = vperm.slane %v1123_v25, %v4617_v59  ;;  %v1150_v38 = vrot.slane %v1141_v46, 4  ;;  %v1148_v10 = vrot.slane %v1133_v3, 4  ;;  %v1153_v18 = vsel %vm823_vm14, 0.0, %v1152_v43 }
 0x2c2   : > { %v1185_v19 = vperm.slane %v1179_v2, %v4617_v59  ;;  %v1191_v35 = vsel %vm823_vm14, %v1190_v15, %v1165_v16  ;;  %v1201_v17 = vperm.slane %v1193_v28, %v4617_v59  ;;  %v1204_v44 = vrot.slane %v1189_v6, 4 }
 0x2c3   : > { %v1146_v11 = vrot.slane %v1129_v26, 4  ;;  %v1151_v0 = vsel %vm823_vm14, 0.0, %v1150_v38  ;;  %v1149_v54 = vsel %vm823_vm14, 0.0, %v1148_v10  ;;  %v1197_v50 = vperm.slane %v1191_v35, %v4617_v59 }
 0x2c4   : > { %v1202_v56 = vrot.slane %v1185_v19, 4  ;;  %v1208_v39 = vrot.slane %v1201_v17, 4  ;;  %v1210_v53 = vsel %vm823_vm14, %v1148_v10, %v1129_v26  ;;  %v1215_v33 = vrot.slane %v1149_v54, 4 }
 0x2c5   : > { %v1147_v29 = vsel %vm823_vm14, 0.0, %v1146_v11  ;;  %v1205_v32 = vsel %vm823_vm14, 0.0, %v1204_v44  ;;  %v1206_v14 = vrot.slane %v1197_v50, 4  ;;  %v1214_v45 = vperm.slane %v1210_v53, %v4613_v52 }
 0x2c6   : > { %v1203_v24 = vsel %vm823_vm14, 0.0, %v1202_v56  ;;  %v1209_v42 = vsel %vm823_vm14, 0.0, %v1208_v39  ;;  %v1216_v51 = vsel %vm823_vm14, %v1215_v33, %v1147_v29  ;;  %v1221_v16 = vsel %vm823_vm14, %v1152_v43, %v1141_v46 }
 0x2c7   : > { %v1226_v21 = vrot.slane %v1153_v18, 4  ;;  %v1207_v48 = vsel %vm823_vm14, 0.0, %v1206_v14  ;;  %v1220_v5 = vperm.slane %v1216_v51, %v4613_v52  ;;  %v1225_v57 = vperm.slane %v1221_v16, %v4613_v52 }
 0x2c8   : > { %v1234_v41 = vrot.slane %v1214_v45, 4  ;;  %v1264_v49 = vsel %vm823_vm14, %v1204_v44, %v1185_v19  ;;  %v1269_v55 = vrot.slane %v1205_v32, 4  ;;  %v1275_v34 = vsel %vm823_vm14, %v1208_v39, %v1197_v50 }
 0x2c9   : > { %v1227_v37 = vsel %vm823_vm14, %v1226_v21, %v1151_v0  ;;  %v1232_v58 = vrot.slane %v1220_v5, 4  ;;  %v1246_v40 = vrot.slane %v1225_v57, 4  ;;  %v1268_v61 = vperm.slane %v1264_v49, %v4613_v52 }
 0x2ca   : > { %v1231_v60 = vperm.slane %v1227_v37, %v4613_v52  ;;  %v1235_v62 = vsel %vm823_vm14, %v1220_v5, %v1234_v41  ;;  %v1270_v23 = vsel %vm823_vm14, %v1269_v55, %v1203_v24  ;;  %v1279_v63 = vperm.slane %v1275_v34, %v4613_v52  ;;  %v4099_v55 = vpop.permute.xlu2 %4098 }
 0x2cb   : > { %v1243_v27 = vperm.slane %v1235_v62, %v4617_v59  ;;  %v1233_v20 = vsel %vm823_vm14, %v1232_v58, %v1214_v45  ;;  %v1274_v47 = vperm.slane %v1270_v23, %v4613_v52  ;;  %v1280_v43 = vrot.slane %v1209_v42, 4 }
 0x2cc   : > { %v1244_v1 = vrot.slane %v1231_v60, 4  ;;  %v1247_v46 = vsel %vm823_vm14, %v1231_v60, %v1246_v40  ;;  %v1239_v4 = vperm.slane %v1233_v20, %v4617_v59  ;;  %v1288_v38 = vrot.slane %v1268_v61, 4 }
 0x2cd   : > { %v1255_v25 = vperm.slane %v1247_v46, %v4617_v59  ;;  %v1262_v3 = vrot.slane %v1243_v27, 4  ;;  %v1286_v26 = vrot.slane %v1274_v47, 4  ;;  %v1300_v2 = vrot.slane %v1279_v63, 4 }
 0x2ce   : > { %v1245_v6 = vsel %vm823_vm14, %v1244_v1, %v1225_v57  ;;  %v1258_v10 = vrot.slane %v1239_v4, 4  ;;  %v1281_v28 = vsel %vm823_vm14, %v1280_v43, %v1207_v48  ;;  %v1289_v0 = vsel %vm823_vm14, %v1274_v47, %v1288_v38 }
 0x2cf   : > { %v1251_v15 = vperm.slane %v1245_v6, %v4617_v59  ;;  %v1260_v18 = vrot.slane %v1255_v25, 4  ;;  %v1263_v19 = vsel %vm823_vm14, %v1255_v25, %v1262_v3  ;;  %v1287_v11 = vsel %vm823_vm14, %v1286_v26, %v1268_v61 }
 0x2d0   : > { %v1324_v35 = vpack.c.bf16 %v1263_v19, %v1263_v19  ;;  %v1285_v56 = vperm.slane %v1281_v28, %v4613_v52  ;;  %v1293_v44 = vperm.slane %v1287_v11, %v4617_v59  ;;  %v1297_v29 = vperm.slane %v1289_v0, %v4617_v59 }
 0x2d1   : > { %v1256_v17 = vrot.slane %v1251_v15, 4  ;;  %v1259_v54 = vsel %vm823_vm14, %v1251_v15, %v1258_v10  ;;  %v1261_v50 = vsel %vm823_vm14, %v1260_v18, %v1243_v27  ;;  %v4066_v40 = vunpack.i.h.bf16 %v4696_v7 }
 0x2d2   : > { %v1320_v39 = vpack.c.bf16 %v1259_v54, %v1259_v54  ;;  %v1322_v53 = vpack.c.bf16 %v1261_v50, %v1261_v50  ;;  %1332 = vst.msk [vmem:[#allocation5 + $0x18] sm:$0xf] %vm1051_vm15, %v1324_v35  ;;  %v1298_v24 = vrot.slane %v1285_v56, 4  ;;  %v1301_v32 = vsel %vm823_vm14, %v1285_v56, %v1300_v2  ;;  %v4109_v3 = vpop.permute.xlu2 %4108 }
 0x2d3   : > { %v1257_v33 = vsel %vm823_vm14, %v1256_v17, %v1239_v4  ;;  %v1309_v14 = vperm.slane %v1301_v32, %v4617_v59  ;;  %v1312_v45 = vrot.slane %v1293_v44, 4  ;;  %v1316_v42 = vrot.slane %v1297_v29, 4 }
 0x2d4   : > { %v1318_v51 = vpack.c.bf16 %v1257_v33, %v1257_v33  ;;  %1328 = vst.msk [vmem:[#allocation5 + $0x8] sm:$0xf] %vm1051_vm15, %v1320_v39  ;;  %v1299_v16 = vsel %vm823_vm14, %v1298_v24, %v1279_v63  ;;  %v4101_v27 = vunpack.i.h.bf16 %v4099_v55  ;;  %v4100_v61 = vunpack.i.l.bf16 %v4099_v55 }
 0x2d5   : > { %1330 = vst.msk [vmem:[#allocation5 + $0x10] sm:$0xf] %vm1051_vm15, %v1322_v53  ;;  %v1305_v21 = vperm.slane %v1299_v16, %v4617_v59  ;;  %v1314_v48 = vrot.slane %v1309_v14, 4  ;;  %v1317_v5 = vsel %vm823_vm14, %v1309_v14, %v1316_v42  ;;  %v2200_v23 = vrot.slane %v4580_v30, 4 }
 0x2d6   : > { %1326 = vst.msk [vmem:[#allocation5] sm:$0xf] %vm1051_vm15, %v1318_v51  ;;  %v1325_v57 = vpack.c.bf16 %v1317_v5, %v1317_v5  ;;  %v2198_v63 = vrot.slane %v4066_v40, 4  ;;  %v4065_v20 = vunpack.i.l.bf16 %v4696_v7  ;;  %v4060_v1 = vunpack.i.l.bf16 %v4956_v36  ;;  %v5093_v7 = vpop.permute.xlu1 %4113 }
 0x2d7   : > { %v1310_v41 = vrot.slane %v1305_v21, 4  ;;  %v1313_v37 = vsel %vm823_vm14, %v1305_v21, %v1312_v45  ;;  %v1315_v49 = vsel %vm823_vm14, %v1314_v48, %v1297_v29  ;;  %v2201_v46 = vsel %vm823_vm14, %v4066_v40, %v2200_v23  ;;  %v4104_v39 = vpop.permute.xlu0 %4103 }
 0x2d8   : > { %v1321_v34 = vpack.c.bf16 %v1313_v37, %v1313_v37  ;;  %v1323_v60 = vpack.c.bf16 %v1315_v49, %v1315_v49  ;;  %1333 = vst.msk [vmem:[#allocation5 + $0x1c] sm:$0xf] %vm1051_vm15, %v1325_v57  ;;  %v4061_v47 = vunpack.i.h.bf16 %v4956_v36  ;;  %v1941_v4 = vrot.slane %v4101_v27, 4 }
 0x2d9   : > { %v1311_v58 = vsel %vm823_vm14, %v1310_v41, %v1293_v44  ;;  %v1885_v25 = vrot.slane %v4100_v61, 4  ;;  %v2144_v43 = vrot.slane %v4582_v31, 4  ;;  %v2199_v6 = vsel %vm823_vm14, %v2198_v63, %v4580_v30 }
 0x2da   : > { %v1319_v62 = vpack.c.bf16 %v1311_v58, %v1311_v58  ;;  %1329 = vst.msk [vmem:[#allocation5 + $0xc] sm:$0xf] %vm1051_vm15, %v1321_v34  ;;  %v5091_v26 = vperm.slane %v2201_v46, %v4613_v52  ;;  %v2142_v38 = vrot.slane %v4065_v20, 4  ;;  %v1887_v2 = vrot.slane %v4060_v1, 4 }
 0x2db   : > { %1331 = vst.msk [vmem:[#allocation5 + $0x14] sm:$0xf] %vm1051_vm15, %v1323_v60  ;;  %v2145_v15 = vsel %vm823_vm14, %v4065_v20, %v2144_v43  ;;  %v1943_v10 = vrot.slane %v4061_v47, 4  ;;  %v4111_v18 = vunpack.i.h.bf16 %v4109_v3  ;;  %v1942_v36 = vsel %vm823_vm14, %v1941_v4, %v4061_v47 }
 0x2dc   : > { %1327 = vst.msk [vmem:[#allocation5 + $0x4] sm:$0xf] %vm1051_vm15, %v1319_v62  ;;  %v1886_v19 = vsel %vm823_vm14, %v1885_v25, %v4060_v1  ;;  %v1888_v28 = vsel %vm823_vm14, %v4100_v61, %v1887_v2  ;;  %v4110_v11 = vunpack.i.l.bf16 %v4109_v3  ;;  %v5100_v30 = vperm.slane %v2199_v6, %v4613_v52 }
 0x2dd   : > { %v4116_v0 = vunpack.i.h.bf16 %v5093_v7  ;;  %v2236_v35 = vrot.slane %v5091_v26, 4  ;;  %v2143_v17 = vsel %vm823_vm14, %v2142_v38, %v4582_v31  ;;  %v1944_v54 = vsel %vm823_vm14, %v4101_v27, %v1943_v10 }
 0x2de   : > { %v5108_v50 = vperm.slane %v2145_v15, %v4613_v52  ;;  %v1948_v56 = vperm.slane %v1942_v36, %v4613_v52  ;;  %v1892_v44 = vperm.slane %v1886_v19, %v4613_v52  ;;  %v1896_v29 = vperm.slane %v1888_v28, %v4613_v52 }
 0x2df   : > { %v1953_v53 = vrot.slane %v4111_v18, 4  ;;  %v1897_v33 = vrot.slane %v4110_v11, 4  ;;  %v4106_v24 = vunpack.i.h.bf16 %v4104_v39  ;;  %v4105_v32 = vunpack.i.l.bf16 %v4104_v39 }
 0x2e0   : > { %v2224_v14 = vrot.slane %v5100_v30, 4  ;;  %v5115_v31 = vperm.slane %v2143_v17, %v4613_v52  ;;  %v5119_v45 = vrot.slane %v4116_v0, 4  ;;  %v1952_v42 = vperm.slane %v1944_v54, %v4613_v52 }
 0x2e1   : > { %v1955_v51 = vrot.slane %v4106_v24, 4  ;;  %v1898_v16 = vsel %vm823_vm14, %v1897_v33, %v4105_v32  ;;  %v1899_v21 = vrot.slane %v4105_v32, 4  ;;  %v1954_v48 = vsel %vm823_vm14, %v1953_v53, %v4106_v24 }
 0x2e2   : > { %v4115_v5 = vunpack.i.l.bf16 %v5093_v7  ;;  %v1911_v57 = vrot.slane %v1892_v44, 4  ;;  %v1904_v41 = vperm.slane %v1898_v16, %v4613_v52  ;;  %v1960_v37 = vperm.slane %v1954_v48, %v4613_v52 }
 0x2e3   : > { %v1967_v49 = vrot.slane %v1948_v56, 4  ;;  %v1923_v55 = vrot.slane %v1896_v29, 4  ;;  %v1900_v34 = vsel %vm823_vm14, %v4110_v11, %v1899_v21  ;;  %v1956_v60 = vsel %vm823_vm14, %v4111_v18, %v1955_v51 }
 0x2e4   : > { %v1908_v58 = vperm.slane %v1900_v34, %v4613_v52  ;;  %v1909_v62 = vrot.slane %v1904_v41, 4  ;;  %v1912_v40 = vsel %vm823_vm14, %v1904_v41, %v1911_v57  ;;  %v1964_v27 = vperm.slane %v1956_v60, %v4613_v52 }
 0x2e5   : > { %v1979_v61 = vrot.slane %v1952_v42, 4  ;;  %v1920_v23 = vperm.slane %v1912_v40, %v4617_v59  ;;  %v1965_v63 = vrot.slane %v1960_v37, 4  ;;  %v1968_v20 = vsel %vm823_vm14, %v1960_v37, %v1967_v49 }
 0x2e6   : > { %v1910_v1 = vsel %vm823_vm14, %v1909_v62, %v1892_v44  ;;  %v1921_v46 = vrot.slane %v1908_v58, 4  ;;  %v1924_v47 = vsel %vm823_vm14, %v1908_v58, %v1923_v55  ;;  %v1976_v4 = vperm.slane %v1968_v20, %v4617_v59 }
 0x2e7   : > { %v1916_v25 = vperm.slane %v1910_v1, %v4617_v59  ;;  %v1932_v3 = vperm.slane %v1924_v47, %v4617_v59  ;;  %v1935_v43 = vrot.slane %v1920_v23, 4  ;;  %v1966_v6 = vsel %vm823_vm14, %v1965_v63, %v1948_v56 }
 0x2e8   : > { %v1922_v38 = vsel %vm823_vm14, %v1921_v46, %v1896_v29  ;;  %v1972_v2 = vperm.slane %v1966_v6, %v4617_v59  ;;  %v1977_v15 = vrot.slane %v1964_v27, 4  ;;  %v1980_v10 = vsel %vm823_vm14, %v1964_v27, %v1979_v61 }
 0x2e9   : > { %v1928_v18 = vperm.slane %v1922_v38, %v4617_v59  ;;  %v1933_v36 = vrot.slane %v1916_v25, 4  ;;  %v1936_v19 = vsel %vm823_vm14, 0.0, %v1935_v43  ;;  %v1939_v28 = vrot.slane %v1932_v3, 4 }
 0x2ea   : > { %v1978_v11 = vsel %vm823_vm14, %v1977_v15, %v1952_v42  ;;  %v1988_v17 = vperm.slane %v1980_v10, %v4617_v59  ;;  %v1989_v54 = vrot.slane %v1972_v2, 4  ;;  %v1991_v44 = vrot.slane %v1976_v4, 4 }
 0x2eb   : > { %v1934_v56 = vsel %vm823_vm14, 0.0, %v1933_v36  ;;  %v1937_v29 = vrot.slane %v1928_v18, 4  ;;  %v1940_v39 = vsel %vm823_vm14, 0.0, %v1939_v28  ;;  %v1984_v53 = vperm.slane %v1978_v11, %v4617_v59 }
 0x2ec   : > { %v1990_v33 = vsel %vm823_vm14, 0.0, %v1989_v54  ;;  %v1992_v24 = vsel %vm823_vm14, 0.0, %v1991_v44  ;;  %v1995_v32 = vrot.slane %v1988_v17, 4  ;;  %v1997_v51 = vsel %vm823_vm14, %v1935_v43, %v1916_v25 }
 0x2ed   : > { %v1938_v42 = vsel %vm823_vm14, 0.0, %v1937_v29  ;;  %v1993_v16 = vrot.slane %v1984_v53, 4  ;;  %v2001_v21 = vperm.slane %v1997_v51, %v4613_v52  ;;  %v2002_v48 = vrot.slane %v1936_v19, 4 }
 0x2ee   : > { %v1996_v57 = vsel %vm823_vm14, 0.0, %v1995_v32  ;;  %v2008_v41 = vsel %vm823_vm14, %v1939_v28, %v1928_v18  ;;  %v2013_v37 = vrot.slane %v1940_v39, 4  ;;  %v2051_v49 = vsel %vm823_vm14, %v1991_v44, %v1972_v2 }
 0x2ef   : > { %v1994_v55 = vsel %vm823_vm14, 0.0, %v1993_v16  ;;  %v2003_v34 = vsel %vm823_vm14, %v2002_v48, %v1934_v56  ;;  %v2012_v60 = vperm.slane %v2008_v41, %v4613_v52  ;;  %v2021_v58 = vrot.slane %v2001_v21, 4  ;;  %v4119_v41 = vpop.permute.xlu0 %4118 }
 0x2f0   : > { %v2007_v62 = vperm.slane %v2003_v34, %v4613_v52  ;;  %v2014_v40 = vsel %vm823_vm14, %v2013_v37, %v1938_v42  ;;  %v2055_v27 = vperm.slane %v2051_v49, %v4613_v52  ;;  %v2056_v61 = vrot.slane %v1992_v24, 4 }
 0x2f1   : > { %v2018_v23 = vperm.slane %v2014_v40, %v4613_v52  ;;  %v2033_v63 = vrot.slane %v2012_v60, 4  ;;  %v2062_v20 = vsel %vm823_vm14, %v1995_v32, %v1984_v53  ;;  %v2067_v1 = vrot.slane %v1996_v57, 4 }
 0x2f2   : > { %v2019_v46 = vrot.slane %v2007_v62, 4  ;;  %v2022_v47 = vsel %vm823_vm14, %v2007_v62, %v2021_v58  ;;  %v2057_v4 = vsel %vm823_vm14, %v2056_v61, %v1990_v33  ;;  %v2066_v25 = vperm.slane %v2062_v20, %v4613_v52 }
 0x2f3   : > { %v2030_v3 = vperm.slane %v2022_v47, %v4617_v59  ;;  %v2031_v43 = vrot.slane %v2018_v23, 4  ;;  %v2034_v6 = vsel %vm823_vm14, %v2018_v23, %v2033_v63  ;;  %v2061_v38 = vperm.slane %v2057_v4, %v4613_v52 }
 0x2f4   : > { %v2020_v2 = vsel %vm823_vm14, %v2019_v46, %v2001_v21  ;;  %v2042_v15 = vperm.slane %v2034_v6, %v4617_v59  ;;  %v2068_v10 = vsel %vm823_vm14, %v2067_v1, %v1994_v55  ;;  %v2075_v18 = vrot.slane %v2055_v27, 4 }
 0x2f5   : > { %v2026_v36 = vperm.slane %v2020_v2, %v4617_v59  ;;  %v2032_v19 = vsel %vm823_vm14, %v2031_v43, %v2012_v60  ;;  %v2049_v28 = vrot.slane %v2030_v3, 4  ;;  %v2072_v11 = vperm.slane %v2068_v10, %v4613_v52 }
 0x2f6   : > { %v2038_v17 = vperm.slane %v2032_v19, %v4617_v59  ;;  %v2047_v54 = vrot.slane %v2042_v15, 4  ;;  %v2073_v44 = vrot.slane %v2061_v38, 4  ;;  %v2076_v56 = vsel %vm823_vm14, %v2061_v38, %v2075_v18 }
 0x2f7   : > { %v2045_v29 = vrot.slane %v2026_v36, 4  ;;  %v2050_v39 = vsel %vm823_vm14, %v2042_v15, %v2049_v28  ;;  %v2084_v53 = vperm.slane %v2076_v56, %v4617_v59  ;;  %v2085_v33 = vrot.slane %v2072_v11, 4 }
 0x2f8   : > { %v2043_v24 = vrot.slane %v2038_v17, 4  ;;  %v2048_v32 = vsel %vm823_vm14, %v2047_v54, %v2030_v3  ;;  %v2074_v51 = vsel %vm823_vm14, %v2073_v44, %v2055_v27  ;;  %v2087_v42 = vrot.slane %v2066_v25, 4 }
 0x2f9   : > { %v2046_v16 = vsel %vm823_vm14, %v2038_v17, %v2045_v29  ;;  %v2080_v21 = vperm.slane %v2074_v51, %v4617_v59  ;;  %v2086_v48 = vsel %vm823_vm14, %v2085_v33, %v2066_v25  ;;  %v2103_v57 = vrot.slane %v2084_v53, 4 }
 0x2fa   : > { %v2044_v37 = vsel %vm823_vm14, %v2043_v24, %v2026_v36  ;;  %v2088_v49 = vsel %vm823_vm14, %v2072_v11, %v2087_v42  ;;  %v2092_v55 = vperm.slane %v2086_v48, %v4617_v59  ;;  %v2107_v34 = vpack.c.bf16 %v2046_v16, %v2046_v16 }
 0x2fb   : > { %v2096_v60 = vperm.slane %v2088_v49, %v4617_v59  ;;  %v2099_v58 = vrot.slane %v2080_v21, 4  ;;  %v2105_v62 = vpack.c.bf16 %v2044_v37, %v2044_v37  ;;  %v2109_v40 = vpack.c.bf16 %v2048_v32, %v2048_v32 }
 0x2fc   : > { %v2097_v27 = vrot.slane %v2092_v55, 4  ;;  %v2111_v61 = vpack.c.bf16 %v2050_v39, %v2050_v39  ;;  %2116 = vst.msk [vmem:[#allocation5 + $0x28] sm:$0xf] %vm1051_vm15, %v2107_v34  ;;  %v4121_v23 = vunpack.i.h.bf16 %v4119_v41  ;;  %v4120_v63 = vunpack.i.l.bf16 %v4119_v41 }
 0x2fd   : > { %v2156_v20 = vrot.slane %v4115_v5, 4  ;;  %v2100_v1 = vsel %vm823_vm14, %v2092_v55, %v2099_v58  ;;  %v2101_v46 = vrot.slane %v2096_v60, 4  ;;  %v2104_v47 = vsel %vm823_vm14, %v2096_v60, %v2103_v57  ;;  %2114 = vst.msk [vmem:[#allocation5 + $0x20] sm:$0xf] %vm1051_vm15, %v2105_v62 }
 0x2fe   : > { %v2098_v4 = vsel %vm823_vm14, %v2097_v27, %v2080_v21  ;;  %v2108_v25 = vpack.c.bf16 %v2100_v1, %v2100_v1  ;;  %v2112_v3 = vpack.c.bf16 %v2104_v47, %v2104_v47  ;;  %2118 = vst.msk [vmem:[#allocation5 + $0x30] sm:$0xf] %vm1051_vm15, %v2109_v40  ;;  %v2210_v43 = vrot.slane %v4121_v23, 4 }
 0x2ff   : > { %v2102_v6 = vsel %vm823_vm14, %v2101_v46, %v2084_v53  ;;  %v2106_v38 = vpack.c.bf16 %v2098_v4, %v2098_v4  ;;  %2120 = vst.msk [vmem:[#allocation5 + $0x38] sm:$0xf] %vm1051_vm15, %v2111_v61  ;;  %v2213_v2 = vsel %vm823_vm14, %v4121_v23, %v5119_v45  ;;  %v2154_v15 = vrot.slane %v4120_v63, 4 }
 0x300   : > { %v2110_v10 = vpack.c.bf16 %v2102_v6, %v2102_v6  ;;  %2117 = vst.msk [vmem:[#allocation5 + $0x2c] sm:$0xf] %vm1051_vm15, %v2108_v25  ;;  %v2211_v18 = vsel %vm823_vm14, %v2210_v43, %v4116_v0  ;;  %v2221_v36 = vperm.slane %v2213_v2, %v4613_v52  ;;  %v2157_v19 = vsel %vm823_vm14, %v4120_v63, %v2156_v20 }
 0x301   : > { %v2180_v28 = vrot.slane %v5108_v50, 4  ;;  %2115 = vst.msk [vmem:[#allocation5 + $0x24] sm:$0xf] %vm1051_vm15, %v2106_v38  ;;  %v2217_v11 = vperm.slane %v2211_v18, %v4613_v52  ;;  %v2155_v45 = vsel %vm823_vm14, %v2154_v15, %v4115_v5  ;;  %v2165_v17 = vperm.slane %v2157_v19, %v4613_v52 }
 0x302   : > { %v2168_v54 = vrot.slane %v5115_v31, 4  ;;  %2119 = vst.msk [vmem:[#allocation5 + $0x34] sm:$0xf] %vm1051_vm15, %v2110_v10  ;;  %v2234_v0 = vrot.slane %v2221_v36, 4  ;;  %v2237_v44 = vsel %vm823_vm14, %v2221_v36, %v2236_v35  ;;  %v2161_v56 = vperm.slane %v2155_v45, %v4613_v52 }
 0x303   : > { %2121 = vst.msk [vmem:[#allocation5 + $0x3c] sm:$0xf] %vm1051_vm15, %v2112_v3  ;;  %v2222_v29 = vrot.slane %v2217_v11, 4  ;;  %v2225_v7 = vsel %vm823_vm14, %v2217_v11, %v2224_v14  ;;  %v2245_v5 = vperm.slane %v2237_v44, %v4617_v59  ;;  %v2178_v39 = vrot.slane %v2165_v17, 4 }
 0x304   : > { %v2233_v53 = vperm.slane %v2225_v7, %v4617_v59  ;;  %v2235_v33 = vsel %vm823_vm14, %v2234_v0, %v5091_v26  ;;  %v2166_v24 = vrot.slane %v2161_v56, 4  ;;  %v2169_v35 = vsel %vm823_vm14, %v2161_v56, %v2168_v54 }
 0x305   : > { %v2223_v32 = vsel %vm823_vm14, %v2222_v29, %v5100_v30  ;;  %v2241_v51 = vperm.slane %v2235_v33, %v4617_v59  ;;  %v2252_v42 = vrot.slane %v2245_v5, 4  ;;  %v2177_v16 = vperm.slane %v2169_v35, %v4617_v59 }
 0x306   : > { %v2229_v14 = vperm.slane %v2223_v32, %v4617_v59  ;;  %v2248_v21 = vrot.slane %v2233_v53, 4  ;;  %v2167_v48 = vsel %vm823_vm14, %v2166_v24, %v5115_v31  ;;  %v2179_v26 = vsel %vm823_vm14, %v2178_v39, %v5108_v50 }
 0x307   : > { %v2250_v57 = vrot.slane %v2241_v51, 4  ;;  %v2253_v41 = vsel %vm823_vm14, 0.0, %v2252_v42  ;;  %v2319_v37 = vsel %vm823_vm14, %v2252_v42, %v2241_v51  ;;  %v2173_v30 = vperm.slane %v2167_v48, %v4617_v59 }
 0x308   : > { %v2246_v49 = vrot.slane %v2229_v14, 4  ;;  %v2249_v55 = vsel %vm823_vm14, 0.0, %v2248_v21  ;;  %v2308_v34 = vsel %vm823_vm14, %v2248_v21, %v2229_v14  ;;  %v2323_v60 = vperm.slane %v2319_v37, %v4613_v52 }
 0x309   : > { %v2251_v58 = vsel %vm823_vm14, 0.0, %v2250_v57  ;;  %v2312_v31 = vperm.slane %v2308_v34, %v4613_v52  ;;  %v2313_v62 = vrot.slane %v2249_v55, 4  ;;  %v2324_v50 = vrot.slane %v2253_v41, 4 }
 0x30a   : > { %v2247_v40 = vsel %vm823_vm14, 0.0, %v2246_v49  ;;  %v2344_v27 = vrot.slane %v2323_v60, 4  ;;  %v2181_v61 = vsel %vm823_vm14, %v2165_v17, %v2180_v28  ;;  %v2185_v23 = vperm.slane %v2179_v26, %v4617_v59 }
 0x30b   : > { %v2314_v63 = vsel %vm823_vm14, %v2313_v62, %v2247_v40  ;;  %v2325_v20 = vsel %vm823_vm14, %v2324_v50, %v2251_v58  ;;  %v2332_v1 = vrot.slane %v2312_v31, 4  ;;  %v2189_v46 = vperm.slane %v2181_v61, %v4617_v59 }
 0x30c   : > { %v2318_v47 = vperm.slane %v2314_v63, %v4613_v52  ;;  %v2329_v4 = vperm.slane %v2325_v20, %v4613_v52  ;;  %v2190_v25 = vrot.slane %v2173_v30, 4  ;;  %v2192_v3 = vrot.slane %v2177_v16, 4 }
 0x30d   : > { %v2194_v43 = vrot.slane %v2185_v23, 4  ;;  %v2196_v6 = vrot.slane %v2189_v46, 4 }
 0x30e   : > { %v2330_v38 = vrot.slane %v2318_v47, 4  ;;  %v2333_v2 = vsel %vm823_vm14, %v2318_v47, %v2332_v1  ;;  %v2342_v15 = vrot.slane %v2329_v4, 4  ;;  %v2345_v10 = vsel %vm823_vm14, %v2329_v4, %v2344_v27 }
 0x30f   : > { %v2341_v18 = vperm.slane %v2333_v2, %v4617_v59  ;;  %v2353_v36 = vperm.slane %v2345_v10, %v4617_v59  ;;  %v2191_v19 = vsel %vm823_vm14, 0.0, %v2190_v25  ;;  %v2193_v28 = vsel %vm823_vm14, 0.0, %v2192_v3 }
 0x310   : > { %v2331_v11 = vsel %vm823_vm14, %v2330_v38, %v2312_v31  ;;  %v2343_v45 = vsel %vm823_vm14, %v2342_v15, %v2323_v60  ;;  %v2195_v17 = vsel %vm823_vm14, 0.0, %v2194_v43  ;;  %v2197_v54 = vsel %vm823_vm14, 0.0, %v2196_v6 }
 0x311   : > { %v2337_v0 = vperm.slane %v2331_v11, %v4617_v59  ;;  %v2349_v44 = vperm.slane %v2343_v45, %v4617_v59  ;;  %v2358_v56 = vrot.slane %v2353_v36, 4  ;;  %v2360_v29 = vrot.slane %v2341_v18, 4 }
 0x312   : > { %v2254_v7 = vsel %vm823_vm14, %v2192_v3, %v2173_v30  ;;  %v2259_v5 = vrot.slane %v2193_v28, 4  ;;  %v2265_v39 = vsel %vm823_vm14, %v2196_v6, %v2185_v23  ;;  %v2270_v53 = vrot.slane %v2197_v54, 4 }
 0x313   : > { %v2354_v33 = vrot.slane %v2349_v44, 4  ;;  %v2356_v24 = vrot.slane %v2337_v0, 4  ;;  %v2359_v35 = vsel %vm823_vm14, %v2358_v56, %v2341_v18  ;;  %v2361_v32 = vsel %vm823_vm14, %v2353_v36, %v2360_v29 }
 0x314   : > { %v2367_v51 = vpack.c.bf16 %v2359_v35, %v2359_v35  ;;  %v2369_v42 = vpack.c.bf16 %v2361_v32, %v2361_v32  ;;  %v2258_v16 = vperm.slane %v2254_v7, %v4613_v52  ;;  %v2260_v14 = vsel %vm823_vm14, %v2259_v5, %v2191_v19 }
 0x315   : > { %v2355_v21 = vsel %vm823_vm14, %v2354_v33, %v2337_v0  ;;  %v2357_v48 = vsel %vm823_vm14, %v2349_v44, %v2356_v24  ;;  %v2264_v26 = vperm.slane %v2260_v14, %v4613_v52  ;;  %v2269_v57 = vperm.slane %v2265_v39, %v4613_v52 }
 0x316   : > { %v2363_v41 = vpack.c.bf16 %v2355_v21, %v2355_v21  ;;  %v2365_v37 = vpack.c.bf16 %v2357_v48, %v2357_v48  ;;  %2376 = vst.msk [vmem:[#allocation6 + $0x34] sm:$0xf] %vm1051_vm15, %v2367_v51  ;;  %v2271_v30 = vsel %vm823_vm14, %v2270_v53, %v2195_v17  ;;  %v2278_v49 = vrot.slane %v2258_v16, 4 }
 0x317   : > { %2378 = vst.msk [vmem:[#allocation6 + $0x3c] sm:$0xf] %vm1051_vm15, %v2369_v42  ;;  %v2275_v55 = vperm.slane %v2271_v30, %v4613_v52  ;;  %v2276_v34 = vrot.slane %v2264_v26, 4  ;;  %v2290_v60 = vrot.slane %v2269_v57, 4 }
 0x318   : > { %2372 = vst.msk [vmem:[#allocation6 + $0x24] sm:$0xf] %vm1051_vm15, %v2363_v41  ;;  %v2279_v58 = vsel %vm823_vm14, %v2264_v26, %v2278_v49 }
 0x319   : > { %2374 = vst.msk [vmem:[#allocation6 + $0x2c] sm:$0xf] %vm1051_vm15, %v2365_v37  ;;  %v2277_v31 = vsel %vm823_vm14, %v2276_v34, %v2258_v16  ;;  %v2287_v62 = vperm.slane %v2279_v58, %v4617_v59  ;;  %v2288_v50 = vrot.slane %v2275_v55, 4  ;;  %v2291_v40 = vsel %vm823_vm14, %v2275_v55, %v2290_v60 }
 0x31a   : > { %v2283_v27 = vperm.slane %v2277_v31, %v4617_v59  ;;  %v2299_v61 = vperm.slane %v2291_v40, %v4617_v59 }
 0x31b   : > { %v2289_v23 = vsel %vm823_vm14, %v2288_v50, %v2269_v57  ;;  %v2306_v63 = vrot.slane %v2287_v62, 4 }
 0x31c   : > { %v2295_v20 = vperm.slane %v2289_v23, %v4617_v59  ;;  %v2302_v1 = vrot.slane %v2283_v27, 4  ;;  %v2304_v46 = vrot.slane %v2299_v61, 4 }
 0x31d   : > { %v2307_v47 = vsel %vm823_vm14, %v2299_v61, %v2306_v63 }
 0x31e   : > { %v2300_v4 = vrot.slane %v2295_v20, 4  ;;  %v2303_v25 = vsel %vm823_vm14, %v2295_v20, %v2302_v1  ;;  %v2305_v3 = vsel %vm823_vm14, %v2304_v46, %v2287_v62  ;;  %v2368_v43 = vpack.c.bf16 %v2307_v47, %v2307_v47 }
 0x31f   : > { %v2364_v6 = vpack.c.bf16 %v2303_v25, %v2303_v25  ;;  %v2366_v38 = vpack.c.bf16 %v2305_v3, %v2305_v3 }
 0x320   : > { %v2301_v2 = vsel %vm823_vm14, %v2300_v4, %v2283_v27  ;;  %2377 = vst.msk [vmem:[#allocation6 + $0x38] sm:$0xf] %vm1051_vm15, %v2368_v43 }
 0x321   : > { %v2362_v15 = vpack.c.bf16 %v2301_v2, %v2301_v2  ;;  %2373 = vst.msk [vmem:[#allocation6 + $0x28] sm:$0xf] %vm1051_vm15, %v2364_v6 }
 0x322   : > { %2375 = vst.msk [vmem:[#allocation6 + $0x30] sm:$0xf] %vm1051_vm15, %v2366_v38 }
 0x323   : > { %2371 = vst.msk [vmem:[#allocation6 + $0x20] sm:$0xf] %vm1051_vm15, %v2362_v15 }
 0x324 LB: >> { %s5306_s25 = sshll.u32 %s4283_s24, 4  ;;  %vm2415_vm1 = vcmask 130048   ;;  %s3882_s16 = sshll.u32 %s4283_s24, 5  ;;  %s4283_s24 = sphi %s5300_s24, %s2384_s24  }
 0x325   : >> { %s2394_s15 = scalar_lea.vmem [#allocation5], %s5306_s25  ;;  %s2388_s20 = scalar_lea.vmem [#allocation4], %s5306_s25 }
 0x326   : >> { %v3877_v10 = vld [vmem:[%s2394_s15] sm:$0xff]  ;;  %v3878_v18 = vld [vmem:[%s2394_s15 + $0x8] sm:$0xff]  ;;  %s2400_s30 = scalar_lea.vmem [#allocation6], %s5306_s25  ;;  %s2571_s18 = scalar_lea.vmem [#allocation7], %s3882_s16 }
 0x327   : >> { %v2420_v36 = vsel %vm2415_vm1, %v3877_v10, 0  ;;  %v2450_v19 = vsel %vm2415_vm1, %v3878_v18, 0  ;;  %v3874_v28 = vld [vmem:[%s2388_s20] sm:$0xff]  ;;  %v3875_v11 = vld [vmem:[%s2388_s20 + $0x8] sm:$0xff]  ;;  %s2384_s24 = sadd.s32 1, %s4283_s24  }
 0x328   : >> { %2429 = vmatpush.bf16.xpose.msra.mxu0 %v2420_v36  ;;  %2459 = vmatpush.bf16.xpose.msra.mxu1 %v2450_v19  ;;  %p2381_p12 = scmp.ge.s32.totalorder %s2384_s24, 4  }
 0x329   : > { %s4292_s21 = smov (%p2381_p12), 16   ;;  %s4293_s28 = smov (%p2381_p12), 32   ;;  %vm2831_vm2 = vcmask (%p2381_p12), 261120   ;;  %vm2834_vm3 = vcmask (%p2381_p12), 392192   ;;  %vm2959_vm7 = vcmask (%p2381_p12), 519168  }
 0x32a   : >> { %v3880_v34 = vld [vmem:[%s2400_s30] sm:$0xff]  ;;  %v3881_v60 = vld [vmem:[%s2400_s30 + $0x8] sm:$0xff]  ;;  %s4294_s20 = smov (%p2381_p12), 48  }
 0x32b   : >> { %2535 = vmatpush.bf16.msra.mxu2 %v3880_v34  ;;  %2563 = vmatpush.bf16.msra.mxu3 %v3881_v60 }
 0x32f   : >> { %3746 = vmatmul.msk.bf16.vlgmr.msra.gmra.mxu0 %vm2415_vm1, %v3874_v28  ;;  %3755 = vmatmul.msk.bf16.vlgmr.msra.gmra.mxu1 %vm2415_vm1, %v3875_v11 }
 0x3ac   : >> { %v2431_v45 = vpop.f32.mrf.mxu0  ;;  %v2461_v17 = vpop.f32.mrf.mxu1 }
 0x3ad   : >> { %v2472_v54 = vsel %vm2415_vm1, %v2461_v17, -inf  ;;  %v2466_v0 = vsel %vm2415_vm1, %v2431_v45, -inf }
 0x3ae   : >> { %2473 = vmax.xlane.f32.xlu1 %v2472_v54  ;;  %2467 = vmax.xlane.f32.xlu0 %v2466_v0 }
 0x3b4   : >> { %v2433_v44 = vpop.f32.mrf.mxu0  ;;  %v2463_v56 = vpop.f32.mrf.mxu1 }
 0x3b5   : >> { %v2475_v29 = vsel %vm2415_vm1, %v2463_v56, -inf  ;;  %v2469_v7 = vsel %vm2415_vm1, %v2433_v44, -inf }
 0x3b6   : >> { %2476 = vmax.xlane.f32.xlu1 %v2475_v29  ;;  %2470 = vmax.xlane.f32.xlu0 %v2469_v7 }
 0x421   : >> { %v2474_v5 = vpop.xlane.xlu1 %2473  ;;  %v2468_v39 = vpop.xlane.xlu0 %2467 }
 0x422   : >> { %v2480_v53 = vsub.f32 %v2461_v17, %v2474_v5  ;;  %v2478_v33 = vsub.f32 %v2431_v45, %v2468_v39 }
 0x424   : >> { %v2486_v24 = vmul.f32 1.442695, %v2480_v53  ;;  %v2482_v35 = vmul.f32 1.442695, %v2478_v33 }
 0x426   : >> { %4134 = vpow2.f32 %v2486_v24 }
 0x427   : >> { %4136 = vpow2.f32 %v2482_v35 }
 0x429   : >> { %v2477_v32 = vpop.xlane.xlu1 %2476  ;;  %v2471_v51 = vpop.xlane.xlu0 %2470 }
 0x42a   : >> { %v2481_v42 = vsub.f32 %v2463_v56, %v2477_v32  ;;  %v2479_v16 = vsub.f32 %v2433_v44, %v2471_v51 }
 0x42c   : >> { %v4135_v14 = vpop.eup %4134  ;;  %v2488_v21 = vmul.f32 1.442695, %v2481_v42  ;;  %v2484_v48 = vmul.f32 1.442695, %v2479_v16 }
 0x42d   : >> { %v4137_v26 = vpop.eup %4136  ;;  %v2496_v57 = vsel %vm2415_vm1, %v4135_v14, 0.0 }
 0x42e   : >> { %4138 = vpow2.f32 %v2488_v21  ;;  %v2490_v41 = vsel %vm2415_vm1, %v4137_v26, 0.0  ;;  %2497 = vadd.xlane.f32.xlu0 %v2496_v57 }
 0x42f   : >> { %4140 = vpow2.f32 %v2484_v48  ;;  %2491 = vadd.xlane.f32.xlu2 %v2490_v41 }
 0x434   : >> { %v4139_v37 = vpop.eup %4138 }
 0x435   : >> { %v4141_v30 = vpop.eup %4140  ;;  %v2499_v49 = vsel %vm2415_vm1, %v4139_v37, 0.0 }
 0x436   : >> { %2500 = vadd.xlane.f32.xlu1 %v2499_v49  ;;  %v2493_v55 = vsel %vm2415_vm1, %v4141_v30, 0.0 }
 0x437   : >> { %2494 = vadd.xlane.f32.xlu2 %v2493_v55 }
 0x4a1   : >> { %v2498_v58 = vpop.xlane.xlu0 %2497 }
 0x4a2   : >> { %v2492_v31 = vpop.xlane.xlu2 %2491  ;;  %4142 = vrcp.f32 %v2498_v58 }
 0x4a3   : >> { %4144 = vrcp.f32 %v2492_v31 }
 0x4a8   : >> { %v4143_v50 = vpop.eup %4142 }
 0x4a9   : >> { %v2501_v62 = vpop.xlane.xlu1 %2500  ;;  %v4145_v27 = vpop.eup %4144  ;;  %v2508_v61 = vmul.f32 %v4143_v50, %v4135_v14 }
 0x4aa   : >> { %4146 = vrcp.f32 %v2501_v62  ;;  %v2495_v40 = vpop.xlane.xlu2 %2494  ;;  %v2506_v23 = vmul.f32 %v4145_v27, %v4137_v26 }
 0x4ab   : >> { %4148 = vrcp.f32 %v2495_v40  ;;  %v2512_v46 = vpack.c.bf16 %v2508_v61, %v2508_v61 }
 0x4ac   : >> { %v2510_v4 = vpack.c.bf16 %v2506_v23, %v2506_v23 }
 0x4ad   : >> { %v2544_v43 = vunpack.c.l.b16 %v2512_v46 }
 0x4ae   : >> { %v2516_v38 = vunpack.c.l.b16 %v2510_v4 }
 0x4b0   : >> { %v4147_v63 = vpop.eup %4146 }
 0x4b1   : >> { %v4149_v20 = vpop.eup %4148  ;;  %v2509_v1 = vmul.f32 %v4147_v63, %v4139_v37 }
 0x4b2   : >> { %v2507_v47 = vmul.f32 %v4149_v20, %v4141_v30 }
 0x4b3   : >> { %v2513_v25 = vpack.c.bf16 %v2509_v1, %v2509_v1 }
 0x4b4   : >> { %v2511_v3 = vpack.c.bf16 %v2507_v47, %v2507_v47 }
 0x4b5   : >> { %v2545_v6 = vunpack.c.l.b16 %v2513_v25 }
 0x4b6   : >> { %v2517_v2 = vunpack.c.l.b16 %v2511_v3 }
 0x4b7   : >> { %v2546_v15 = vpack.c.b16 %v2545_v6, %v2544_v43 }
 0x4b8   : >> { %v2518_v10 = vpack.c.b16 %v2517_v2, %v2516_v38 }
 0x4b9   : >> { %3765 = vmatmul.msk.bf16.vlgmr.msra.gmra.mxu3 %vm2415_vm1, %v2546_v15 }
 0x4ba   : >> { %3760 = vmatmul.msk.bf16.vlgmr.msra.gmra.mxu2 %vm2415_vm1, %v2518_v10 }
 0x53c   : >> { %v2565_v18 = vpop.f32.mrf.mxu3 }
 0x53d   : >> { %v2537_v36 = vpop.f32.mrf.mxu2  ;;  %2574 = vst.msk [vmem:[%s2571_s18 + $0x10] sm:$0xff] %vm2415_vm1, %v2565_v18 }
 0x53e   : >> { %2572 = vst.msk [vmem:[%s2571_s18] sm:$0xff] %vm2415_vm1, %v2537_v36 }
 0x542   : > { %2383 = sbr.rel (!%p2381_p12) target bundleno = 804 (0x324), region = 178 }
 0x544   : >> { %v2567_v19 = vpop.f32.mrf.mxu3 }
 0x545   : >> { %v2539_v28 = vpop.f32.mrf.mxu2  ;;  %2575 = vst.msk [vmem:[%s2571_s18 + $0x18] sm:$0xff] %vm2415_vm1, %v2567_v19 }
 0x546   : >> { %2573 = vst.msk [vmem:[%s2571_s18 + $0x8] sm:$0xff] %vm2415_vm1, %v2539_v28 }
 0x54d   : > { %v2576_v11 = vld [vmem:[#allocation7] sm:$0xff]  ;;  %v2577_v45 = vld [vmem:[#allocation7 + $0x8] sm:$0xff]  ;;  %v2578_v17 = vld [vmem:[#allocation7 + $0x10] sm:$0xff] }
 0x54e   : > { %v2579_v54 = vld [vmem:[#allocation7 + $0x18] sm:$0xff]  ;;  %v2580_v0 = vld [vmem:[#allocation7 + $0x20] sm:$0xff]  ;;  %v2581_v44 = vld [vmem:[#allocation7 + $0x28] sm:$0xff]  ;;  %v2586_v56 = vrot.slane %v2576_v11, 4  ;;  %v2598_v29 = vrot.slane %v2578_v17, 4  ;;  %v2642_v7 = vrot.slane %v2577_v45, 4 }
 0x54f   : > { %v2582_v5 = vld [vmem:[#allocation7 + $0x30] sm:$0xff]  ;;  %v2584_v39 = vrot.slane %v2580_v0, 4  ;;  %v2640_v53 = vrot.slane %v2581_v44, 4  ;;  %v2654_v33 = vrot.slane %v2579_v54, 4  ;;  %v2583_v24 = vld [vmem:[#allocation7 + $0x38] sm:$0xff] }
 0x550   : > { %v2587_v35 = vsel %vm823_vm14, %v2580_v0, %v2586_v56  ;;  %v2596_v32 = vrot.slane %v2582_v5, 4  ;;  %v2599_v51 = vsel %vm823_vm14, %v2582_v5, %v2598_v29  ;;  %v2643_v42 = vsel %vm823_vm14, %v2581_v44, %v2642_v7 }
 0x551   : > { %v2585_v16 = vsel %vm823_vm14, %v2584_v39, %v2576_v11  ;;  %v2595_v14 = vperm.slane %v2587_v35, %v4613_v52  ;;  %v2607_v21 = vperm.slane %v2599_v51, %v4613_v52  ;;  %v2641_v48 = vsel %vm823_vm14, %v2640_v53, %v2577_v45 }
 0x552   : > { %v2591_v26 = vperm.slane %v2585_v16, %v4613_v52  ;;  %v2597_v57 = vsel %vm823_vm14, %v2596_v32, %v2578_v17  ;;  %v2647_v41 = vperm.slane %v2641_v48, %v4613_v52  ;;  %v2651_v37 = vperm.slane %v2643_v42, %v4613_v52 }
 0x553   : > { %v2603_v30 = vperm.slane %v2597_v57, %v4613_v52  ;;  %v2620_v49 = vrot.slane %v2607_v21, 4  ;;  %v2622_v55 = vrot.slane %v2595_v14, 4  ;;  %v2652_v34 = vrot.slane %v2583_v24, 4 }
 0x554   : > { %v2610_v60 = vrot.slane %v2591_v26, 4  ;;  %v2655_v58 = vsel %vm823_vm14, %v2583_v24, %v2654_v33  ;;  %v2666_v31 = vrot.slane %v2647_v41, 4  ;;  %v2678_v62 = vrot.slane %v2651_v37, 4 }
 0x555   : > { %v2608_v50 = vrot.slane %v2603_v30, 4  ;;  %v2621_v40 = vsel %vm823_vm14, %v2620_v49, %v2595_v14  ;;  %v2623_v27 = vsel %vm823_vm14, %v2607_v21, %v2622_v55  ;;  %v2653_v61 = vsel %vm823_vm14, %v2652_v34, %v2579_v54 }
 0x556   : > { %v2611_v23 = vsel %vm823_vm14, %v2603_v30, %v2610_v60  ;;  %v2627_v63 = vperm.slane %v2621_v40, %v4617_v59  ;;  %v2631_v20 = vperm.slane %v2623_v27, %v4617_v59  ;;  %v2659_v1 = vperm.slane %v2653_v61, %v4613_v52  ;;  %v2967_v27 = vld [vmem:[#allocation7 + $0x60] sm:$0xff] }
 0x557   : > { %v2609_v46 = vsel %vm823_vm14, %v2608_v50, %v2591_v26  ;;  %v2619_v47 = vperm.slane %v2611_v23, %v4617_v59  ;;  %v2663_v4 = vperm.slane %v2655_v58, %v4613_v52 }
 0x558   : > { %v2615_v25 = vperm.slane %v2609_v46, %v4617_v59  ;;  %v2636_v3 = vrot.slane %v2627_v63, 4  ;;  %v2638_v43 = vrot.slane %v2631_v20, 4  ;;  %v2664_v6 = vrot.slane %v2659_v1, 4 }
 0x559   : > { %v2634_v38 = vrot.slane %v2619_v47, 4  ;;  %v2667_v2 = vsel %vm823_vm14, %v2659_v1, %v2666_v31  ;;  %v2676_v15 = vrot.slane %v2663_v4, 4  ;;  %v2679_v10 = vsel %vm823_vm14, %v2663_v4, %v2678_v62 }
 0x55a   : > { %v2632_v18 = vrot.slane %v2615_v25, 4  ;;  %v2637_v36 = vsel %vm823_vm14, 0.0, %v2636_v3  ;;  %v2639_v19 = vsel %vm823_vm14, 0.0, %v2638_v43  ;;  %v2665_v28 = vsel %vm823_vm14, %v2664_v6, %v2647_v41 }
 0x55b   : > { %v2635_v11 = vsel %vm823_vm14, 0.0, %v2634_v38  ;;  %v2671_v45 = vperm.slane %v2665_v28, %v4617_v59  ;;  %v2675_v17 = vperm.slane %v2667_v2, %v4617_v59  ;;  %v2677_v54 = vsel %vm823_vm14, %v2676_v15, %v2651_v37 }
 0x55c   : > { %v2633_v0 = vsel %vm823_vm14, 0.0, %v2632_v18  ;;  %v2683_v44 = vperm.slane %v2677_v54, %v4617_v59  ;;  %v2687_v56 = vperm.slane %v2679_v10, %v4617_v59  ;;  %v2696_v29 = vsel %vm823_vm14, %v2634_v38, %v2615_v25  ;;  %v2963_v18 = vld [vmem:[#allocation7 + $0x40] sm:$0xff] }
 0x55d   : > { %v2688_v7 = vrot.slane %v2671_v45, 4  ;;  %v2690_v5 = vrot.slane %v2675_v17, 4  ;;  %v2700_v39 = vperm.slane %v2696_v29, %v4613_v52  ;;  %v2701_v53 = vrot.slane %v2635_v11, 4 }
 0x55e   : > { %v2692_v33 = vrot.slane %v2683_v44, 4  ;;  %v2694_v24 = vrot.slane %v2687_v56, 4  ;;  %v2707_v35 = vsel %vm823_vm14, %v2638_v43, %v2627_v63  ;;  %v2712_v32 = vrot.slane %v2639_v19, 4 }
 0x55f   : > { %v2689_v51 = vsel %vm823_vm14, 0.0, %v2688_v7  ;;  %v2691_v42 = vsel %vm823_vm14, 0.0, %v2690_v5  ;;  %v2702_v16 = vsel %vm823_vm14, %v2701_v53, %v2633_v0  ;;  %v2711_v14 = vperm.slane %v2707_v35, %v4613_v52  ;;  %v2965_v0 = vld [vmem:[#allocation7 + $0x50] sm:$0xff] }
 0x560   : > { %v2693_v21 = vsel %vm823_vm14, 0.0, %v2692_v33  ;;  %v2695_v48 = vsel %vm823_vm14, 0.0, %v2694_v24  ;;  %v2706_v26 = vperm.slane %v2702_v16, %v4613_v52  ;;  %v2713_v57 = vsel %vm823_vm14, %v2712_v32, %v2637_v36 }
 0x561   : > { %v2717_v41 = vperm.slane %v2713_v57, %v4613_v52  ;;  %v2750_v37 = vsel %vm823_vm14, %v2690_v5, %v2671_v45  ;;  %v2755_v30 = vrot.slane %v2691_v42, 4  ;;  %v2761_v49 = vsel %vm823_vm14, %v2694_v24, %v2683_v44  ;;  %v2969_v44 = vld [vmem:[#allocation7 + $0x70] sm:$0xff]  ;;  %v2968_v24 = vld [vmem:[#allocation7 + $0x68] sm:$0xff] }
 0x562   : > { %v2718_v55 = vrot.slane %v2706_v26, 4  ;;  %v2754_v34 = vperm.slane %v2750_v37, %v4613_v52  ;;  %v2765_v60 = vperm.slane %v2761_v49, %v4613_v52  ;;  %v2766_v58 = vrot.slane %v2695_v48, 4  ;;  %v2964_v48 = vld [vmem:[#allocation7 + $0x48] sm:$0xff] }
 0x563   : > { %v2730_v31 = vrot.slane %v2717_v41, 4  ;;  %v2756_v62 = vsel %vm823_vm14, %v2755_v30, %v2689_v51  ;;  %v2720_v50 = vrot.slane %v2700_v39, 4  ;;  %v2732_v40 = vrot.slane %v2711_v14, 4 }
 0x564   : > { %v2719_v61 = vsel %vm823_vm14, %v2718_v55, %v2700_v39  ;;  %v2760_v23 = vperm.slane %v2756_v62, %v4613_v52  ;;  %v2767_v63 = vsel %vm823_vm14, %v2766_v58, %v2693_v21  ;;  %v2774_v20 = vrot.slane %v2754_v34, 4 }
 0x565   : > { %v5390_v1 = vperm.slane %v2719_v61, %v4617_v59  ;;  %v2731_v46 = vsel %vm823_vm14, %v2730_v31, %v2711_v14  ;;  %v2771_v47 = vperm.slane %v2767_v63, %v4613_v52  ;;  %v2721_v4 = vsel %vm823_vm14, %v2706_v26, %v2720_v50  ;;  %v2970_v26 = vld [vmem:[#allocation7 + $0x78] sm:$0xff] }
 0x566   : > { %v5396_v25 = vperm.slane %v2731_v46, %v4617_v59  ;;  %v2772_v3 = vrot.slane %v2760_v23, 4  ;;  %v2733_v43 = vsel %vm823_vm14, %v2717_v41, %v2732_v40  ;;  %v2971_v6 = vrot.slane %v2967_v27, 4  ;;  %v2966_v50 = vld [vmem:[#allocation7 + $0x58] sm:$0xff] }
 0x567   : > { %v2744_v38 = vrot.slane %v5390_v1, 4  ;;  %v2784_v2 = vrot.slane %v2771_v47, 4  ;;  %v5401_v15 = vperm.slane %v2733_v43, %v4617_v59  ;;  %v2775_v10 = vsel %vm823_vm14, %v2760_v23, %v2774_v20 }
 0x568   : > { %v2773_v36 = vsel %vm823_vm14, %v2772_v3, %v2754_v34  ;;  %v5406_v19 = vperm.slane %v2721_v4, %v4617_v59  ;;  %v2786_v28 = vrot.slane %v2765_v60, 4  ;;  %v5414_v54 = vperm.slane %v2775_v10, %v4617_v59 }
 0x569   : > { %v5409_v11 = vperm.slane %v2773_v36, %v4617_v59  ;;  %v2785_v45 = vsel %vm823_vm14, %v2784_v2, %v2765_v60  ;;  %v2746_v17 = vrot.slane %v5401_v15, 4  ;;  %v2972_v7 = vsel %vm823_vm14, %v2971_v6, %v2963_v18 }
 0x56a   : > { %v5417_v56 = vperm.slane %v2785_v45, %v4617_v59  ;;  %v2787_v29 = vsel %vm823_vm14, %v2771_v47, %v2786_v28  ;;  %v2973_v5 = vrot.slane %v2963_v18, 4  ;;  %v2745_v39 = vsel %vm823_vm14, %v5396_v25, %v2744_v38  ;;  %v3886_v18 = vld [vmem:[%s5690_s5 + $0x18] sm:$0xff] }
 0x56b   : > { %v2798_v53 = vrot.slane %v5409_v11, 4  ;;  %v5425_v33 = vperm.slane %v2787_v29, %v4617_v59  ;;  %v2978_v35 = vperm.slane %v2972_v7, %v4613_v52  ;;  %v2747_v32 = vsel %vm823_vm14, %v2746_v17, %v5406_v19  ;;  %2881 = vmatpush.bf16.msra.mxu0 %v3886_v18 }
 0x56c   : > { %v2974_v51 = vsel %vm823_vm14, %v2967_v27, %v2973_v5  ;;  %v2983_v42 = vrot.slane %v2969_v44, 4  ;;  %v2985_v16 = vrot.slane %v2965_v0, 4  ;;  %v3027_v55 = vrot.slane %v2968_v24, 4  ;;  %v3885_v5 = vld [vmem:[%s5690_s5 + $0x10] sm:$0xff] }
 0x56d   : > { %v2799_v14 = vsel %vm823_vm14, %v5417_v56, %v2798_v53  ;;  %v2800_v21 = vrot.slane %v5425_v33, 4  ;;  %v2982_v57 = vperm.slane %v2974_v51, %v4613_v52  ;;  %v2997_v41 = vrot.slane %v2978_v35, 4 }
 0x56e   : > { %v4150_v37 = vpack.i.bf16 %v2799_v14, %v2745_v39  ;;  %v2984_v30 = vsel %vm823_vm14, %v2983_v42, %v2965_v0  ;;  %v2986_v49 = vsel %vm823_vm14, %v2969_v44, %v2985_v16  ;;  %v3028_v40 = vsel %vm823_vm14, %v3027_v55, %v2964_v48 }
 0x56f   : > { %v2801_v34 = vsel %vm823_vm14, %v2800_v21, %v5414_v54  ;;  %v2990_v60 = vperm.slane %v2984_v30, %v4613_v52  ;;  %v2994_v58 = vperm.slane %v2986_v49, %v4613_v52  ;;  %v3009_v31 = vrot.slane %v2982_v57, 4  ;;  %2882 = vmatpush.bf16.msra.mxu0 %v3885_v5 }
 0x570   : > { %4151 = vrot.lane.b32.xlu0 %v4150_v37, %s4292_s21  ;;  %v4160_v62 = vpack.i.bf16 %v2801_v34, %v2747_v32  ;;  %v3029_v27 = vrot.slane %v2964_v48, 4  ;;  %v3039_v61 = vrot.slane %v2970_v26, 4  ;;  %v3034_v43 = vperm.slane %v3028_v40, %v4613_v52 }
 0x571   : > { %v2995_v23 = vrot.slane %v2990_v60, 4  ;;  %v2998_v63 = vsel %vm823_vm14, %v2990_v60, %v2997_v41  ;;  %v3007_v20 = vrot.slane %v2994_v58, 4  ;;  %v3010_v46 = vsel %vm823_vm14, %v2994_v58, %v3009_v31 }
 0x572   : > { %4161 = vrot.lane.b32.xlu1 %v4160_v62, %s4293_s28  ;;  %v3006_v47 = vperm.slane %v2998_v63, %v4617_v59  ;;  %v3018_v4 = vperm.slane %v3010_v46, %v4617_v59  ;;  %v3030_v3 = vsel %vm823_vm14, %v2968_v24, %v3029_v27  ;;  %v3040_v10 = vsel %vm823_vm14, %v3039_v61, %v2966_v50 }
 0x573   : > { %v2996_v6 = vsel %vm823_vm14, %v2995_v23, %v2978_v35  ;;  %v3008_v38 = vsel %vm823_vm14, %v3007_v20, %v2982_v57  ;;  %v3038_v2 = vperm.slane %v3030_v3, %v4613_v52  ;;  %v3041_v0 = vrot.slane %v2966_v50, 4 }
 0x574   : > { %v3002_v36 = vperm.slane %v2996_v6, %v4617_v59  ;;  %v3014_v28 = vperm.slane %v3008_v38, %v4617_v59  ;;  %v3021_v45 = vrot.slane %v3006_v47, 4  ;;  %v3025_v17 = vrot.slane %v3018_v4, 4 }
 0x575   : > { %v3046_v44 = vperm.slane %v3040_v10, %v4613_v52  ;;  %v3053_v29 = vrot.slane %v3034_v43, 4  ;;  %v3065_v7 = vrot.slane %v3038_v2, 4  ;;  %v3042_v32 = vsel %vm823_vm14, %v2970_v26, %v3041_v0 }
 0x576   : > { %v3019_v39 = vrot.slane %v3002_v36, 4  ;;  %v3022_v53 = vsel %vm823_vm14, 0.0, %v3021_v45  ;;  %v3023_v24 = vrot.slane %v3014_v28, 4  ;;  %v3026_v35 = vsel %vm823_vm14, 0.0, %v3025_v17 }
 0x577   : > { %v3051_v51 = vrot.slane %v3046_v44, 4  ;;  %v3054_v42 = vsel %vm823_vm14, %v3046_v44, %v3053_v29  ;;  %v3083_v16 = vsel %vm823_vm14, %v3021_v45, %v3002_v36  ;;  %v3050_v48 = vperm.slane %v3042_v32, %v4613_v52 }
 0x578   : > { %v3020_v14 = vsel %vm823_vm14, 0.0, %v3019_v39  ;;  %v3024_v21 = vsel %vm823_vm14, 0.0, %v3023_v24  ;;  %v3062_v57 = vperm.slane %v3054_v42, %v4617_v59  ;;  %v3087_v37 = vperm.slane %v3083_v16, %v4613_v52 }
 0x579   : > { %v3052_v41 = vsel %vm823_vm14, %v3051_v51, %v3034_v43  ;;  %v3088_v30 = vrot.slane %v3022_v53, 4  ;;  %v3094_v26 = vsel %vm823_vm14, %v3025_v17, %v3014_v28  ;;  %v3063_v55 = vrot.slane %v3050_v48, 4 }
 0x57a   : > { %v3058_v49 = vperm.slane %v3052_v41, %v4617_v59  ;;  %v3066_v34 = vsel %vm823_vm14, %v3050_v48, %v3065_v7  ;;  %v3077_v60 = vrot.slane %v3062_v57, 4  ;;  %v3098_v62 = vperm.slane %v3094_v26, %v4613_v52 }
 0x57b   : > { %v3074_v58 = vperm.slane %v3066_v34, %v4617_v59  ;;  %v3089_v31 = vsel %vm823_vm14, %v3088_v30, %v3020_v14  ;;  %v3099_v50 = vrot.slane %v3026_v35, 4  ;;  %v3064_v40 = vsel %vm823_vm14, %v3063_v55, %v3038_v2 }
 0x57c   : > { %v3075_v27 = vrot.slane %v3058_v49, 4  ;;  %v3078_v61 = vsel %vm823_vm14, 0.0, %v3077_v60  ;;  %v3093_v23 = vperm.slane %v3089_v31, %v4613_v52  ;;  %v3070_v63 = vperm.slane %v3064_v40, %v4617_v59 }
 0x57d   : > { %v3081_v20 = vrot.slane %v3074_v58, 4  ;;  %v3100_v46 = vsel %vm823_vm14, %v3099_v50, %v3024_v21  ;;  %v3137_v47 = vsel %vm823_vm14, %v3077_v60, %v3058_v49  ;;  %v3142_v10 = vrot.slane %v3078_v61, 4 }
 0x57e   : > { %v3076_v4 = vsel %vm823_vm14, 0.0, %v3075_v27  ;;  %v3104_v3 = vperm.slane %v3100_v46, %v4613_v52  ;;  %v3105_v43 = vrot.slane %v3093_v23, 4  ;;  %v3141_v6 = vperm.slane %v3137_v47, %v4613_v52 }
 0x57f   : > { %v3079_v38 = vrot.slane %v3070_v63, 4  ;;  %v3082_v2 = vsel %vm823_vm14, 0.0, %v3081_v20  ;;  %v3148_v18 = vsel %vm823_vm14, %v3081_v20, %v3070_v63  ;;  %v3143_v29 = vsel %vm823_vm14, %v3142_v10, %v3076_v4  ;;  %v3883_v10 = vld [vmem:[%s5690_s5] sm:$0xff] }
 0x580   : > { %v3106_v36 = vsel %vm823_vm14, %v3105_v43, %v3087_v37  ;;  %v3117_v28 = vrot.slane %v3104_v3, 4  ;;  %v3152_v45 = vperm.slane %v3148_v18, %v4613_v52  ;;  %v3153_v17 = vrot.slane %v3082_v2, 4  ;;  %v3889_v18 = vld [vmem:[%s5690_s5 + $0x10] sm:$0xff] }
 0x581   : > { %v3080_v0 = vsel %vm823_vm14, 0.0, %v3079_v38  ;;  %v5495_v44 = vperm.slane %v3106_v36, %v4617_v59  ;;  %v3107_v7 = vrot.slane %v3087_v37, 4  ;;  %v3147_v39 = vperm.slane %v3143_v29, %v4613_v52  ;;  %v3890_v38 = vld [vmem:[%s5690_s5 + $0x18] sm:$0xff] }
 0x582   : > { %v3118_v5 = vsel %vm823_vm14, %v3117_v28, %v3098_v62  ;;  %v3154_v53 = vsel %vm823_vm14, %v3153_v17, %v3080_v0  ;;  %v3119_v24 = vrot.slane %v3098_v62, 4  ;;  %v2796_v35 = vrot.slane %v5417_v56, 4  ;;  %3265 = vmatpush.bf16.msra.mxu1 %v3890_v38 }
 0x583   : > { %v5503_v32 = vperm.slane %v3118_v5, %v4617_v59  ;;  %v3158_v51 = vperm.slane %v3154_v53, %v4613_v52  ;;  %v3108_v42 = vsel %vm823_vm14, %v3093_v23, %v3107_v7  ;;  %v3131_v16 = vrot.slane %v5495_v44, 4  ;;  %v3887_v5 = vld [vmem:[%s5690_s5] sm:$0xff] }
 0x584   : > { %v3159_v14 = vrot.slane %v3147_v39, 4  ;;  %v3120_v21 = vsel %vm823_vm14, %v3104_v3, %v3119_v24  ;;  %v3161_v48 = vrot.slane %v3141_v6, 4  ;;  %v3116_v41 = vperm.slane %v3108_v42, %v4617_v59 }
 0x585   : > { %v3171_v57 = vrot.slane %v3158_v51, 4  ;;  %v3128_v37 = vperm.slane %v3120_v21, %v4617_v59  ;;  %v3173_v30 = vrot.slane %v3152_v45, 4  ;;  %v2748_v52 = vrot.slane %v5406_v19, 4 }
 0x586   : > { %v3160_v56 = vsel %vm823_vm14, %v3159_v14, %v3141_v6  ;;  %v3162_v26 = vsel %vm823_vm14, %v3147_v39, %v3161_v48  ;;  %v2802_v49 = vrot.slane %v5414_v54, 4  ;;  %v3132_v19 = vsel %vm823_vm14, %v5503_v32, %v3131_v16  ;;  %3266 = vmatpush.bf16.msra.mxu1 %v3889_v18 }
 0x587   : > { %v3166_v55 = vperm.slane %v3160_v56, %v4617_v59  ;;  %v3172_v34 = vsel %vm823_vm14, %v3171_v57, %v3152_v45  ;;  %v3133_v60 = vrot.slane %v3128_v37, 4  ;;  %v3170_v58 = vperm.slane %v3162_v26, %v4617_v59  ;;  %v3888_v45 = vld [vmem:[%s5690_s5 + $0x8] sm:$0xff] }
 0x588   : > { %v3178_v31 = vperm.slane %v3172_v34, %v4617_v59  ;;  %v3174_v62 = vsel %vm823_vm14, %v3158_v51, %v3173_v30  ;;  %v2749_v50 = vsel %vm823_vm14, %v5401_v15, %v2748_v52  ;;  %v2803_v40 = vsel %vm823_vm14, %v5425_v33, %v2802_v49 }
 0x589   : > { %v3185_v54 = vrot.slane %v3166_v55, 4  ;;  %v3182_v27 = vperm.slane %v3174_v62, %v4617_v59  ;;  %v4170_v61 = vpack.i.bf16 %v2803_v40, %v2749_v50  ;;  %v3135_v23 = vrot.slane %v3116_v41, 4 }
 0x58a   : > { %v3189_v63 = vrot.slane %v3170_v58, 4  ;;  %v2797_v20 = vsel %vm823_vm14, %v2796_v35, %v5409_v11  ;;  %v3134_v47 = vsel %vm823_vm14, %v3133_v60, %v3116_v41  ;;  %v3884_v11 = vld [vmem:[%s5690_s5 + $0x8] sm:$0xff]  ;;  %v3183_v2 = vrot.slane %v3178_v31, 4  ;;  %3267 = vmatpush.bf16.msra.mxu1 %v3888_v45 }
 0x58b   : > { %v3186_v46 = vsel %vm823_vm14, %v3178_v31, %v3185_v54  ;;  %v3187_v15 = vrot.slane %v3182_v27, 4  ;;  %4171 = vrot.lane.b32.xlu2 %v4170_v61, %s4294_s20  ;;  %v3136_v4 = vsel %vm823_vm14, %v3128_v37, %v3135_v23  ;;  %2883 = vmatpush.bf16.msra.mxu0 %v3884_v11  ;;  %v2742_v28 = vrot.slane %v5396_v25, 4  ;;  %v4180_v54 = vld [vmem:[%s5691_s6] ss:$0 sm:$0xff] }
 0x58c   : > { %v4155_v33 = vpack.i.bf16 %v3186_v46, %v3132_v19  ;;  %v3190_v3 = vsel %vm823_vm14, %v3182_v27, %v3189_v63  ;;  %v3184_v36 = vsel %vm823_vm14, %v3183_v2, %v3166_v55  ;;  %v3129_v41 = vrot.slane %v5503_v32, 4  ;;  %v4181_v23 = vld [vmem:[%s5697_s12] ss:$0 sm:$0xff] }
 0x58d   : > { %v3188_v59 = vsel %vm823_vm14, %v3187_v15, %v3170_v58  ;;  %v4175_v6 = vpack.i.bf16 %v3190_v3, %v3136_v4  ;;  %v2743_v0 = vsel %vm823_vm14, %v2742_v28, %v5390_v1 }
 0x58e   : > { %4156 = vrot.lane.b32.xlu0 %v4155_v33, %s4292_s21  ;;  %v4165_v43 = vpack.i.bf16 %v3188_v59, %v3134_v47  ;;  %3268 = vmatpush.bf16.msra.mxu1 %v3887_v5  ;;  %v3130_v30 = vsel %vm823_vm14, %v3129_v41, %v5495_v44 }
 0x58f   : > { %2884 = vmatpush.bf16.msra.mxu0 %v3883_v10 }
 0x590   : > { %4166 = vrot.lane.b32.xlu1 %v4165_v43, %s4293_s28 }
 0x593   : > { %4176 = vrot.lane.b32.xlu2 %v4175_v6, %s4294_s20  ;;  %v4183_v6 = vld [vmem:[%s5697_s12] ss:$0 sm:$0xff] }
 0x5e2   : > { %v4152_v17 = vpop.permute.xlu0 %4151 }
 0x5e3   : > { %v4154_v29 = vunpack.i.h.bf16 %v4152_v17  ;;  %v4153_v7 = vunpack.i.l.bf16 %v4152_v17 }
 0x5e4   : > { %v4162_v39 = vpop.permute.xlu1 %4161 }
 0x5e5   : > { %v2830_v25 = vsel %vm2415_vm1, %v2797_v20, %v4154_v29  ;;  %v2829_v53 = vsel %vm2415_vm1, %v2743_v0, %v4153_v7  ;;  %v4164_v24 = vunpack.i.h.bf16 %v4162_v39  ;;  %v4163_v35 = vunpack.i.l.bf16 %v4162_v39  ;;  %v4172_v51 = vpop.permute.xlu2 %4171 }
 0x5e6   : > { %v4174_v42 = vunpack.i.h.bf16 %v4172_v51  ;;  %v4173_v16 = vunpack.i.l.bf16 %v4172_v51 }
 0x5e7   : > { %v2832_v1 = vsel %vm2831_vm2, %v2829_v53, %v4163_v35  ;;  %v2833_v14 = vsel %vm2831_vm2, %v2830_v25, %v4164_v24 }
 0x5e8   : > { %v2835_v21 = vsel %vm2834_vm3, %v2832_v1, %v4173_v16  ;;  %v2836_v48 = vsel %vm2834_vm3, %v2833_v14, %v4174_v42 }
 0x5e9   : > { %v2837_v57 = vpack.c.bf16 %v2836_v48, %v2835_v21 }
 0x5eb   : > { %3783 = vmatmul.msk.bf16.vlgmr.msra.gmra.mxu0 %vm588_vm0, %v2837_v57 }
 0x5ed   : > { %v4177_v37 = vpop.permute.xlu2 %4176 }
 0x5ee   : > { %v4179_v55 = vunpack.i.h.bf16 %v4177_v37  ;;  %v4178_v34 = vunpack.i.l.bf16 %v4177_v37 }
 0x600   : > { %v4157_v56 = vpop.permute.xlu0 %4156 }
 0x601   : > { %v4159_v26 = vunpack.i.h.bf16 %v4157_v56  ;;  %v4158_v52 = vunpack.i.l.bf16 %v4157_v56 }
 0x602   : > { %v4167_v49 = vpop.permute.xlu1 %4166 }
 0x603   : > { %v3216_v60 = vsel %vm2415_vm1, %v3184_v36, %v4159_v26  ;;  %v3215_v58 = vsel %vm2415_vm1, %v3130_v30, %v4158_v52  ;;  %v4169_v31 = vunpack.i.h.bf16 %v4167_v49  ;;  %v4168_v62 = vunpack.i.l.bf16 %v4167_v49 }
 0x605   : > { %v3217_v50 = vsel %vm2831_vm2, %v3215_v58, %v4168_v62  ;;  %v3218_v32 = vsel %vm2831_vm2, %v3216_v60, %v4169_v31 }
 0x606   : > { %v3219_v40 = vsel %vm2834_vm3, %v3217_v50, %v4178_v34  ;;  %v3220_v44 = vsel %vm2834_vm3, %v3218_v32, %v4179_v55  ;;  %v4184_v50 = vld [vmem:[%s5692_s7] ss:$0 sm:$0xff] }
 0x607   : > { %v3221_v19 = vpack.c.bf16 %v3220_v44, %v3219_v40  ;;  %v4185_v44 = vld [vmem:[%s5693_s8] ss:$0 sm:$0xff] }
 0x609   : > { %3800 = vmatmul.msk.bf16.vlgmr.msra.gmra.mxu1 %vm588_vm0, %v3221_v19 }
 0x668   : > { %v2886_v27 = vpop.f32.mrf.mxu0 }
 0x669   : > { %v2887_v61 = vadd.f32 %v4180_v54, %v2886_v27 }
 0x66b   : > { %v2891_v63 = vadd.f32 %v2887_v61, %v4440_v9  ;;  %v4182_v9 = vld [vmem:[%s5691_s6] ss:$0 sm:$0xff] }
 0x66d   : > { %v2897_v20 = vadd.f32 %v4181_v23, %v2891_v63  ;;  %v2903_v46 = vsel %vm588_vm0, %v2891_v63, 0.0 }
 0x66e   : > { %2904 = vadd.xlane.f32.xlu0 %v2903_v46 }
 0x66f   : > { %2899 = vst.msk [vmem:[#allocation2] sm:$0xff] %vm588_vm0, %v2897_v20 }
 0x670   : > { %v2888_v47 = vpop.f32.mrf.mxu0 }
 0x671   : > { %v2889_v15 = vadd.f32 %v4180_v54, %v2888_v47 }
 0x673   : > { %v2892_v33 = vadd.f32 %v2889_v15, %v4454_v13 }
 0x675   : > { %v2898_v4 = vadd.f32 %v4181_v23, %v2892_v33  ;;  %v2906_v3 = vsel %vm588_vm0, %v2892_v33, 0.0 }
 0x676   : > { %2907 = vadd.xlane.f32.xlu1 %v2906_v3 }
 0x677   : > { %2900 = vst.msk [vmem:[#allocation2 + $0x8] sm:$0xff] %vm588_vm0, %v2898_v4 }
 0x686   : > { %v3270_v59 = vpop.f32.mrf.mxu1 }
 0x687   : > { %v3271_v43 = vadd.f32 %v4182_v9, %v3270_v59 }
 0x689   : > { %v3275_v11 = vadd.f32 %v3271_v43, %v4435_v8 }
 0x68b   : > { %v3281_v38 = vadd.f32 %v4183_v6, %v3275_v11  ;;  %v3287_v13 = vsel %vm588_vm0, %v3275_v11, 0.0 }
 0x68c   : > { %3288 = vadd.xlane.f32.xlu2 %v3287_v13 }
 0x68d   : > { %3283 = vst.msk [vmem:[#allocation2 + $0x10] sm:$0xff] %vm588_vm0, %v3281_v38 }
 0x68e   : > { %v3272_v2 = vpop.f32.mrf.mxu1 }
 0x68f   : > { %v3273_v10 = vadd.f32 %v4182_v9, %v3272_v2 }
 0x691   : > { %v3276_v18 = vadd.f32 %v3273_v10, %v4449_v12 }
 0x693   : > { %v3282_v36 = vadd.f32 %v4183_v6, %v3276_v18  ;;  %v3290_v28 = vsel %vm588_vm0, %v3276_v18, 0.0 }
 0x694   : > { %3291 = vadd.xlane.f32.xlu2 %v3290_v28 }
 0x695   : > { %3284 = vst.msk [vmem:[#allocation2 + $0x18] sm:$0xff] %vm588_vm0, %v3282_v36 }
 0x6e1   : > { %v2905_v45 = vpop.xlane.xlu0 %2904 }
 0x6e2   : > { %v2909_v17 = vmul.f32 %v2905_v45, %v4460_v22 }
 0x6e4   : > { %v2911_v8 = vsub.f32 %v2891_v63, %v2909_v17  ;;  %v4186_v17 = vld [vmem:[%s5692_s7] ss:$0 sm:$0xff] }
 0x6e6   : > { %v2913_v0 = vmul.f32 %v2911_v8, %v2911_v8 }
 0x6e8   : > { %v2915_v29 = vsel %vm588_vm0, %v2913_v0, 0.0 }
 0x6e9   : > { %v2908_v7 = vpop.xlane.xlu1 %2907  ;;  %2916 = vadd.xlane.f32.xlu0 %v2915_v29 }
 0x6ea   : > { %v2910_v5 = vmul.f32 %v2908_v7, %v4460_v22 }
 0x6ec   : > { %v2912_v39 = vsub.f32 %v2892_v33, %v2910_v5 }
 0x6ee   : > { %v2914_v25 = vmul.f32 %v2912_v39, %v2912_v39 }
 0x6f0   : > { %v2918_v12 = vsel %vm588_vm0, %v2914_v25, 0.0 }
 0x6f1   : > { %2919 = vadd.xlane.f32.xlu1 %v2918_v12 }
 0x6ff   : > { %v3289_v53 = vpop.xlane.xlu2 %3288 }
 0x700   : > { %v3293_v24 = vmul.f32 %v3289_v53, %v4460_v22 }
 0x702   : > { %v5604_v35 = vsub.f32 %v3275_v11, %v3293_v24 }
 0x704   : > { %v3297_v51 = vmul.f32 %v5604_v35, %v5604_v35 }
 0x706   : > { %v3299_v42 = vsel %vm588_vm0, %v3297_v51, 0.0 }
 0x707   : > { %3300 = vadd.xlane.f32.xlu2 %v3299_v42  ;;  %v3292_v16 = vpop.xlane.xlu2 %3291 }
 0x708   : > { %v3294_v1 = vmul.f32 %v3292_v16, %v4460_v22 }
 0x70a   : > { %v5610_v14 = vsub.f32 %v3276_v18, %v3294_v1 }
 0x70c   : > { %v3298_v21 = vmul.f32 %v5610_v14, %v5610_v14 }
 0x70e   : > { %v3302_v48 = vsel %vm588_vm0, %v3298_v21, 0.0 }
 0x70f   : > { %3303 = vadd.xlane.f32.xlu0 %v3302_v48 }
 0x75c   : > { %v2917_v57 = vpop.xlane.xlu0 %2916 }
 0x75d   : > { %v2921_v41 = vmul.f32 %v2917_v57, %v4460_v22 }
 0x75f   : > { %v2923_v37 = vadd.f32 1e-06, %v2921_v41 }
 0x761   : > { %4188 = vrsqrt.f32 %v2923_v37  ;;  %vm2931_vm0 = vweird.f32 %v2923_v37 }
 0x764   : > { %v2920_v30 = vpop.xlane.xlu1 %2919 }
 0x765   : > { %v2922_v56 = vmul.f32 %v2920_v30, %v4460_v22 }
 0x767   : > { %v4189_v26 = vpop.eup %4188  ;;  %v2924_v52 = vadd.f32 1e-06, %v2922_v56 }
 0x768   : > { %v2926_v49 = vmul.f32 %v4189_v26, %v2923_v37  ;;  %vm2932_vm4 = vweird.f32 %v4189_v26 }
 0x769   : > { %4190 = vrsqrt.f32 %v2924_v52  ;;  %vm2933_vm5 = vmor %vm2931_vm0, %vm2932_vm4  ;;  %vm2941_vm8 = vweird.f32 %v2924_v52 }
 0x76a   : > { %v2927_v55 = vmul.f32 %v4189_v26, %v2926_v49 }
 0x76c   : > { %v2928_v34 = vmul.f32 0.5, %v2927_v55 }
 0x76e   : > { %v2929_v60 = vsub.f32 1.5, %v2928_v34 }
 0x76f   : > { %v4191_v58 = vpop.eup %4190 }
 0x770   : > { %v2930_v31 = vmul.f32 %v4189_v26, %v2929_v60  ;;  %v2936_v62 = vmul.f32 %v4191_v58, %v2924_v52  ;;  %vm2942_vm6 = vweird.f32 %v4191_v58 }
 0x771   : > { %vm2943_vm9 = vmor %vm2941_vm8, %vm2942_vm6 }
 0x772   : > { %v2934_v32 = vsel %vm2933_vm5, %v4189_v26, %v2930_v31  ;;  %v2937_v40 = vmul.f32 %v4191_v58, %v2936_v62 }
 0x773   : > { %v2945_v19 = vmul.f32 %v2934_v32, %v2911_v8 }
 0x774   : > { %v2938_v54 = vmul.f32 0.5, %v2937_v40 }
 0x775   : > { %v2950_v27 = vmul.f32 %v4184_v50, %v2945_v19 }
 0x776   : > { %v2939_v61 = vsub.f32 1.5, %v2938_v54 }
 0x777   : > { %v2955_v23 = vadd.f32 %v4185_v44, %v2950_v27 }
 0x778   : > { %v2940_v63 = vmul.f32 %v4191_v58, %v2939_v61 }
 0x779   : > { %v2957_v20 = vpack.c.bf16 %v2955_v23, %v2955_v23 }
 0x77a   : > { %v3301_v46 = vpop.xlane.xlu2 %3300  ;;  %v2944_v47 = vsel %vm2943_vm9, %v4191_v58, %v2940_v63 }
 0x77b   : > { %2960 = vst.msk [vmem:[#allocation3] sm:$0xf] %vm2959_vm7, %v2957_v20  ;;  %v3305_v15 = vmul.f32 %v3301_v46, %v4460_v22  ;;  %v2946_v33 = vmul.f32 %v2944_v47, %v2912_v39 }
 0x77d   : > { %v3307_v4 = vadd.f32 1e-06, %v3305_v15  ;;  %v2951_v3 = vmul.f32 %v4184_v50, %v2946_v33 }
 0x77f   : > { %4192 = vrsqrt.f32 %v3307_v4  ;;  %v2956_v9 = vadd.f32 %v4185_v44, %v2951_v3  ;;  %vm3315_vm11 = vweird.f32 %v3307_v4 }
 0x781   : > { %v2958_v59 = vpack.c.bf16 %v2956_v9, %v2956_v9 }
 0x782   : > { %v3304_v43 = vpop.xlane.xlu0 %3303 }
 0x783   : > { %2961 = vst.msk [vmem:[#allocation3 + $0x4] sm:$0xf] %vm2959_vm7, %v2958_v59  ;;  %v3306_v6 = vmul.f32 %v3304_v43, %v4460_v22  ;;  %v4187_v22 = vld [vmem:[%s5693_s8] ss:$0 sm:$0xff] }
 0x785   : > { %v4193_v11 = vpop.eup %4192  ;;  %v3308_v38 = vadd.f32 1e-06, %v3306_v6 }
 0x786   : > { %v3310_v13 = vmul.f32 %v4193_v11, %v3307_v4  ;;  %vm3316_vm10 = vweird.f32 %v4193_v11 }
 0x787   : > { %4194 = vrsqrt.f32 %v3308_v38  ;;  %vm3317_vm12 = vmor %vm3315_vm11, %vm3316_vm10  ;;  %vm3325_vm14 = vweird.f32 %v3308_v38 }
 0x788   : > { %v3311_v2 = vmul.f32 %v4193_v11, %v3310_v13 }
 0x78a   : > { %v3312_v10 = vmul.f32 0.5, %v3311_v2 }
 0x78c   : > { %v3313_v18 = vsub.f32 1.5, %v3312_v10 }
 0x78d   : > { %v4195_v36 = vpop.eup %4194 }
 0x78e   : > { %v3314_v28 = vmul.f32 %v4193_v11, %v3313_v18  ;;  %v3320_v45 = vmul.f32 %v4195_v36, %v3308_v38  ;;  %vm3326_vm13 = vweird.f32 %v4195_v36 }
 0x78f   : > { %vm3327_vm15 = vmor %vm3325_vm14, %vm3326_vm13 }
 0x790   : > { %v3318_v8 = vsel %vm3317_vm12, %v4193_v11, %v3314_v28  ;;  %v3321_v0 = vmul.f32 %v4195_v36, %v3320_v45 }
 0x791   : > { %v3329_v29 = vmul.f32 %v3318_v8, %v5604_v35 }
 0x792   : > { %v3322_v7 = vmul.f32 0.5, %v3321_v0 }
 0x793   : > { %v3334_v5 = vmul.f32 %v4186_v17, %v3329_v29 }
 0x794   : > { %v3323_v39 = vsub.f32 1.5, %v3322_v7 }
 0x795   : > { %v3339_v25 = vadd.f32 %v4187_v22, %v3334_v5 }
 0x796   : > { %v3324_v12 = vmul.f32 %v4195_v36, %v3323_v39 }
 0x797   : > { %v3341_v53 = vpack.c.bf16 %v3339_v25, %v3339_v25 }
 0x798   : > { %v3328_v24 = vsel %vm3327_vm15, %v4195_v36, %v3324_v12 }
 0x799   : > { %3343 = vst.msk [vmem:[#allocation3 + $0x8] sm:$0xf] %vm2959_vm7, %v3341_v53  ;;  %v3330_v51 = vmul.f32 %v3328_v24, %v5610_v14 }
 0x79b   : > { %v3335_v42 = vmul.f32 %v4186_v17, %v3330_v51 }
 0x79d   : > { %v3340_v16 = vadd.f32 %v4187_v22, %v3335_v42 }
 0x79f   : > { %v3342_v1 = vpack.c.bf16 %v3340_v16, %v3340_v16 }
 0x7a1   : > { %3344 = vst.msk [vmem:[#allocation3 + $0xc] sm:$0xf] %vm2959_vm7, %v3342_v1 }
 0x7a2 PF: > { %v3896_v35 = vld [vmem:[%s4429_s14 + $0x18] sm:$0xff]  ;;  %v3895_v21 = vld [vmem:[%s4429_s14 + $0x10] sm:$0xff]  ;;  %v3894_v48 = vld [vmem:[%s4429_s14 + $0x8] sm:$0xff]  ;;  %vm3395_vm1 = vcmask 523264   ;;  %p3859_p13 = scmp.ne.s32.totalorder %s4271_s27, 2 }
 0x7a3   : > { %3406 = vmatpush.bf16.msra.mxu0 %v3896_v35  ;;  %3913 = vmatpush.bf16.msra.mxu3 %v3896_v35  ;;  %v3893_v14 = vld [vmem:[%s4429_s14] sm:$0xff]  ;;  %v3891_v57 = vld [vmem:[#allocation3] sm:$0xff]  ;;  %v3904_v37 = vld [vmem:[%s4427_s9 + $0x38] sm:$0xff] }
 0x7a4   : > { %3527 = vmatpush.bf16.msra.mxu1 %v3904_v37  ;;  %3917 = vmatpush.bf16.msra.mxu2 %v3904_v37  ;;  %v3903_v30 = vld [vmem:[%s4427_s9 + $0x30] sm:$0xff]  ;;  %v3902_v56 = vld [vmem:[%s4427_s9 + $0x28] sm:$0xff]  ;;  %v3901_v26 = vld [vmem:[%s4427_s9 + $0x20] sm:$0xff] }
 0x7a5   : > { %v3900_v52 = vld [vmem:[%s4427_s9 + $0x18] sm:$0xff]  ;;  %v3899_v49 = vld [vmem:[%s4427_s9 + $0x10] sm:$0xff]  ;;  %v3898_v55 = vld [vmem:[%s4427_s9 + $0x8] sm:$0xff] }
 0x7a6   : > { %v3897_v34 = vld [vmem:[%s4427_s9] sm:$0xff]  ;;  %v3458_v35 = vld [vmem:[#allocation2 + $0x8] sm:$0xff]  ;;  %v3460_v37 = vld [vmem:[#allocation2 + $0x18] sm:$0xff] }
 0x7a7   : > { %3407 = vmatpush.bf16.msra.mxu0 %v3895_v21  ;;  %3914 = vmatpush.bf16.msra.mxu3 %v3895_v21  ;;  %v4196_v60 = vld [vmem:[%s569_s22] ss:$0 sm:$0xff] }
 0x7a8   : > { %v3892_v41 = vld [vmem:[#allocation3 + $0x8] sm:$0xff]  ;;  %3528 = vmatpush.bf16.msra.mxu1 %v3903_v30  ;;  %3918 = vmatpush.bf16.msra.mxu2 %v3903_v30  ;;  %v3457_v42 = vld [vmem:[#allocation2] sm:$0xff] }
 0x7ab   : > { %3408 = vmatpush.bf16.msra.mxu0 %v3894_v48  ;;  %3915 = vmatpush.bf16.msra.mxu3 %v3894_v48 }
 0x7ac   : > { %3529 = vmatpush.bf16.msra.mxu1 %v3902_v56  ;;  %3919 = vmatpush.bf16.msra.mxu2 %v3902_v56 }
 0x7af   : > { %3409 = vmatpush.bf16.msra.mxu0 %v3893_v14  ;;  %3916 = vmatpush.bf16.msra.mxu3 %v3893_v14  ;;  %v3459_v14 = vld [vmem:[#allocation2 + $0x10] sm:$0xff] }
 0x7b0   : > { %3530 = vmatpush.bf16.msra.mxu1 %v3901_v26  ;;  %3920 = vmatpush.bf16.msra.mxu2 %v3901_v26 }
 0x7b2   : > { %3825 = vmatmul.msk.bf16.vlgmr.msra.gmra.mxu0 %vm3395_vm1, %v3891_v57  ;;  %3826 = vmatmul.msk.bf16.vlgmr.msra.gmra.mxu3 %vm3395_vm1, %v3892_v41 }
 0x7b4   : > { %3531 = vmatpush.bf16.msra.mxu1 %v3900_v52  ;;  %3921 = vmatpush.bf16.msra.mxu2 %v3900_v52 }
 0x7b8   : > { %3532 = vmatpush.bf16.msra.mxu1 %v3899_v49  ;;  %3922 = vmatpush.bf16.msra.mxu2 %v3899_v49 }
 0x7bc   : > { %3533 = vmatpush.bf16.msra.mxu1 %v3898_v55  ;;  %3923 = vmatpush.bf16.msra.mxu2 %v3898_v55 }
 0x7c0   : > { %3534 = vmatpush.bf16.msra.mxu1 %v3897_v34  ;;  %3924 = vmatpush.bf16.msra.mxu2 %v3897_v34 }
 0x82f   : > { %v3411_v58 = vpop.f32.mrf.mxu0 }
 0x830   : > { %v3412_v31 = vadd.f32 %v4196_v60, %v3411_v58 }
 0x832   : > { %v3425_v62 = vmul.f32 %v3412_v31, %v3412_v31  ;;  %v3421_v28 = vmul.f32 0.5, %v3412_v31 }
 0x834   : > { %v3429_v50 = vmul.f32 %v3425_v62, %v3412_v31 }
 0x835   : > { %v3416_v32 = vpop.f32.mrf.mxu3 }
 0x836   : > { %v3433_v40 = vmul.f32 0.044715, %v3429_v50  ;;  %v3417_v44 = vadd.f32 %v4196_v60, %v3416_v32 }
 0x837   : > { %v3413_v19 = vpop.f32.mrf.mxu0 }
 0x838   : > { %v3427_v54 = vmul.f32 %v3417_v44, %v3417_v44  ;;  %v3414_v27 = vadd.f32 %v4196_v60, %v3413_v19  ;;  %v3437_v61 = vadd.f32 %v3433_v40, %v3412_v31  ;;  %v3423_v39 = vmul.f32 0.5, %v3417_v44 }
 0x83a   : > { %v3431_v23 = vmul.f32 %v3427_v54, %v3417_v44  ;;  %v3426_v63 = vmul.f32 %v3414_v27, %v3414_v27  ;;  %v3441_v47 = vmul.f32 0.7978846, %v3437_v61  ;;  %v3422_v45 = vmul.f32 0.5, %v3414_v27 }
 0x83c   : > { %v3435_v20 = vmul.f32 0.044715, %v3431_v23  ;;  %v3430_v46 = vmul.f32 %v3426_v63, %v3414_v27  ;;  %4197 = vtanh.f32 %v3441_v47 }
 0x83d   : > { %v3418_v15 = vpop.f32.mrf.mxu3 }
 0x83e   : > { %v3434_v33 = vmul.f32 0.044715, %v3430_v46  ;;  %v3419_v4 = vadd.f32 %v4196_v60, %v3418_v15  ;;  %v3439_v3 = vadd.f32 %v3435_v20, %v3417_v44 }
 0x840   : > { %v3428_v9 = vmul.f32 %v3419_v4, %v3419_v4  ;;  %v3438_v59 = vadd.f32 %v3434_v33, %v3414_v27  ;;  %v3443_v11 = vmul.f32 0.7978846, %v3439_v3  ;;  %v3424_v25 = vmul.f32 0.5, %v3419_v4 }
 0x842   : > { %v3432_v43 = vmul.f32 %v3428_v9, %v3419_v4  ;;  %v3442_v6 = vmul.f32 0.7978846, %v3438_v59  ;;  %v4198_v13 = vpop.eup %4197 }
 0x843   : > { %v3449_v18 = vadd.f32 1.0, %v4198_v13 }
 0x844   : > { %v3436_v38 = vmul.f32 0.044715, %v3432_v43  ;;  %4199 = vtanh.f32 %v3442_v6 }
 0x845   : > { %4201 = vtanh.f32 %v3443_v11  ;;  %v3453_v0 = vmul.f32 %v3449_v18, %v3421_v28 }
 0x846   : > { %v3440_v2 = vadd.f32 %v3436_v38, %v3419_v4 }
 0x848   : > { %v3444_v10 = vmul.f32 0.7978846, %v3440_v2 }
 0x84a   : > { %v4200_v36 = vpop.eup %4199  ;;  %4203 = vtanh.f32 %v3444_v10 }
 0x84b   : > { %v3450_v17 = vadd.f32 1.0, %v4200_v36  ;;  %v4202_v8 = vpop.eup %4201 }
 0x84c   : > { %v3451_v7 = vadd.f32 1.0, %v4202_v8 }
 0x84d   : > { %v3454_v22 = vmul.f32 %v3450_v17, %v3422_v45 }
 0x84e   : > { %v3455_v53 = vmul.f32 %v3451_v7, %v3423_v39 }
 0x84f   : > { %v3461_v29 = vpack.c.bf16 %v3454_v22, %v3453_v0 }
 0x850   : > { %v4204_v5 = vpop.eup %4203 }
 0x851   : > { %3535 = vmatmul.bf16.vlgmr.msra.gmra.mxu1 %v3461_v29  ;;  %v3452_v12 = vadd.f32 1.0, %v4204_v5 }
 0x853   : > { %v3456_v24 = vmul.f32 %v3452_v12, %v3424_v25 }
 0x855   : > { %v3462_v51 = vpack.c.bf16 %v3456_v24, %v3455_v53 }
 0x857   : > { %3540 = vmatmul.bf16.vlgmr.msra.gmra.mxu2 %v3462_v51 }
 0x8ce   : > { %v3536_v16 = vpop.f32.mrf.mxu1 }
 0x8cf   : > { %v3546_v1 = vadd.f32 %v3536_v16, %v3457_v42 }
 0x8d1   : > { %3550 = vst.msk [vmem:[#allocation2] sm:$0xff] %vm3395_vm1, %v3546_v1 }
 0x8d6   : > { %v3538_v21 = vpop.f32.mrf.mxu1 }
 0x8d7   : > { %v3547_v48 = vadd.f32 %v3538_v21, %v3458_v35 }
 0x8d9   : > { %3551 = vst.msk [vmem:[#allocation2 + $0x8] sm:$0xff] %vm3395_vm1, %v3547_v48 }
 0x8da   : > { %v3541_v57 = vpop.f32.mrf.mxu2 }
 0x8db   : > { %v3548_v41 = vadd.f32 %v3541_v57, %v3459_v14 }
 0x8dd   : > { %3552 = vst.msk [vmem:[#allocation2 + $0x10] sm:$0xff] %vm3395_vm1, %v3548_v41 }
 0x8e1   : > { %3557 = sbr.rel (%p3859_p13) target bundleno = 2286 (0x8ee), region = 128 }
 0x8e2   : > { %v3543_v30 = vpop.f32.mrf.mxu2 }
 0x8e3   : > { %v3549_v56 = vadd.f32 %v3543_v30, %v3460_v37 }
 0x8e5   : > { %3553 = vst.msk [vmem:[#allocation2 + $0x18] sm:$0xff] %vm3395_vm1, %v3549_v56 }
 0x8e6   : > { %v3558_v26 = vld [vmem:[#allocation2] sm:$0xff]  ;;  %v3559_v52 = vld [vmem:[#allocation2 + $0x8] sm:$0xff]  ;;  %v3560_v49 = vld [vmem:[#allocation2 + $0x10] sm:$0xff] }
 0x8e7   : > { %3562 = vst.msk [vmem:[#allocation9] sm:$0xff] %vm3395_vm1, %v3558_v26 }
 0x8e8   : > { %3563 = vst.msk [vmem:[#allocation9 + $0x8] sm:$0xff] %vm3395_vm1, %v3559_v52 }
 0x8e9   : > { %3564 = vst.msk [vmem:[#allocation9 + $0x10] sm:$0xff] %vm3395_vm1, %v3560_v49 }
 0x8ec   : > { %v3561_v55 = vld [vmem:[#allocation2 + $0x18] sm:$0xff] }
 0x8ed   : > { %3565 = vst.msk [vmem:[#allocation9 + $0x18] sm:$0xff] %vm3395_vm1, %v3561_v55 }
 0x8ee PF: > { %s5705_s9 = sadd.s32 4294967295, %s4279_s29   ;;  %s3577_s27 = sshll.u32 %s5698_s13, 4  ;;  %s3578_s27 = int_to_ptr.hbm [resolvable:$true] %s3577_s27 }
 0x8ef   : > { %p3929_p0 = scmp.eq.s32.totalorder %s5705_s9, 2  ;;  %s4295_s20 = smov [#allocation9]  }
 0x8f0   : > { %s3575_s30 = sshll.u32 %s4295_s20, 4  ;;  %s4296_s16 = smov 128   ;;  %s3576_s30 = int_to_ptr.vmem [resolvable:$true] %s3575_s30 }
 0x8f1   : > { %s4297_s18 = smov 8  }
 0x8f2   : > { %3926 = dma.vmem_to_hbm [thread:$0]  (%p3929_p0), %s3576_s30, 512, %s3578_s27, [#allocation10], %s4296_s16, %s4296_s16, %s4297_s18  }
 0x8f3   : > { %4258 = dma.done.wait (%p3929_p0), [#allocation10], 512  }
 0x8f4   : > { %4260 = vsyncadd (%p3929_p0), [#allocation10], 4294966784 }
 0x8f5 PF: > { %s24_s29 = sadd.s32 1, %s4279_s29   ;;  %s5706_s27 = sld [smem:[#allocation12_spill]] }
 0x8f6   : > { %p21_p1 = scmp.ge.s32.totalorder %s24_s29, 5   ;;  %s5707_s28 = sld [smem:[#allocation13_spill]] }
 0x8f7   : > { %s5708_s25 = smov %s4267_s26  ;;  %s5709_s26 = smov %s4404_s17 }
 0x8f8   :  { %23 = sbr.rel (!%p21_p1) target bundleno = 5 (0x5), region = 189 }
 0x8fd   :  { %3594 = vsyncpa [#allocation10], 1 }
 0x8fe   :  { %3596 = vsyncpa [#allocation10 + $0x1], 1 }

</bundles_post_ra>
